<compile_context>
chip_gen: v7x
topology: tpu7x:2x2x1
jax: 0.10.0
libtpu: 0.0.40
codegen_flags: <defaults>
</compile_context>

<pallas_src>
import functools

import jax
import jax.numpy as jnp
from jax.experimental import pallas as pl
from jax.experimental.pallas import tpu as pltpu


# ---------------------------------------------------------------------------
# Fused forward kernel (one batch element per grid step)
# ---------------------------------------------------------------------------
def _cnn_forward_kernel(x_ref, w1_ref, b1_ref, w2_ref, b2_ref, wfc_ref, bfc_ref,
                        logits_ref, feat_ref):
    f32 = jnp.float32
    x = x_ref[...]                      # (1, 30, 1, 30)  = (b, h_pad, c=1, w_pad)
    bb = x.shape[0]                     # 1 (batch block)

    # ---------------- conv1: 3x3, 1->8, pad already applied, + bias + ReLU ----
    w1 = w1_ref[...]                    # (8, 9), column t = i*3 + j
    acc = None
    for i in range(3):
        for j in range(3):
            t = i * 3 + j
            sl = x[:, i:i + 28, :, j:j + 28]                 # (1,28,1,28)
            wc = w1[:, t:t + 1].reshape(1, 1, 8, 1)          # per-OC scalar column
            term = sl * wc                                   # (1,28,8,28)
            acc = term if acc is None else acc + term
    h1 = jnp.maximum(acc + b1_ref[...].reshape(1, 1, 8, 1), 0.0)   # (1,28,8,28)

    # ------------- maxpool 2x2 -> 14x14, fused with conv2 zero-pad -> 16x16 ---
    # W (lane) direction: pairwise max, then a 0/1 selection matmul that picks
    # even columns AND places them at offset 1 of a 16-wide (zero padded) row.
    wmax = jnp.maximum(h1[..., 0:27], h1[..., 1:28])         # (1,28,8,27)
    r_i = jax.lax.broadcasted_iota(jnp.int32, (27, 16), 0)
    c_i = jax.lax.broadcasted_iota(jnp.int32, (27, 16), 1)
    sel1 = jnp.where((c_i >= 1) & (c_i <= 14) & (r_i == 2 * (c_i - 1)),
                     1.0, 0.0).astype(f32)                   # (27,16)
    g1 = wmax.reshape(bb * 28, 8, 27)
    sel1b = jnp.broadcast_to(sel1[None], (bb * 28, 27, 16))
    pw = jnp.einsum('gcw,gwj->gcj', g1, sel1b,
                    preferred_element_type=f32).reshape(bb, 28, 8, 16)
    # H (major) direction: pairwise max, take even rows, add zero rows (pad=1).
    hmax = jnp.maximum(pw[:, 0:27], pw[:, 1:28])             # (1,27,8,16)
    zrow = jnp.zeros((bb, 1, 8, 16), f32)
    p1p = jnp.concatenate([zrow] + [hmax[:, 2 * k:2 * k + 1] for k in range(14)]
                          + [zrow], axis=1)                  # (1,16,8,16)

    # ---------------- conv2: 5x5, 8->16, + bias + ReLU (MXU) ------------------
    # in-VMEM im2col: 25 channel-aligned slices concatenated along the C axis.
    pieces = [p1p[:, i:i + 12, :, j:j + 12]
              for i in range(5) for j in range(5)]           # each (1,12,8,12)
    s2 = jnp.concatenate(pieces, axis=2)                     # (1,12,200,12)
    s2 = s2.reshape(bb * 12, 200, 12)                        # (12,200,12)
    w2 = jnp.broadcast_to(w2_ref[...][None], (bb * 12, 16, 200))
    h2 = jnp.einsum('goc,gcw->gow', w2, s2,
                    preferred_element_type=f32)              # (12,16,12)
    h2 = jnp.maximum(h2 + b2_ref[...][None], 0.0)            # bias (1,16,1)
    h2 = h2.reshape(bb, 12, 16, 12)

    # ---------------- maxpool 2x2 -> (1,6,16,6) -------------------------------
    wmax2 = jnp.maximum(h2[..., 0:11], h2[..., 1:12])        # (1,12,16,11)
    r2 = jax.lax.broadcasted_iota(jnp.int32, (11, 6), 0)
    c2 = jax.lax.broadcasted_iota(jnp.int32, (11, 6), 1)
    sel2 = jnp.where(r2 == 2 * c2, 1.0, 0.0).astype(f32)     # (11,6)
    g2 = wmax2.reshape(bb * 12, 16, 11)
    sel2b = jnp.broadcast_to(sel2[None], (bb * 12, 11, 6))
    pw2 = jnp.einsum('gcw,gwj->gcj', g2, sel2b,
                     preferred_element_type=f32).reshape(bb, 12, 16, 6)
    hmax2 = jnp.maximum(pw2[:, 0:11], pw2[:, 1:12])          # (1,11,16,6)
    p2 = jnp.concatenate([hmax2[:, 2 * k:2 * k + 1] for k in range(6)],
                         axis=1)                             # (1,6,16,6) = (b,h,c,w)

    feat_ref[...] = p2.astype(feat_ref.dtype)

    # ---------------- fc1 (576 -> 10), fused -----------------------------------
    # wfc is pre-arranged to (10, h, c, w) matching PyTorch's (c, h, w) flatten.
    prod = p2[:, None] * wfc_ref[...][None]                  # (1,10,6,16,6)
    s = jnp.sum(prod, axis=-1)                               # (1,10,6,16)
    s = jnp.sum(s, axis=-1)                                  # (1,10,6)
    s = jnp.sum(s, axis=-1)                                  # (1,10)
    logits_ref[...] = (s + bfc_ref[...]).reshape(bb, 1, 10).astype(logits_ref.dtype)


def _fused_forward(xp, w1, b1, w2, b2, wfc, bfc):
    B = xp.shape[0]
    logits3, feats = pl.pallas_call(
        _cnn_forward_kernel,
        out_shape=(jax.ShapeDtypeStruct((B, 1, 10), jnp.float32),
                   jax.ShapeDtypeStruct((B, 6, 16, 6), jnp.float32)),
        grid=(B,),
        in_specs=[
            pl.BlockSpec((1, 30, 1, 30), lambda b: (b, 0, 0, 0)),   # input (per batch)
            pl.BlockSpec((8, 9), lambda b: (0, 0)),                 # conv1 w
            pl.BlockSpec((8, 1), lambda b: (0, 0)),                 # conv1 b
            pl.BlockSpec((16, 200), lambda b: (0, 0)),              # conv2 w
            pl.BlockSpec((16, 1), lambda b: (0, 0)),                # conv2 b
            pl.BlockSpec((10, 6, 16, 6), lambda b: (0, 0, 0, 0)),   # fc1 w
            pl.BlockSpec((1, 10), lambda b: (0, 0)),                # fc1 b
        ],
        out_specs=(
            pl.BlockSpec((1, 1, 10), lambda b: (b, 0, 0)),
            pl.BlockSpec((1, 6, 16, 6), lambda b: (b, 0, 0, 0)),
        ),
        compiler_params=pltpu.CompilerParams(
            dimension_semantics=("parallel",)),
    )(xp, w1, b1, w2, b2, wfc, bfc)
    return logits3, feats


# ---------------------------------------------------------------------------
# Parameters (PyTorch layout) and one-time kernel-layout preparation
# ---------------------------------------------------------------------------
def init_params(key, in_channels=1, n_outputs=10):
    ks = jax.random.split(key, 6)
    scale = 0.1
    return {
        "conv1_w": scale * jax.random.normal(ks[0], (8, in_channels, 3, 3), jnp.float32),
        "conv1_b": scale * jax.random.normal(ks[1], (8,), jnp.float32),
        "conv2_w": scale * jax.random.normal(ks[2], (16, 8, 5, 5), jnp.float32),
        "conv2_b": scale * jax.random.normal(ks[3], (16,), jnp.float32),
        "fc1_w": scale * jax.random.normal(ks[4], (n_outputs, 16 * 6 * 6), jnp.float32),
        "fc1_b": scale * jax.random.normal(ks[5], (n_outputs,), jnp.float32),
    }


def prepare_params(params):
    """One-time re-layout of PyTorch-shaped weights into kernel layout."""
    return {
        "w1": params["conv1_w"].reshape(8, 9),                          # [oc, i*3+j]
        "b1": params["conv1_b"].reshape(8, 1),
        "w2": params["conv2_w"].transpose(0, 2, 3, 1).reshape(16, 200), # [oc, (i*5+j)*8+c]
        "b2": params["conv2_b"].reshape(16, 1),
        "wfc": params["fc1_w"].reshape(10, 16, 6, 6).transpose(0, 2, 1, 3),  # [o,h,c,w]
        "bfc": params["fc1_b"].reshape(1, 10),
    }


@functools.partial(jax.jit, static_argnames=("extract_feature",))
def forward(kparams, x, extract_feature=False):
    """x: (B, 1, 28, 28) NCHW float32 (28x28 implied by fc1 = 16*6*6)."""
    B = x.shape[0]
    assert x.shape[1:] == (1, 28, 28), x.shape
    # Pad once and move to (B, H, C, W) layout for the kernel (tiny, one XLA op).
    xp = jnp.pad(x, ((0, 0), (0, 0), (1, 1), (1, 1))).transpose(0, 2, 1, 3)  # (B,30,1,30)
    logits3, feats = _fused_forward(xp, kparams["w1"], kparams["b1"],
                                    kparams["w2"], kparams["b2"],
                                    kparams["wfc"], kparams["bfc"])
    if extract_feature:
        # kernel layout (b,h,c,w) -> PyTorch flatten order (c,h,w)
        return feats.transpose(0, 2, 1, 3).reshape(B, 16 * 6 * 6)
    return logits3.reshape(B, 10)


# ---------------------------------------------------------------------------
# Pure-JAX reference (matches the PyTorch module) for validation
# ---------------------------------------------------------------------------
def reference_forward(params, x, extract_feature=False):
    dn = ("NCHW", "OIHW", "NCHW")
    out = jax.lax.conv_general_dilated(x, params["conv1_w"], (1, 1),
                                       ((1, 1), (1, 1)), dimension_numbers=dn)
    out = jnp.maximum(out + params["conv1_b"][None, :, None, None], 0.0)
    out = jax.lax.reduce_window(out, -jnp.inf, jax.lax.max,
                                (1, 1, 2, 2), (1, 1, 2, 2), "VALID")
    out = jax.lax.conv_general_dilated(out, params["conv2_w"], (1, 1),
                                       ((1, 1), (1, 1)), dimension_numbers=dn)
    out = jnp.maximum(out + params["conv2_b"][None, :, None, None], 0.0)
    out = jax.lax.reduce_window(out, -jnp.inf, jax.lax.max,
                                (1, 1, 2, 2), (1, 1, 2, 2), "VALID")
    flat = out.reshape(out.shape[0], -1)
    if extract_feature:
        return flat
    return flat @ params["fc1_w"].T + params["fc1_b"]


if __name__ == "__main__":
    key = jax.random.PRNGKey(0)
    k_param, k_x = jax.random.split(key)
    params = init_params(k_param)
    kparams = prepare_params(params)

    # fc1 (16*6*6) implies 28x28 inputs: batch=2, 1 channel, 28x28.
    x = jax.random.normal(k_x, (2, 1, 28, 28), jnp.float32)

    logits = forward(kparams, x)
    jax.block_until_ready(logits)
    assert logits.shape == (2, 10), logits.shape

    feats = forward(kparams, x, extract_feature=True)
    jax.block_until_ready(feats)
    assert feats.shape == (2, 576), feats.shape

    # Validate against the pure-JAX reference of the PyTorch module.
    ref_logits = reference_forward(params, x)
    ref_feats = reference_forward(params, x, extract_feature=True)
    assert bool(jnp.allclose(logits, ref_logits, atol=1e-3, rtol=1e-3)), \
        float(jnp.max(jnp.abs(logits - ref_logits)))
    assert bool(jnp.allclose(feats, ref_feats, atol=1e-3, rtol=1e-3)), \
        float(jnp.max(jnp.abs(feats - ref_feats)))

    print("KERNEL_OK")
</pallas_src>

<mosaic_0001>
module attributes {stable_mosaic.version = 11 : i64} {
  func.func @_cnn_forward_kernel(%arg0: i32, %arg1: memref<1x30x1x30xf32, #tpu.memory_space<vmem>>, %arg2: memref<8x9xf32, #tpu.memory_space<vmem>>, %arg3: memref<8x1xf32, #tpu.memory_space<vmem>>, %arg4: memref<16x200xf32, #tpu.memory_space<vmem>>, %arg5: memref<16x1xf32, #tpu.memory_space<vmem>>, %arg6: memref<10x6x16x6xf32, #tpu.memory_space<vmem>>, %arg7: memref<1x10xf32, #tpu.memory_space<vmem>>, %arg8: memref<1x1x10xf32, #tpu.memory_space<vmem>>, %arg9: memref<1x6x16x6xf32, #tpu.memory_space<vmem>>) attributes {dimension_semantics = [#tpu.dimension_semantics<parallel>], iteration_bounds = array<i64: 2>, scalar_prefetch = 0 : i64, scratch_operands = 0 : i64, tpu.core_type = #tpu.core_type<tc>, window_params = [{transform_indices = @transform_0, window_bounds = array<i64: 1, 30, 1, 30>}, {pipeline_mode = #tpu.pipeline_mode<synchronous>, transform_indices = @transform_1, window_bounds = array<i64: 8, 9>}, {pipeline_mode = #tpu.pipeline_mode<synchronous>, transform_indices = @transform_2, window_bounds = array<i64: 8, 1>}, {pipeline_mode = #tpu.pipeline_mode<synchronous>, transform_indices = @transform_3, window_bounds = array<i64: 16, 200>}, {pipeline_mode = #tpu.pipeline_mode<synchronous>, transform_indices = @transform_4, window_bounds = array<i64: 16, 1>}, {pipeline_mode = #tpu.pipeline_mode<synchronous>, transform_indices = @transform_5, window_bounds = array<i64: 10, 6, 16, 6>}, {pipeline_mode = #tpu.pipeline_mode<synchronous>, transform_indices = @transform_6, window_bounds = array<i64: 1, 10>}, {transform_indices = @transform_7, window_bounds = array<i64: 1, 1, 10>}, {transform_indices = @transform_8, window_bounds = array<i64: 1, 6, 16, 6>}]} {
    %c0 = arith.constant 0 : index
    %c0_0 = arith.constant 0 : index
    %c0_1 = arith.constant 0 : index
    %c0_2 = arith.constant 0 : index
    %0 = vector.load %arg1[%c0, %c0_0, %c0_1, %c0_2] : memref<1x30x1x30xf32, #tpu.memory_space<vmem>>, vector<1x30x1x30xf32>
    %c0_3 = arith.constant 0 : index
    %c0_4 = arith.constant 0 : index
    %1 = vector.load %arg2[%c0_3, %c0_4] : memref<8x9xf32, #tpu.memory_space<vmem>>, vector<8x9xf32>
    %2 = vector.extract_strided_slice %0 {offsets = [0, 0, 0, 0], sizes = [1, 28, 1, 28], strides = [1, 1, 1, 1]} : vector<1x30x1x30xf32> to vector<1x28x1x28xf32>
    %3 = vector.extract_strided_slice %1 {offsets = [0, 0], sizes = [8, 1], strides = [1, 1]} : vector<8x9xf32> to vector<8x1xf32>
    %4 = vector.shape_cast %3 : vector<8x1xf32> to vector<1x1x8x1xf32>
    %5 = vector.broadcast %2 : vector<1x28x1x28xf32> to vector<1x28x8x28xf32>
    %6 = vector.broadcast %4 : vector<1x1x8x1xf32> to vector<1x28x8x28xf32>
    %7 = arith.mulf %5, %6 : vector<1x28x8x28xf32>
    %8 = vector.extract_strided_slice %0 {offsets = [0, 0, 0, 1], sizes = [1, 28, 1, 28], strides = [1, 1, 1, 1]} : vector<1x30x1x30xf32> to vector<1x28x1x28xf32>
    %9 = vector.extract_strided_slice %1 {offsets = [0, 1], sizes = [8, 1], strides = [1, 1]} : vector<8x9xf32> to vector<8x1xf32>
    %10 = vector.shape_cast %9 : vector<8x1xf32> to vector<1x1x8x1xf32>
    %11 = vector.broadcast %8 : vector<1x28x1x28xf32> to vector<1x28x8x28xf32>
    %12 = vector.broadcast %10 : vector<1x1x8x1xf32> to vector<1x28x8x28xf32>
    %13 = arith.mulf %11, %12 : vector<1x28x8x28xf32>
    %14 = arith.addf %7, %13 : vector<1x28x8x28xf32>
    %15 = vector.extract_strided_slice %0 {offsets = [0, 0, 0, 2], sizes = [1, 28, 1, 28], strides = [1, 1, 1, 1]} : vector<1x30x1x30xf32> to vector<1x28x1x28xf32>
    %16 = vector.extract_strided_slice %1 {offsets = [0, 2], sizes = [8, 1], strides = [1, 1]} : vector<8x9xf32> to vector<8x1xf32>
    %17 = vector.shape_cast %16 : vector<8x1xf32> to vector<1x1x8x1xf32>
    %18 = vector.broadcast %15 : vector<1x28x1x28xf32> to vector<1x28x8x28xf32>
    %19 = vector.broadcast %17 : vector<1x1x8x1xf32> to vector<1x28x8x28xf32>
    %20 = arith.mulf %18, %19 : vector<1x28x8x28xf32>
    %21 = arith.addf %14, %20 : vector<1x28x8x28xf32>
    %22 = vector.extract_strided_slice %0 {offsets = [0, 1, 0, 0], sizes = [1, 28, 1, 28], strides = [1, 1, 1, 1]} : vector<1x30x1x30xf32> to vector<1x28x1x28xf32>
    %23 = vector.extract_strided_slice %1 {offsets = [0, 3], sizes = [8, 1], strides = [1, 1]} : vector<8x9xf32> to vector<8x1xf32>
    %24 = vector.shape_cast %23 : vector<8x1xf32> to vector<1x1x8x1xf32>
    %25 = vector.broadcast %22 : vector<1x28x1x28xf32> to vector<1x28x8x28xf32>
    %26 = vector.broadcast %24 : vector<1x1x8x1xf32> to vector<1x28x8x28xf32>
    %27 = arith.mulf %25, %26 : vector<1x28x8x28xf32>
    %28 = arith.addf %21, %27 : vector<1x28x8x28xf32>
    %29 = vector.extract_strided_slice %0 {offsets = [0, 1, 0, 1], sizes = [1, 28, 1, 28], strides = [1, 1, 1, 1]} : vector<1x30x1x30xf32> to vector<1x28x1x28xf32>
    %30 = vector.extract_strided_slice %1 {offsets = [0, 4], sizes = [8, 1], strides = [1, 1]} : vector<8x9xf32> to vector<8x1xf32>
    %31 = vector.shape_cast %30 : vector<8x1xf32> to vector<1x1x8x1xf32>
    %32 = vector.broadcast %29 : vector<1x28x1x28xf32> to vector<1x28x8x28xf32>
    %33 = vector.broadcast %31 : vector<1x1x8x1xf32> to vector<1x28x8x28xf32>
    %34 = arith.mulf %32, %33 : vector<1x28x8x28xf32>
    %35 = arith.addf %28, %34 : vector<1x28x8x28xf32>
    %36 = vector.extract_strided_slice %0 {offsets = [0, 1, 0, 2], sizes = [1, 28, 1, 28], strides = [1, 1, 1, 1]} : vector<1x30x1x30xf32> to vector<1x28x1x28xf32>
    %37 = vector.extract_strided_slice %1 {offsets = [0, 5], sizes = [8, 1], strides = [1, 1]} : vector<8x9xf32> to vector<8x1xf32>
    %38 = vector.shape_cast %37 : vector<8x1xf32> to vector<1x1x8x1xf32>
    %39 = vector.broadcast %36 : vector<1x28x1x28xf32> to vector<1x28x8x28xf32>
    %40 = vector.broadcast %38 : vector<1x1x8x1xf32> to vector<1x28x8x28xf32>
    %41 = arith.mulf %39, %40 : vector<1x28x8x28xf32>
    %42 = arith.addf %35, %41 : vector<1x28x8x28xf32>
    %43 = vector.extract_strided_slice %0 {offsets = [0, 2, 0, 0], sizes = [1, 28, 1, 28], strides = [1, 1, 1, 1]} : vector<1x30x1x30xf32> to vector<1x28x1x28xf32>
    %44 = vector.extract_strided_slice %1 {offsets = [0, 6], sizes = [8, 1], strides = [1, 1]} : vector<8x9xf32> to vector<8x1xf32>
    %45 = vector.shape_cast %44 : vector<8x1xf32> to vector<1x1x8x1xf32>
    %46 = vector.broadcast %43 : vector<1x28x1x28xf32> to vector<1x28x8x28xf32>
    %47 = vector.broadcast %45 : vector<1x1x8x1xf32> to vector<1x28x8x28xf32>
    %48 = arith.mulf %46, %47 : vector<1x28x8x28xf32>
    %49 = arith.addf %42, %48 : vector<1x28x8x28xf32>
    %50 = vector.extract_strided_slice %0 {offsets = [0, 2, 0, 1], sizes = [1, 28, 1, 28], strides = [1, 1, 1, 1]} : vector<1x30x1x30xf32> to vector<1x28x1x28xf32>
    %51 = vector.extract_strided_slice %1 {offsets = [0, 7], sizes = [8, 1], strides = [1, 1]} : vector<8x9xf32> to vector<8x1xf32>
    %52 = vector.shape_cast %51 : vector<8x1xf32> to vector<1x1x8x1xf32>
    %53 = vector.broadcast %50 : vector<1x28x1x28xf32> to vector<1x28x8x28xf32>
    %54 = vector.broadcast %52 : vector<1x1x8x1xf32> to vector<1x28x8x28xf32>
    %55 = arith.mulf %53, %54 : vector<1x28x8x28xf32>
    %56 = arith.addf %49, %55 : vector<1x28x8x28xf32>
    %57 = vector.extract_strided_slice %0 {offsets = [0, 2, 0, 2], sizes = [1, 28, 1, 28], strides = [1, 1, 1, 1]} : vector<1x30x1x30xf32> to vector<1x28x1x28xf32>
    %58 = vector.extract_strided_slice %1 {offsets = [0, 8], sizes = [8, 1], strides = [1, 1]} : vector<8x9xf32> to vector<8x1xf32>
    %59 = vector.shape_cast %58 : vector<8x1xf32> to vector<1x1x8x1xf32>
    %60 = vector.broadcast %57 : vector<1x28x1x28xf32> to vector<1x28x8x28xf32>
    %61 = vector.broadcast %59 : vector<1x1x8x1xf32> to vector<1x28x8x28xf32>
    %62 = arith.mulf %60, %61 : vector<1x28x8x28xf32>
    %63 = arith.addf %56, %62 : vector<1x28x8x28xf32>
    %c0_5 = arith.constant 0 : index
    %c0_6 = arith.constant 0 : index
    %64 = vector.load %arg3[%c0_5, %c0_6] : memref<8x1xf32, #tpu.memory_space<vmem>>, vector<8x1xf32>
    %65 = vector.shape_cast %64 : vector<8x1xf32> to vector<1x1x8x1xf32>
    %66 = vector.broadcast %65 : vector<1x1x8x1xf32> to vector<1x28x8x28xf32>
    %67 = arith.addf %63, %66 : vector<1x28x8x28xf32>
    %cst = arith.constant 0.000000e+00 : f32
    %68 = vector.broadcast %cst : f32 to vector<1x28x8x28xf32>
    %69 = arith.maximumf %67, %68 : vector<1x28x8x28xf32>
    %70 = vector.extract_strided_slice %69 {offsets = [0, 0, 0, 0], sizes = [1, 28, 8, 27], strides = [1, 1, 1, 1]} : vector<1x28x8x28xf32> to vector<1x28x8x27xf32>
    %71 = vector.extract_strided_slice %69 {offsets = [0, 0, 0, 1], sizes = [1, 28, 8, 27], strides = [1, 1, 1, 1]} : vector<1x28x8x28xf32> to vector<1x28x8x27xf32>
    %72 = arith.maximumf %70, %71 : vector<1x28x8x27xf32>
    %73 = tpu.iota {dimensions = array<i32: 0>} : vector<27x16xi32>
    %74 = tpu.iota {dimensions = array<i32: 1>} : vector<27x16xi32>
    %c1_i32 = arith.constant 1 : i32
    %75 = vector.broadcast %c1_i32 : i32 to vector<27x16xi32>
    %76 = arith.cmpi sge, %74, %75 : vector<27x16xi32>
    %c14_i32 = arith.constant 14 : i32
    %77 = vector.broadcast %c14_i32 : i32 to vector<27x16xi32>
    %78 = arith.cmpi sle, %74, %77 : vector<27x16xi32>
    %79 = arith.andi %76, %78 : vector<27x16xi1>
    %c1_i32_7 = arith.constant 1 : i32
    %80 = vector.broadcast %c1_i32_7 : i32 to vector<27x16xi32>
    %81 = arith.subi %74, %80 : vector<27x16xi32>
    %c2_i32 = arith.constant 2 : i32
    %82 = vector.broadcast %c2_i32 : i32 to vector<27x16xi32>
    %83 = arith.muli %82, %81 : vector<27x16xi32>
    %84 = arith.cmpi eq, %73, %83 : vector<27x16xi32>
    %85 = arith.andi %79, %84 : vector<27x16xi1>
    %cst_8 = arith.constant 1.000000e+00 : f32
    %cst_9 = arith.constant 0.000000e+00 : f32
    %86 = vector.broadcast %cst_8 : f32 to vector<27x16xf32>
    %87 = vector.broadcast %cst_9 : f32 to vector<27x16xf32>
    %88 = arith.select %85, %86, %87 : vector<27x16xi1>, vector<27x16xf32>
    %89 = vector.shape_cast %72 : vector<1x28x8x27xf32> to vector<28x8x27xf32>
    %90 = vector.shape_cast %88 : vector<27x16xf32> to vector<1x27x16xf32>
    %91 = vector.shape_cast %90 : vector<1x27x16xf32> to vector<1x27x16xf32>
    %92 = vector.broadcast %91 : vector<1x27x16xf32> to vector<28x27x16xf32>
    "tpu.trace_start"() <{level = 10 : i32, message = "gcw,gwj->gcj"}> : () -> ()
    %cst_10 = arith.constant dense<0.000000e+00> : vector<28x8x16xf32>
    %93 = tpu.matmul %89, %92, %cst_10 {dimension_numbers = #tpu.dot_dimension_numbers<[2], [1], [1], [2], [0, 0, 0, 1, 1, 2], [0], [0]>} : vector<28x8x27xf32>, vector<28x27x16xf32>, vector<28x8x16xf32> -> vector<28x8x16xf32>
    "tpu.trace_stop"() : () -> ()
    %94 = vector.shape_cast %93 : vector<28x8x16xf32> to vector<1x28x8x16xf32>
    %95 = vector.extract_strided_slice %94 {offsets = [0, 0, 0, 0], sizes = [1, 27, 8, 16], strides = [1, 1, 1, 1]} : vector<1x28x8x16xf32> to vector<1x27x8x16xf32>
    %96 = vector.extract_strided_slice %94 {offsets = [0, 1, 0, 0], sizes = [1, 27, 8, 16], strides = [1, 1, 1, 1]} : vector<1x28x8x16xf32> to vector<1x27x8x16xf32>
    %97 = arith.maximumf %95, %96 : vector<1x27x8x16xf32>
    %cst_11 = arith.constant 0.000000e+00 : f32
    %98 = vector.broadcast %cst_11 : f32 to vector<1x1x8x16xf32>
    %99 = vector.extract_strided_slice %97 {offsets = [0, 0, 0, 0], sizes = [1, 1, 8, 16], strides = [1, 1, 1, 1]} : vector<1x27x8x16xf32> to vector<1x1x8x16xf32>
    %100 = vector.extract_strided_slice %97 {offsets = [0, 2, 0, 0], sizes = [1, 1, 8, 16], strides = [1, 1, 1, 1]} : vector<1x27x8x16xf32> to vector<1x1x8x16xf32>
    %101 = vector.extract_strided_slice %97 {offsets = [0, 4, 0, 0], sizes = [1, 1, 8, 16], strides = [1, 1, 1, 1]} : vector<1x27x8x16xf32> to vector<1x1x8x16xf32>
    %102 = vector.extract_strided_slice %97 {offsets = [0, 6, 0, 0], sizes = [1, 1, 8, 16], strides = [1, 1, 1, 1]} : vector<1x27x8x16xf32> to vector<1x1x8x16xf32>
    %103 = vector.extract_strided_slice %97 {offsets = [0, 8, 0, 0], sizes = [1, 1, 8, 16], strides = [1, 1, 1, 1]} : vector<1x27x8x16xf32> to vector<1x1x8x16xf32>
    %104 = vector.extract_strided_slice %97 {offsets = [0, 10, 0, 0], sizes = [1, 1, 8, 16], strides = [1, 1, 1, 1]} : vector<1x27x8x16xf32> to vector<1x1x8x16xf32>
    %105 = vector.extract_strided_slice %97 {offsets = [0, 12, 0, 0], sizes = [1, 1, 8, 16], strides = [1, 1, 1, 1]} : vector<1x27x8x16xf32> to vector<1x1x8x16xf32>
    %106 = vector.extract_strided_slice %97 {offsets = [0, 14, 0, 0], sizes = [1, 1, 8, 16], strides = [1, 1, 1, 1]} : vector<1x27x8x16xf32> to vector<1x1x8x16xf32>
    %107 = vector.extract_strided_slice %97 {offsets = [0, 16, 0, 0], sizes = [1, 1, 8, 16], strides = [1, 1, 1, 1]} : vector<1x27x8x16xf32> to vector<1x1x8x16xf32>
    %108 = vector.extract_strided_slice %97 {offsets = [0, 18, 0, 0], sizes = [1, 1, 8, 16], strides = [1, 1, 1, 1]} : vector<1x27x8x16xf32> to vector<1x1x8x16xf32>
    %109 = vector.extract_strided_slice %97 {offsets = [0, 20, 0, 0], sizes = [1, 1, 8, 16], strides = [1, 1, 1, 1]} : vector<1x27x8x16xf32> to vector<1x1x8x16xf32>
    %110 = vector.extract_strided_slice %97 {offsets = [0, 22, 0, 0], sizes = [1, 1, 8, 16], strides = [1, 1, 1, 1]} : vector<1x27x8x16xf32> to vector<1x1x8x16xf32>
    %111 = vector.extract_strided_slice %97 {offsets = [0, 24, 0, 0], sizes = [1, 1, 8, 16], strides = [1, 1, 1, 1]} : vector<1x27x8x16xf32> to vector<1x1x8x16xf32>
    %112 = vector.extract_strided_slice %97 {offsets = [0, 26, 0, 0], sizes = [1, 1, 8, 16], strides = [1, 1, 1, 1]} : vector<1x27x8x16xf32> to vector<1x1x8x16xf32>
    %113 = tpu.concatenate %98, %99, %100, %101, %102, %103, %104, %105, %106, %107, %108, %109, %110, %111, %112, %98 in 1 : vector<1x1x8x16xf32>, vector<1x1x8x16xf32>, vector<1x1x8x16xf32>, vector<1x1x8x16xf32>, vector<1x1x8x16xf32>, vector<1x1x8x16xf32>, vector<1x1x8x16xf32>, vector<1x1x8x16xf32>, vector<1x1x8x16xf32>, vector<1x1x8x16xf32>, vector<1x1x8x16xf32>, vector<1x1x8x16xf32>, vector<1x1x8x16xf32>, vector<1x1x8x16xf32>, vector<1x1x8x16xf32>, vector<1x1x8x16xf32> -> vector<1x16x8x16xf32>
    %114 = vector.extract_strided_slice %113 {offsets = [0, 0, 0, 0], sizes = [1, 12, 8, 12], strides = [1, 1, 1, 1]} : vector<1x16x8x16xf32> to vector<1x12x8x12xf32>
    %115 = vector.extract_strided_slice %113 {offsets = [0, 0, 0, 1], sizes = [1, 12, 8, 12], strides = [1, 1, 1, 1]} : vector<1x16x8x16xf32> to vector<1x12x8x12xf32>
    %116 = vector.extract_strided_slice %113 {offsets = [0, 0, 0, 2], sizes = [1, 12, 8, 12], strides = [1, 1, 1, 1]} : vector<1x16x8x16xf32> to vector<1x12x8x12xf32>
    %117 = vector.extract_strided_slice %113 {offsets = [0, 0, 0, 3], sizes = [1, 12, 8, 12], strides = [1, 1, 1, 1]} : vector<1x16x8x16xf32> to vector<1x12x8x12xf32>
    %118 = vector.extract_strided_slice %113 {offsets = [0, 0, 0, 4], sizes = [1, 12, 8, 12], strides = [1, 1, 1, 1]} : vector<1x16x8x16xf32> to vector<1x12x8x12xf32>
    %119 = vector.extract_strided_slice %113 {offsets = [0, 1, 0, 0], sizes = [1, 12, 8, 12], strides = [1, 1, 1, 1]} : vector<1x16x8x16xf32> to vector<1x12x8x12xf32>
    %120 = vector.extract_strided_slice %113 {offsets = [0, 1, 0, 1], sizes = [1, 12, 8, 12], strides = [1, 1, 1, 1]} : vector<1x16x8x16xf32> to vector<1x12x8x12xf32>
    %121 = vector.extract_strided_slice %113 {offsets = [0, 1, 0, 2], sizes = [1, 12, 8, 12], strides = [1, 1, 1, 1]} : vector<1x16x8x16xf32> to vector<1x12x8x12xf32>
    %122 = vector.extract_strided_slice %113 {offsets = [0, 1, 0, 3], sizes = [1, 12, 8, 12], strides = [1, 1, 1, 1]} : vector<1x16x8x16xf32> to vector<1x12x8x12xf32>
    %123 = vector.extract_strided_slice %113 {offsets = [0, 1, 0, 4], sizes = [1, 12, 8, 12], strides = [1, 1, 1, 1]} : vector<1x16x8x16xf32> to vector<1x12x8x12xf32>
    %124 = vector.extract_strided_slice %113 {offsets = [0, 2, 0, 0], sizes = [1, 12, 8, 12], strides = [1, 1, 1, 1]} : vector<1x16x8x16xf32> to vector<1x12x8x12xf32>
    %125 = vector.extract_strided_slice %113 {offsets = [0, 2, 0, 1], sizes = [1, 12, 8, 12], strides = [1, 1, 1, 1]} : vector<1x16x8x16xf32> to vector<1x12x8x12xf32>
    %126 = vector.extract_strided_slice %113 {offsets = [0, 2, 0, 2], sizes = [1, 12, 8, 12], strides = [1, 1, 1, 1]} : vector<1x16x8x16xf32> to vector<1x12x8x12xf32>
    %127 = vector.extract_strided_slice %113 {offsets = [0, 2, 0, 3], sizes = [1, 12, 8, 12], strides = [1, 1, 1, 1]} : vector<1x16x8x16xf32> to vector<1x12x8x12xf32>
    %128 = vector.extract_strided_slice %113 {offsets = [0, 2, 0, 4], sizes = [1, 12, 8, 12], strides = [1, 1, 1, 1]} : vector<1x16x8x16xf32> to vector<1x12x8x12xf32>
    %129 = vector.extract_strided_slice %113 {offsets = [0, 3, 0, 0], sizes = [1, 12, 8, 12], strides = [1, 1, 1, 1]} : vector<1x16x8x16xf32> to vector<1x12x8x12xf32>
    %130 = vector.extract_strided_slice %113 {offsets = [0, 3, 0, 1], sizes = [1, 12, 8, 12], strides = [1, 1, 1, 1]} : vector<1x16x8x16xf32> to vector<1x12x8x12xf32>
    %131 = vector.extract_strided_slice %113 {offsets = [0, 3, 0, 2], sizes = [1, 12, 8, 12], strides = [1, 1, 1, 1]} : vector<1x16x8x16xf32> to vector<1x12x8x12xf32>
    %132 = vector.extract_strided_slice %113 {offsets = [0, 3, 0, 3], sizes = [1, 12, 8, 12], strides = [1, 1, 1, 1]} : vector<1x16x8x16xf32> to vector<1x12x8x12xf32>
    %133 = vector.extract_strided_slice %113 {offsets = [0, 3, 0, 4], sizes = [1, 12, 8, 12], strides = [1, 1, 1, 1]} : vector<1x16x8x16xf32> to vector<1x12x8x12xf32>
    %134 = vector.extract_strided_slice %113 {offsets = [0, 4, 0, 0], sizes = [1, 12, 8, 12], strides = [1, 1, 1, 1]} : vector<1x16x8x16xf32> to vector<1x12x8x12xf32>
    %135 = vector.extract_strided_slice %113 {offsets = [0, 4, 0, 1], sizes = [1, 12, 8, 12], strides = [1, 1, 1, 1]} : vector<1x16x8x16xf32> to vector<1x12x8x12xf32>
    %136 = vector.extract_strided_slice %113 {offsets = [0, 4, 0, 2], sizes = [1, 12, 8, 12], strides = [1, 1, 1, 1]} : vector<1x16x8x16xf32> to vector<1x12x8x12xf32>
    %137 = vector.extract_strided_slice %113 {offsets = [0, 4, 0, 3], sizes = [1, 12, 8, 12], strides = [1, 1, 1, 1]} : vector<1x16x8x16xf32> to vector<1x12x8x12xf32>
    %138 = vector.extract_strided_slice %113 {offsets = [0, 4, 0, 4], sizes = [1, 12, 8, 12], strides = [1, 1, 1, 1]} : vector<1x16x8x16xf32> to vector<1x12x8x12xf32>
    %139 = tpu.concatenate %114, %115, %116, %117, %118, %119, %120, %121, %122, %123, %124, %125, %126, %127, %128, %129 in 2 : vector<1x12x8x12xf32>, vector<1x12x8x12xf32>, vector<1x12x8x12xf32>, vector<1x12x8x12xf32>, vector<1x12x8x12xf32>, vector<1x12x8x12xf32>, vector<1x12x8x12xf32>, vector<1x12x8x12xf32>, vector<1x12x8x12xf32>, vector<1x12x8x12xf32>, vector<1x12x8x12xf32>, vector<1x12x8x12xf32>, vector<1x12x8x12xf32>, vector<1x12x8x12xf32>, vector<1x12x8x12xf32>, vector<1x12x8x12xf32> -> vector<1x12x128x12xf32>
    %140 = tpu.concatenate %130, %131, %132, %133, %134, %135, %136, %137, %138 in 2 : vector<1x12x8x12xf32>, vector<1x12x8x12xf32>, vector<1x12x8x12xf32>, vector<1x12x8x12xf32>, vector<1x12x8x12xf32>, vector<1x12x8x12xf32>, vector<1x12x8x12xf32>, vector<1x12x8x12xf32>, vector<1x12x8x12xf32> -> vector<1x12x72x12xf32>
    %141 = tpu.concatenate %139, %140 in 2 : vector<1x12x128x12xf32>, vector<1x12x72x12xf32> -> vector<1x12x200x12xf32>
    %142 = vector.shape_cast %141 : vector<1x12x200x12xf32> to vector<12x200x12xf32>
    %c0_12 = arith.constant 0 : index
    %c0_13 = arith.constant 0 : index
    %143 = vector.load %arg4[%c0_12, %c0_13] : memref<16x200xf32, #tpu.memory_space<vmem>>, vector<16x200xf32>
    %144 = vector.shape_cast %143 : vector<16x200xf32> to vector<1x16x200xf32>
    %145 = vector.shape_cast %144 : vector<1x16x200xf32> to vector<1x16x200xf32>
    %146 = vector.broadcast %145 : vector<1x16x200xf32> to vector<12x16x200xf32>
    "tpu.trace_start"() <{level = 10 : i32, message = "goc,gcw->gow"}> : () -> ()
    %cst_14 = arith.constant dense<0.000000e+00> : vector<12x16x12xf32>
    %147 = tpu.matmul %146, %142, %cst_14 {dimension_numbers = #tpu.dot_dimension_numbers<[2], [1], [1], [2], [0, 0, 0, 1, 1, 2], [0], [0]>} : vector<12x16x200xf32>, vector<12x200x12xf32>, vector<12x16x12xf32> -> vector<12x16x12xf32>
    "tpu.trace_stop"() : () -> ()
    %c0_15 = arith.constant 0 : index
    %c0_16 = arith.constant 0 : index
    %148 = vector.load %arg5[%c0_15, %c0_16] : memref<16x1xf32, #tpu.memory_space<vmem>>, vector<16x1xf32>
    %149 = vector.shape_cast %148 : vector<16x1xf32> to vector<1x16x1xf32>
    %150 = vector.broadcast %149 : vector<1x16x1xf32> to vector<12x16x12xf32>
    %151 = arith.addf %147, %150 : vector<12x16x12xf32>
    %cst_17 = arith.constant 0.000000e+00 : f32
    %152 = vector.broadcast %cst_17 : f32 to vector<12x16x12xf32>
    %153 = arith.maximumf %151, %152 : vector<12x16x12xf32>
    %154 = vector.shape_cast %153 : vector<12x16x12xf32> to vector<1x12x16x12xf32>
    %155 = vector.extract_strided_slice %154 {offsets = [0, 0, 0, 0], sizes = [1, 12, 16, 11], strides = [1, 1, 1, 1]} : vector<1x12x16x12xf32> to vector<1x12x16x11xf32>
    %156 = vector.extract_strided_slice %154 {offsets = [0, 0, 0, 1], sizes = [1, 12, 16, 11], strides = [1, 1, 1, 1]} : vector<1x12x16x12xf32> to vector<1x12x16x11xf32>
    %157 = arith.maximumf %155, %156 : vector<1x12x16x11xf32>
    %158 = tpu.iota {dimensions = array<i32: 0>} : vector<11x6xi32>
    %159 = tpu.iota {dimensions = array<i32: 1>} : vector<11x6xi32>
    %c2_i32_18 = arith.constant 2 : i32
    %160 = vector.broadcast %c2_i32_18 : i32 to vector<11x6xi32>
    %161 = arith.muli %160, %159 : vector<11x6xi32>
    %162 = arith.cmpi eq, %158, %161 : vector<11x6xi32>
    %cst_19 = arith.constant 1.000000e+00 : f32
    %cst_20 = arith.constant 0.000000e+00 : f32
    %163 = vector.broadcast %cst_19 : f32 to vector<11x6xf32>
    %164 = vector.broadcast %cst_20 : f32 to vector<11x6xf32>
    %165 = arith.select %162, %163, %164 : vector<11x6xi1>, vector<11x6xf32>
    %166 = vector.shape_cast %157 : vector<1x12x16x11xf32> to vector<12x16x11xf32>
    %167 = vector.shape_cast %165 : vector<11x6xf32> to vector<1x11x6xf32>
    %168 = vector.shape_cast %167 : vector<1x11x6xf32> to vector<1x11x6xf32>
    %169 = vector.broadcast %168 : vector<1x11x6xf32> to vector<12x11x6xf32>
    "tpu.trace_start"() <{level = 10 : i32, message = "gcw,gwj->gcj"}> : () -> ()
    %cst_21 = arith.constant dense<0.000000e+00> : vector<12x16x6xf32>
    %170 = tpu.matmul %166, %169, %cst_21 {dimension_numbers = #tpu.dot_dimension_numbers<[2], [1], [1], [2], [0, 0, 0, 1, 1, 2], [0], [0]>} : vector<12x16x11xf32>, vector<12x11x6xf32>, vector<12x16x6xf32> -> vector<12x16x6xf32>
    "tpu.trace_stop"() : () -> ()
    %171 = vector.shape_cast %170 : vector<12x16x6xf32> to vector<1x12x16x6xf32>
    %172 = vector.extract_strided_slice %171 {offsets = [0, 0, 0, 0], sizes = [1, 11, 16, 6], strides = [1, 1, 1, 1]} : vector<1x12x16x6xf32> to vector<1x11x16x6xf32>
    %173 = vector.extract_strided_slice %171 {offsets = [0, 1, 0, 0], sizes = [1, 11, 16, 6], strides = [1, 1, 1, 1]} : vector<1x12x16x6xf32> to vector<1x11x16x6xf32>
    %174 = arith.maximumf %172, %173 : vector<1x11x16x6xf32>
    %175 = vector.extract_strided_slice %174 {offsets = [0, 0, 0, 0], sizes = [1, 1, 16, 6], strides = [1, 1, 1, 1]} : vector<1x11x16x6xf32> to vector<1x1x16x6xf32>
    %176 = vector.extract_strided_slice %174 {offsets = [0, 2, 0, 0], sizes = [1, 1, 16, 6], strides = [1, 1, 1, 1]} : vector<1x11x16x6xf32> to vector<1x1x16x6xf32>
    %177 = vector.extract_strided_slice %174 {offsets = [0, 4, 0, 0], sizes = [1, 1, 16, 6], strides = [1, 1, 1, 1]} : vector<1x11x16x6xf32> to vector<1x1x16x6xf32>
    %178 = vector.extract_strided_slice %174 {offsets = [0, 6, 0, 0], sizes = [1, 1, 16, 6], strides = [1, 1, 1, 1]} : vector<1x11x16x6xf32> to vector<1x1x16x6xf32>
    %179 = vector.extract_strided_slice %174 {offsets = [0, 8, 0, 0], sizes = [1, 1, 16, 6], strides = [1, 1, 1, 1]} : vector<1x11x16x6xf32> to vector<1x1x16x6xf32>
    %180 = vector.extract_strided_slice %174 {offsets = [0, 10, 0, 0], sizes = [1, 1, 16, 6], strides = [1, 1, 1, 1]} : vector<1x11x16x6xf32> to vector<1x1x16x6xf32>
    %181 = tpu.concatenate %175, %176, %177, %178, %179, %180 in 1 : vector<1x1x16x6xf32>, vector<1x1x16x6xf32>, vector<1x1x16x6xf32>, vector<1x1x16x6xf32>, vector<1x1x16x6xf32>, vector<1x1x16x6xf32> -> vector<1x6x16x6xf32>
    %c0_22 = arith.constant 0 : index
    %c0_23 = arith.constant 0 : index
    %c0_24 = arith.constant 0 : index
    %c0_25 = arith.constant 0 : index
    %182 = vector.load %arg9[%c0_22, %c0_23, %c0_24, %c0_25] : memref<1x6x16x6xf32, #tpu.memory_space<vmem>>, vector<1x6x16x6xf32>
    tpu.vector_store %arg9[%c0_22, %c0_23, %c0_24, %c0_25], %181 {strides = array<i32>} : memref<1x6x16x6xf32, #tpu.memory_space<vmem>>, vector<1x6x16x6xf32>,
    %183 = vector.shape_cast %181 : vector<1x6x16x6xf32> to vector<1x1x6x16x6xf32>
    %c0_26 = arith.constant 0 : index
    %c0_27 = arith.constant 0 : index
    %c0_28 = arith.constant 0 : index
    %c0_29 = arith.constant 0 : index
    %184 = vector.load %arg6[%c0_26, %c0_27, %c0_28, %c0_29] : memref<10x6x16x6xf32, #tpu.memory_space<vmem>>, vector<10x6x16x6xf32>
    %185 = vector.shape_cast %184 : vector<10x6x16x6xf32> to vector<1x10x6x16x6xf32>
    %186 = vector.broadcast %183 : vector<1x1x6x16x6xf32> to vector<1x10x6x16x6xf32>
    %187 = arith.mulf %186, %185 : vector<1x10x6x16x6xf32>
    %cst_30 = arith.constant dense<0.000000e+00> : vector<1x10x6x16xf32>
    %188 = vector.multi_reduction <add>, %187, %cst_30 [4] : vector<1x10x6x16x6xf32> to vector<1x10x6x16xf32>
    %cst_31 = arith.constant dense<0.000000e+00> : vector<1x10x6xf32>
    %189 = vector.multi_reduction <add>, %188, %cst_31 [3] : vector<1x10x6x16xf32> to vector<1x10x6xf32>
    %cst_32 = arith.constant dense<0.000000e+00> : vector<1x10xf32>
    %190 = vector.multi_reduction <add>, %189, %cst_32 [2] : vector<1x10x6xf32> to vector<1x10xf32>
    %c0_33 = arith.constant 0 : index
    %c0_34 = arith.constant 0 : index
    %191 = vector.load %arg7[%c0_33, %c0_34] : memref<1x10xf32, #tpu.memory_space<vmem>>, vector<1x10xf32>
    %192 = arith.addf %190, %191 : vector<1x10xf32>
    %193 = vector.shape_cast %192 : vector<1x10xf32> to vector<1x1x10xf32>
    %c0_35 = arith.constant 0 : index
    %c0_36 = arith.constant 0 : index
    %c0_37 = arith.constant 0 : index
    %194 = vector.load %arg8[%c0_35, %c0_36, %c0_37] : memref<1x1x10xf32, #tpu.memory_space<vmem>>, vector<1x1x10xf32>
    tpu.vector_store %arg8[%c0_35, %c0_36, %c0_37], %193 {strides = array<i32>} : memref<1x1x10xf32, #tpu.memory_space<vmem>>, vector<1x1x10xf32>,
    return
  }
  func.func @transform_0(%arg0: i32) -> (i32, i32, i32, i32) {
    %c0_i32 = arith.constant 0 : i32
    %c0_i32_0 = arith.constant 0 : i32
    %c0_i32_1 = arith.constant 0 : i32
    %c0_i32_2 = arith.constant 0 : i32
    return %arg0, %c0_i32, %c0_i32_0, %c0_i32_1 : i32, i32, i32, i32
  }
  func.func @transform_1(%arg0: i32) -> (i32, i32) {
    %c0_i32 = arith.constant 0 : i32
    %c0_i32_0 = arith.constant 0 : i32
    %c0_i32_1 = arith.constant 0 : i32
    return %c0_i32, %c0_i32_0 : i32, i32
  }
  func.func @transform_2(%arg0: i32) -> (i32, i32) {
    %c0_i32 = arith.constant 0 : i32
    %c0_i32_0 = arith.constant 0 : i32
    %c0_i32_1 = arith.constant 0 : i32
    return %c0_i32, %c0_i32_0 : i32, i32
  }
  func.func @transform_3(%arg0: i32) -> (i32, i32) {
    %c0_i32 = arith.constant 0 : i32
    %c0_i32_0 = arith.constant 0 : i32
    %c0_i32_1 = arith.constant 0 : i32
    return %c0_i32, %c0_i32_0 : i32, i32
  }
  func.func @transform_4(%arg0: i32) -> (i32, i32) {
    %c0_i32 = arith.constant 0 : i32
    %c0_i32_0 = arith.constant 0 : i32
    %c0_i32_1 = arith.constant 0 : i32
    return %c0_i32, %c0_i32_0 : i32, i32
  }
  func.func @transform_5(%arg0: i32) -> (i32, i32, i32, i32) {
    %c0_i32 = arith.constant 0 : i32
    %c0_i32_0 = arith.constant 0 : i32
    %c0_i32_1 = arith.constant 0 : i32
    %c0_i32_2 = arith.constant 0 : i32
    %c0_i32_3 = arith.constant 0 : i32
    return %c0_i32, %c0_i32_0, %c0_i32_1, %c0_i32_2 : i32, i32, i32, i32
  }
  func.func @transform_6(%arg0: i32) -> (i32, i32) {
    %c0_i32 = arith.constant 0 : i32
    %c0_i32_0 = arith.constant 0 : i32
    %c0_i32_1 = arith.constant 0 : i32
    return %c0_i32, %c0_i32_0 : i32, i32
  }
  func.func @transform_7(%arg0: i32) -> (i32, i32, i32) {
    %c0_i32 = arith.constant 0 : i32
    %c0_i32_0 = arith.constant 0 : i32
    %c0_i32_1 = arith.constant 0 : i32
    return %arg0, %c0_i32, %c0_i32_0 : i32, i32, i32
  }
  func.func @transform_8(%arg0: i32) -> (i32, i32, i32, i32) {
    %c0_i32 = arith.constant 0 : i32
    %c0_i32_0 = arith.constant 0 : i32
    %c0_i32_1 = arith.constant 0 : i32
    %c0_i32_2 = arith.constant 0 : i32
    return %arg0, %c0_i32, %c0_i32_0, %c0_i32_1 : i32, i32, i32, i32
  }
}

</mosaic_0001>

<bundles_post_ra>
// kernel: forward.1
= control target key start
LH: loop header
LB: loop body
LE: loop exit
PB: predicated region body
PF: predicated region fallthrough
CT: control target
= control target key end

     0   :  { %14 = vsyncpa [#allocation3], 0  ;;  %s13887_s0 = inlined_call_operand.vmem [shape: f32[2,30,1,30], index: 0, kind: input, shape index: {}]   ;;  %s13888_s1 = inlined_call_operand.vmem [shape: f32[8,9], index: 1, kind: input, shape index: {}]   ;;  %s13889_s2 = inlined_call_operand.vmem [shape: f32[8,1], index: 2, kind: input, shape index: {}]   ;;  %s13890_s3 = inlined_call_operand.vmem [shape: f32[16,200], index: 3, kind: input, shape index: {}]   ;;  %s13891_s4 = inlined_call_operand.vmem [shape: f32[16,1], index: 4, kind: input, shape index: {}]   ;;  %s13892_s5 = inlined_call_operand.vmem [shape: f32[10,6,16,6], index: 5, kind: input, shape index: {}]   ;;  %s13893_s6 = inlined_call_operand.vmem [shape: f32[1,10], index: 6, kind: input, shape index: {}]   ;;  %s13894_s7 = inlined_call_operand.hbm [shape: f32[2,1,10], index: 7, kind: output, shape index: {0}]   ;;  %s13895_s8 = inlined_call_operand.hbm [shape: f32[2,6,16,6], index: 8, kind: output, shape index: {1}]  }
   0x1   :  { %16 = vsyncpa [#allocation3 + $0x1], 0 }
   0x2   :  { %17 = vsyncpa [#allocation5], 0 }
   0x3   :  { %19 = vsyncpa [#allocation5 + $0x1], 0  ;;  %s9970_s27 = smov 0   ;;  %s9972_s28 = smov 0  }
   0x4   :  { %s9974_s29 = smov 0   ;;  %s9976_s30 = smov 0  }
   0x5 LB: > { %s9991_s9 = sadd.s32 4294967295, %s9900_s30   ;;  %s8021_s10 = sadd.s32 4294967294, %s9900_s30   ;;  %s9900_s30 = sphi %s9976_s30, %s13913_s30   ;;  %s9896_s29 = sphi %s9974_s29, %s13912_s29   ;;  %s9892_s28 = sphi %s9972_s28, %s13911_s28   ;;  %s9888_s27 = sphi %s9970_s27, %s13910_s27  }
   0x6   : > { %s9995_s11 = sadd.s32 1, %s9900_s30   ;;  %s184_s12 = sadd.s32 1, %s9896_s29 }
   0x7   : > { %s181_s13 = ssub.s32 %s9900_s30, %s9995_s11  ;;  %p194_p0 = scmp.ne.s32.totalorder %s9896_s29, %s9892_s28 }
   0x8   : > { %p182_p1 = scmp.eq.s32.totalorder %s181_s13, 0  ;;  %p195_p2 = scmp.eq.s32.totalorder %s9991_s9, 1 }
   0x9   : > { %p200_p3 = scmp.ne.s32.totalorder %s9892_s28, %s9888_s27  ;;  %p201_p4 = scmp.eq.s32.totalorder %s8021_s10, 1 }
   0xa   : > { %s10006_s14 = scalar_select %p182_p1, %s9896_s29, %s184_s12  }
   0xb   : > { %p10008_p5 = por %p195_p2, %p194_p0  ;;  %p10012_p6 = por %p201_p4, %p200_p3 }
   0xc   : > { %p8024_p7 = scmp.ge.s32.totalorder %s9900_s30, 1  ;;  %p270_p8 = scmp.lt.s32.totalorder %s9900_s30, 3 }
   0xe   : > { %p271_p9 = pnand %p8024_p7, %p270_p8 }
   0xf   : > { %v341_v0 = vld [vmem:[%s13888_s1] sm:$0xff] (!%p271_p9)  ;;  %v9902_v1 = vmov (!%p271_p9), 1   ;;  %v9903_v2 = vmov (!%p271_p9), 4   ;;  %v9904_v3 = vmov (!%p271_p9), 2   ;;  %v9905_v4 = vmov (!%p271_p9), 5   ;;  %p307_p10 = scmp.lt.s32.totalorder (!%p271_p9), %s9991_s9, 1 }
  0x10   : > { %274 = sbr.rel (%p271_p9) target bundleno = 2597 (0xa25), region = 48  ;;  %9621 = vset.pattern.permute.xlu0 (!%p271_p9), %v9902_v1  ;;  %9623 = vset.pattern.permute.xlu1 (!%p271_p9), %v9903_v2  ;;  %v9906_v5 = vmov (!%p271_p9), 7   ;;  %v9907_v6 = vmov (!%p271_p9), 8   ;;  %v9908_v7 = vmov (!%p271_p9), 0   ;;  %v9909_v8 = vmov (!%p271_p9), 6   ;;  %v1707_v9 = vld [vmem:[%s13889_s2] sm:$0xff] (!%p271_p9) }
  0x11   : > { %544 = vperm.xlu0 (!%p271_p9), %9621, %v341_v0   ;;  %954 = vperm.xlu1 (!%p271_p9), %9623, %v341_v0   ;;  %v9910_v10 = vmov (!%p271_p9), 3   ;;  %s9911_s26 = smov (!%p271_p9), 127   ;;  %s9912_s10 = smov (!%p271_p9), 126   ;;  %vm9914_vm3 = vmmov (!%p271_p9), 0   ;;  %vm1937_vm11 = vcmask (!%p271_p9), 1042432   ;;  %vm1933_vm15 = vcmask (!%p271_p9), 220160  }
  0x12   : > { %s9918_s12 = smov (!%p271_p9), 125   ;;  %s9919_s13 = smov (!%p271_p9), 1  }
  0x13   : > { %s9920_s17 = smov (!%p271_p9), 124  }
  0x15   : > { %9622 = vset.pattern.permute.xlu0 (!%p271_p9), %v9904_v3  ;;  %9624 = vset.pattern.permute.xlu1 (!%p271_p9), %v9905_v4 }
  0x16   : > { %716 = vperm.xlu0 (!%p271_p9), %9622, %v341_v0   ;;  %1126 = vperm.xlu1 (!%p271_p9), %9624, %v341_v0  }
  0x17   : > { %s308_s21 = scalar_select %p307_p10, %s9991_s9, 1 }
  0x19   : > { %s9554_s22 = smul.u32 30, %s308_s21 }
  0x1a   : > { %9625 = vset.pattern.permute.xlu1 %v9906_v5  ;;  %9626 = vset.pattern.permute.xlu0 %v9907_v6 }
  0x1b   : > { %1364 = vperm.xlu1 %9625, %v341_v0   ;;  %1536 = vperm.xlu0 %9626, %v341_v0   ;;  %s10029_s25 = scalar_lea.vmem %s13887_s0, %s9554_s22  ;;  %s9921_s22 = smov [#allocation4]  }
  0x1c   : > { %v10032_v11 = vld [vmem:[%s10029_s25 + $0x1] ss:$0 sm:$0xff]  ;;  %v10035_v12 = vld [vmem:[%s10029_s25] ss:$0 sm:$0xff]  ;;  %v10054_v20 = vld [vmem:[%s10029_s25 + $0x2] ss:$0 sm:$0xff] }
  0x1d   : > { %v10076_v28 = vld [vmem:[%s10029_s25 + $0x3] ss:$0 sm:$0xff]  ;;  %v10096_v35 = vld [vmem:[%s10029_s25 + $0x4] ss:$0 sm:$0xff]  ;;  %v10124_v44 = vld [vmem:[%s10029_s25 + $0x5] ss:$0 sm:$0xff] }
  0x1e   : > { %v10138_v49 = vld [vmem:[%s10029_s25 + $0x6] ss:$0 sm:$0xff]  ;;  %v10166_v58 = vld [vmem:[%s10029_s25 + $0x7] ss:$0 sm:$0xff]  ;;  %v10180_v63 = vld [vmem:[%s10029_s25 + $0x8] ss:$0 sm:$0xff] }
  0x1f   : > { %9627 = vset.pattern.permute.xlu1 %v9908_v7  ;;  %9629 = vset.pattern.permute.xlu0 %v9909_v8  ;;  %v10208_v8 = vld [vmem:[%s10029_s25 + $0x9] ss:$0 sm:$0xff]  ;;  %s9810_s24 = sshll.u32 %s9921_s22, 4  ;;  %s9811_s24 = int_to_ptr.vmem [resolvable:$false] %s9810_s24 }
  0x20   : > { %512 = vperm.xlu1 %9627, %v341_v0   ;;  %1304 = vperm.xlu0 %9629, %v341_v0  }
  0x24   : > { %9628 = vset.pattern.permute.xlu1 %v9910_v10  ;;  %9630 = vset.pattern.permute.xlu0 %v9908_v7 }
  0x25   : > { %894 = vperm.xlu1 %9628, %v341_v0   ;;  %1710 = vperm.xlu0 %9630, %v1707_v9  }
  0x29   : > { %9801 = vset.pattern.permute.xlu1 %v9908_v7 }
  0x90   : > { %v10037_v13 = vpop.permute.xlu0 %544  ;;  %v10039_v14 = vpop.permute.xlu1 %954 }
  0x91   : > { %v548_v15 = vmul.f32 %v10032_v11, %v10037_v13  ;;  %v547_v16 = vmul.f32 %v10035_v12, %v10037_v13  ;;  %v957_v17 = vmul.f32 %v10032_v11, %v10039_v14  ;;  %v549_v22 = vmul.f32 %v10054_v20, %v10037_v13 }
  0x92   : > { %v958_v26 = vmul.f32 %v10054_v20, %v10039_v14  ;;  %v550_v29 = vmul.f32 %v10076_v28, %v10037_v13  ;;  %v959_v32 = vmul.f32 %v10076_v28, %v10039_v14  ;;  %v551_v36 = vmul.f32 %v10096_v35, %v10037_v13 }
  0x93   : > { %605 = vrot.lane.b32.xlu1 %v548_v15, %s9911_s26  ;;  %603 = vrot.lane.b32.xlu0 %v547_v16, %s9911_s26  ;;  %v960_v41 = vmul.f32 %v10096_v35, %v10039_v14  ;;  %v961_v45 = vmul.f32 %v10124_v44, %v10039_v14  ;;  %v552_v46 = vmul.f32 %v10124_v44, %v10037_v13 }
  0x94   : > { %v553_v50 = vmul.f32 %v10138_v49, %v10037_v13  ;;  %v962_v55 = vmul.f32 %v10138_v49, %v10039_v14  ;;  %v963_v59 = vmul.f32 %v10166_v58, %v10039_v14  ;;  %v554_v60 = vmul.f32 %v10166_v58, %v10037_v13 }
  0x95   : > { %v10049_v18 = vpop.permute.xlu0 %716  ;;  %v10056_v21 = vpop.permute.xlu1 %1126  ;;  %v555_v0 = vmul.f32 %v10180_v63, %v10037_v13  ;;  %v964_v5 = vmul.f32 %v10180_v63, %v10039_v14  ;;  %v965_v9 = vmul.f32 %v10208_v8, %v10039_v14  ;;  %v556_v10 = vmul.f32 %v10208_v8, %v10037_v13 }
  0x96   : > { %v719_v19 = vmul.f32 %v10035_v12, %v10049_v18  ;;  %v720_v23 = vmul.f32 %v10032_v11, %v10049_v18  ;;  %v1129_v24 = vmul.f32 %v10032_v11, %v10056_v21  ;;  %v1130_v31 = vmul.f32 %v10054_v20, %v10056_v21 }
  0x97   : > { %1013 = vrot.lane.b32.xlu0 %v957_v17, %s9911_s26  ;;  %v721_v34 = vmul.f32 %v10054_v20, %v10049_v18  ;;  %v722_v37 = vmul.f32 %v10076_v28, %v10049_v18  ;;  %v1131_v38 = vmul.f32 %v10076_v28, %v10056_v21  ;;  %v723_v40 = vmul.f32 %v10096_v35, %v10049_v18 }
  0x98   : > { %775 = vrot.lane.b32.xlu1 %v719_v19, %s9912_s10  ;;  %v1132_v48 = vmul.f32 %v10096_v35, %v10056_v21  ;;  %v724_v51 = vmul.f32 %v10124_v44, %v10049_v18  ;;  %v1133_v52 = vmul.f32 %v10124_v44, %v10056_v21  ;;  %v725_v54 = vmul.f32 %v10138_v49, %v10049_v18 }
  0x99   : > { %v1134_v62 = vmul.f32 %v10138_v49, %v10056_v21  ;;  %v726_v1 = vmul.f32 %v10166_v58, %v10049_v18  ;;  %v1135_v2 = vmul.f32 %v10166_v58, %v10056_v21  ;;  %v727_v4 = vmul.f32 %v10180_v63, %v10049_v18 }
  0x9a   : > { %v10068_v25 = vpop.permute.xlu1 %1364  ;;  %v10083_v30 = vpop.permute.xlu0 %1536  ;;  %v1136_v16 = vmul.f32 %v10180_v63, %v10056_v21  ;;  %v1137_v17 = vmul.f32 %v10208_v8, %v10056_v21  ;;  %v728_v19 = vmul.f32 %v10208_v8, %v10049_v18 }
  0x9b   : > { %607 = vrot.lane.b32.xlu0 %v549_v22, %s9911_s26  ;;  %v1367_v27 = vmul.f32 %v10054_v20, %v10068_v25  ;;  %v1539_v33 = vmul.f32 %v10054_v20, %v10083_v30  ;;  %v1368_v39 = vmul.f32 %v10076_v28, %v10068_v25  ;;  %v1369_v42 = vmul.f32 %v10096_v35, %v10068_v25  ;;  %v10230_v22 = vld [vmem:[%s10029_s25 + $0xa] ss:$0 sm:$0xff] }
  0x9c   : > { %777 = vrot.lane.b32.xlu1 %v720_v23, %s9912_s10  ;;  %v1540_v43 = vmul.f32 %v10076_v28, %v10083_v30  ;;  %v1541_v47 = vmul.f32 %v10096_v35, %v10083_v30  ;;  %v1370_v53 = vmul.f32 %v10124_v44, %v10068_v25  ;;  %v1371_v56 = vmul.f32 %v10138_v49, %v10068_v25 }
  0x9d   : > { %v1542_v57 = vmul.f32 %v10124_v44, %v10083_v30  ;;  %v1543_v61 = vmul.f32 %v10138_v49, %v10083_v30  ;;  %v1372_v3 = vmul.f32 %v10166_v58, %v10068_v25  ;;  %v1373_v6 = vmul.f32 %v10180_v63, %v10068_v25 }
  0x9e   : > { %v1544_v7 = vmul.f32 %v10166_v58, %v10083_v30  ;;  %v1545_v15 = vmul.f32 %v10180_v63, %v10083_v30  ;;  %v1375_v23 = vmul.f32 %v10230_v22, %v10068_v25 }
  0x9f   : > { %1185 = vrot.lane.b32.xlu0 %v1129_v24, %s9912_s10  ;;  %v10234_v24 = vpop.permute.xlu1 %512 }
  0xa0   : > { %1015 = vrot.lane.b32.xlu1 %v958_v26, %s9911_s26  ;;  %v10236_v26 = vpop.permute.xlu0 %1304 }
  0xa3   : > { %1423 = vrot.lane.b32.xlu0 %v1367_v27, %s9911_s26  ;;  %v1374_v27 = vmul.f32 %v10208_v8, %v10068_v25 }
  0xa4   : > { %609 = vrot.lane.b32.xlu1 %v550_v29, %s9911_s26  ;;  %v1547_v29 = vmul.f32 %v10230_v22, %v10083_v30 }
  0xa7   : > { %1017 = vrot.lane.b32.xlu0 %v959_v32, %s9911_s26  ;;  %v10247_v32 = vpop.permute.xlu1 %894 }
  0xa8   : > { %1187 = vrot.lane.b32.xlu1 %v1130_v31, %s9912_s10  ;;  %v966_v31 = vmul.f32 %v10230_v22, %v10039_v14 }
  0xab   : > { %1595 = vrot.lane.b32.xlu0 %v1539_v33, %s9912_s10  ;;  %v10249_v33 = vpop.permute.xlu0 %1710 }
  0xac   : > { %779 = vrot.lane.b32.xlu1 %v721_v34, %s9912_s10  ;;  %v557_v34 = vmul.f32 %v10230_v22, %v10037_v13 }
  0xaf   : > { %611 = vrot.lane.b32.xlu0 %v551_v36, %s9911_s26  ;;  %v1546_v36 = vmul.f32 %v10208_v8, %v10083_v30 }
  0xb0   : > { %781 = vrot.lane.b32.xlu1 %v722_v37, %s9912_s10 }
  0xb3   : > { %1189 = vrot.lane.b32.xlu0 %v1131_v38, %s9912_s10 }
  0xb4   : > { %1425 = vrot.lane.b32.xlu1 %v1368_v39, %s9911_s26  ;;  %v729_v39 = vmul.f32 %v10230_v22, %v10049_v18 }
  0xb7   : > { %783 = vrot.lane.b32.xlu0 %v723_v40, %s9912_s10  ;;  %v1138_v40 = vmul.f32 %v10230_v22, %v10056_v21 }
  0xb8   : > { %1019 = vrot.lane.b32.xlu1 %v960_v41, %s9911_s26  ;;  %v515_v41 = vmul.f32 %v10035_v12, %v10234_v24  ;;  %v516_v12 = vmul.f32 %v10032_v11, %v10234_v24 }
  0xbb   : > { %1427 = vrot.lane.b32.xlu0 %v1369_v42, %s9911_s26  ;;  %v10267_v42 = vld [vmem:[%s10029_s25 + $0xb] ss:$0 sm:$0xff] }
  0xbc   : > { %1597 = vrot.lane.b32.xlu1 %v1540_v43, %s9912_s10 }
  0xbf   : > { %1021 = vrot.lane.b32.xlu0 %v961_v45, %s9911_s26 }
  0xc0   : > { %613 = vrot.lane.b32.xlu1 %v552_v46, %s9911_s26  ;;  %v967_v46 = vmul.f32 %v10267_v42, %v10039_v14 }
  0xc3   : > { %1599 = vrot.lane.b32.xlu0 %v1541_v47, %s9912_s10 }
  0xc4   : > { %1191 = vrot.lane.b32.xlu1 %v1132_v48, %s9912_s10  ;;  %v1376_v48 = vmul.f32 %v10267_v42, %v10068_v25 }
  0xc7   : > { %615 = vrot.lane.b32.xlu0 %v553_v50, %s9911_s26  ;;  %v10274_v50 = vld [vmem:[%s10029_s25 + $0xc] ss:$0 sm:$0xff] }
  0xc8   : > { %785 = vrot.lane.b32.xlu1 %v724_v51, %s9912_s10  ;;  %v897_v51 = vmul.f32 %v10032_v11, %v10247_v32  ;;  %v898_v11 = vmul.f32 %v10054_v20, %v10247_v32 }
  0xcb   : > { %1193 = vrot.lane.b32.xlu0 %v1133_v52, %s9912_s10 }
  0xcc   : > { %1429 = vrot.lane.b32.xlu1 %v1370_v53, %s9911_s26 }
  0xcf   : > { %787 = vrot.lane.b32.xlu0 %v725_v54, %s9912_s10 }
  0xd0   : > { %1023 = vrot.lane.b32.xlu1 %v962_v55, %s9911_s26 }
  0xd3   : > { %1431 = vrot.lane.b32.xlu0 %v1371_v56, %s9911_s26  ;;  %v559_v56 = vmul.f32 %v10274_v50, %v10037_v13 }
  0xd4   : > { %1601 = vrot.lane.b32.xlu1 %v1542_v57, %s9912_s10 }
  0xd7   : > { %1025 = vrot.lane.b32.xlu0 %v963_v59, %s9911_s26  ;;  %v1548_v59 = vmul.f32 %v10267_v42, %v10083_v30 }
  0xd8   : > { %617 = vrot.lane.b32.xlu1 %v554_v60, %s9911_s26 }
  0xdb   : > { %1603 = vrot.lane.b32.xlu0 %v1543_v61, %s9912_s10 }
  0xdc   : > { %1195 = vrot.lane.b32.xlu1 %v1134_v62, %s9912_s10 }
  0xdf   : > { %619 = vrot.lane.b32.xlu0 %v555_v0, %s9911_s26 }
  0xe0   : > { %789 = vrot.lane.b32.xlu1 %v726_v1, %s9912_s10  ;;  %v1139_v1 = vmul.f32 %v10267_v42, %v10056_v21 }
  0xe3   : > { %1197 = vrot.lane.b32.xlu0 %v1135_v2, %s9912_s10 }
  0xe4   : > { %1433 = vrot.lane.b32.xlu1 %v1372_v3, %s9911_s26 }
  0xe7   : > { %791 = vrot.lane.b32.xlu0 %v727_v4, %s9912_s10  ;;  %v558_v4 = vmul.f32 %v10267_v42, %v10037_v13 }
  0xe8   : > { %1027 = vrot.lane.b32.xlu1 %v964_v5, %s9911_s26  ;;  %v1307_v5 = vmul.f32 %v10054_v20, %v10236_v26 }
  0xeb   : > { %1435 = vrot.lane.b32.xlu0 %v1373_v6, %s9911_s26 }
  0xec   : > { %1605 = vrot.lane.b32.xlu1 %v1544_v7, %s9912_s10 }
  0xef   : > { %1029 = vrot.lane.b32.xlu0 %v965_v9, %s9911_s26  ;;  %v731_v9 = vmul.f32 %v10274_v50, %v10049_v18 }
  0xf0   : > { %621 = vrot.lane.b32.xlu1 %v556_v10, %s9911_s26 }
  0xf3   : > { %1607 = vrot.lane.b32.xlu0 %v1545_v15, %s9912_s10  ;;  %v730_v15 = vmul.f32 %v10267_v42, %v10049_v18 }
  0xf4   : > { %1199 = vrot.lane.b32.xlu1 %v1136_v16, %s9912_s10 }
  0xf7   : > { %1201 = vrot.lane.b32.xlu0 %v1137_v17, %s9912_s10 }
  0xf8   : > { %793 = vrot.lane.b32.xlu1 %v728_v19, %s9912_s10  ;;  %v1377_v19 = vmul.f32 %v10274_v50, %v10068_v25 }
  0xfb   : > { %1439 = vrot.lane.b32.xlu0 %v1375_v23, %s9911_s26 }
  0xfc   : > { %1437 = vrot.lane.b32.xlu1 %v1374_v27, %s9911_s26  ;;  %v968_v27 = vmul.f32 %v10274_v50, %v10039_v14 }
  0xff   : > { %1611 = vrot.lane.b32.xlu0 %v1547_v29, %s9912_s10  ;;  %v517_v29 = vmul.f32 %v10054_v20, %v10234_v24 }
 0x100   : > { %1031 = vrot.lane.b32.xlu1 %v966_v31, %s9911_s26 }
 0x103   : > { %623 = vrot.lane.b32.xlu0 %v557_v34, %s9911_s26  ;;  %v10316_v34 = vld [vmem:[%s10029_s25 + $0xd] ss:$0 sm:$0xff] }
 0x104   : > { %1609 = vrot.lane.b32.xlu1 %v1546_v36, %s9912_s10  ;;  %v1308_v36 = vmul.f32 %v10076_v28, %v10236_v26  ;;  %v560_v20 = vmul.f32 %v10316_v34, %v10037_v13 }
 0x105   : > { %v606_v37 = vpop.permute.xlu1 %605  ;;  %v604_v38 = vpop.permute.xlu0 %603 }
 0x106   : > { %v687_v43 = vadd.f32 %v604_v38, %v515_v41  ;;  %v688_v53 = vadd.f32 %v606_v37, %v516_v12 }
 0x107   : > { %795 = vrot.lane.b32.xlu0 %v729_v39, %s9912_s10  ;;  %v969_v39 = vmul.f32 %v10316_v34, %v10039_v14 }
 0x108   : > { %1203 = vrot.lane.b32.xlu1 %v1138_v40, %s9912_s10 }
 0x109   : > { %v1014_v45 = vpop.permute.xlu0 %1013 }
 0x10a   : > { %v776_v47 = vpop.permute.xlu1 %775 }
 0x10b   : > { %v859_v52 = vadd.f32 %v776_v47, %v687_v43  ;;  %1033 = vrot.lane.b32.xlu0 %v967_v46, %s9911_s26  ;;  %v518_v43 = vmul.f32 %v10076_v28, %v10234_v24 }
 0x10c   : > { %1441 = vrot.lane.b32.xlu1 %v1376_v48, %s9911_s26 }
 0x10d   : > { %v925_v54 = vadd.f32 %v897_v51, %v859_v52  ;;  %v608_v55 = vpop.permute.xlu0 %607  ;;  %v1549_v51 = vmul.f32 %v10274_v50, %v10083_v30 }
 0x10e   : > { %v778_v57 = vpop.permute.xlu1 %777  ;;  %v689_v37 = vadd.f32 %v608_v55, %v517_v29  ;;  %v900_v55 = vmul.f32 %v10096_v35, %v10247_v32 }
 0x10f   : > { %v860_v60 = vadd.f32 %v778_v57, %v688_v53  ;;  %627 = vrot.lane.b32.xlu0 %v559_v56, %s9911_s26  ;;  %v1097_v61 = vadd.f32 %v1014_v45, %v925_v54  ;;  %v899_v45 = vmul.f32 %v10076_v28, %v10247_v32  ;;  %v1140_v53 = vmul.f32 %v10274_v50, %v10056_v21 }
 0x110   : > { %1613 = vrot.lane.b32.xlu1 %v1548_v59, %s9912_s10  ;;  %v1141_v57 = vmul.f32 %v10316_v34, %v10056_v21 }
 0x111   : > { %v1186_v62 = vpop.permute.xlu0 %1185  ;;  %v926_v0 = vadd.f32 %v898_v11, %v860_v60  ;;  %v519_v60 = vmul.f32 %v10096_v35, %v10234_v24 }
 0x112   : > { %v1269_v2 = vadd.f32 %v1186_v62, %v1097_v61  ;;  %v1016_v3 = vpop.permute.xlu1 %1015  ;;  %v732_v62 = vmul.f32 %v10316_v34, %v10049_v18 }
 0x113   : > { %1205 = vrot.lane.b32.xlu0 %v1139_v1, %s9912_s10  ;;  %v1098_v16 = vadd.f32 %v1016_v3, %v926_v0  ;;  %v1309_v0 = vmul.f32 %v10096_v35, %v10236_v26  ;;  %v901_v35 = vmul.f32 %v10124_v44, %v10247_v32 }
 0x114   : > { %625 = vrot.lane.b32.xlu1 %v558_v4, %s9911_s26  ;;  %v10298_v6 = vadd.f32 %v1307_v5, %v1269_v2  ;;  %v10354_v2 = vld [vmem:[%s10029_s25 + $0xe] ss:$0 sm:$0xff] }
 0x115   : > { %v10300_v7 = vpop.permute.xlu0 %1423  ;;  %v1379_v5 = vmul.f32 %v10354_v2, %v10068_v25 }
 0x116   : > { %v610_v10 = vpop.permute.xlu1 %609 }
 0x117   : > { %799 = vrot.lane.b32.xlu0 %v731_v9, %s9912_s10  ;;  %v690_v47 = vadd.f32 %v610_v10, %v518_v43 }
 0x118   : > { %797 = vrot.lane.b32.xlu1 %v730_v15, %s9912_s10  ;;  %v1378_v15 = vmul.f32 %v10316_v34, %v10068_v25 }
 0x119   : > { %v1018_v17 = vpop.permute.xlu0 %1017 }
 0x11a   : > { %v1188_v23 = vpop.permute.xlu1 %1187 }
 0x11b   : > { %v1270_v31 = vadd.f32 %v1188_v23, %v1098_v16  ;;  %1443 = vrot.lane.b32.xlu0 %v1377_v19, %s9911_s26  ;;  %v1909_v16 = vlaneseq  ;;  %v9913_v19 = vmov 0.0|0.0  }
 0x11c   : > { %1035 = vrot.lane.b32.xlu1 %v968_v27, %s9911_s26  ;;  %8853 = vmatprep.subr.bf16.mxu0 %v9913_v19  ;;  %v1551_v27 = vmul.f32 %v10354_v2, %v10083_v30 }
 0x11d   : > { %v1596_v38 = vpop.permute.xlu0 %1595  ;;  %v10323_v40 = vadd.f32 %v1308_v36, %v1270_v31  ;;  %v10369_v29 = vshrl.u32 %v1909_v16, 7  ;;  %v10371_v31 = vand.u32 127, %v1909_v16  ;;  %8860 = vmatprep.subr.bf16.mxu1 %v9913_v19 }
 0x11e   : > { %v780_v41 = vpop.permute.xlu1 %779 }
 0x11f   : > { %v861_v46 = vadd.f32 %v780_v41, %v689_v37  ;;  %1037 = vrot.lane.b32.xlu0 %v969_v39, %s9911_s26  ;;  %v970_v37 = vmul.f32 %v10354_v2, %v10039_v14  ;;  %v1507_v39 = vadd.f32 %v10300_v7, %v10298_v6  ;;  %vm1916_vm0 = vcmp.ge.s32.totalorder %v10371_v31, 1 }
 0x120   : > { %629 = vrot.lane.b32.xlu1 %v560_v20, %s9911_s26  ;;  %v10384_v41 = vadd.s32 8, %v10369_v29  ;;  %v1913_v20 = vadd.s32 24, %v10369_v29  ;;  %vm1917_vm1 = vcmp.le.s32.totalorder %v10371_v31, 14  ;;  %v8055_v43 = vadd.s32 4294967295, %v10371_v31 }
 0x121   : > { %v927_v48 = vadd.f32 %v899_v45, %v861_v46  ;;  %v612_v12 = vpop.permute.xlu0 %611  ;;  %v1679_v45 = vadd.f32 %v1596_v38, %v1507_v39  ;;  %v561_v6 = vmul.f32 %v10354_v2, %v10037_v13  ;;  %vm10393_vm2 = vmand %vm1916_vm0, %vm1917_vm1  ;;  %v902_v39 = vmul.f32 %v10138_v49, %v10247_v32 }
 0x122   : > { %v782_v52 = vpop.permute.xlu1 %781  ;;  %v691_v1 = vadd.f32 %v612_v12, %v519_v60  ;;  %v1920_v12 = vmul.u32 2, %v8055_v43  ;;  %v521_v43 = vmul.f32 %v10138_v49, %v10234_v24  ;;  %vm4379_vm0 = vcmask 588800  }
 0x123   : > { %v862_v54 = vadd.f32 %v782_v52, %v690_v47  ;;  %1615 = vrot.lane.b32.xlu0 %v1549_v51, %s9912_s10  ;;  %v1099_v28 = vadd.f32 %v1018_v17, %v927_v48  ;;  %v1550_v47 = vmul.f32 %v10316_v34, %v10083_v30  ;;  %v1912_v51 = vadd.s32 16, %v10369_v29 }
 0x124   : > { %1207 = vrot.lane.b32.xlu1 %v1140_v53, %s9912_s10  ;;  %v9915_v52 = vmov 0.0   ;;  %vm1921_vm4 = vcmp.eq.s32.totalorder %v10369_v29, %v1920_v12  ;;  %vm1922_vm5 = vcmp.eq.s32.totalorder %v10384_v41, %v1920_v12  ;;  %vm1924_vm6 = vcmp.eq.s32.totalorder %v1913_v20, %v1920_v12 }
 0x125   : > { %v1190_v56 = vpop.permute.xlu0 %1189  ;;  %v928_v59 = vadd.f32 %v900_v55, %v862_v54  ;;  %8469 = vmatprep.mubr.msk.f32.mxu0 %vm9914_vm3, %v9915_v52  ;;  %8480 = vmatprep.mubr.msk.f32.mxu1 %vm9914_vm3, %v9915_v52  ;;  %v10407_v38 = vadd.f32 %v10249_v33, %v1679_v45  ;;  %v520_v54 = vmul.f32 %v10124_v44, %v10234_v24  ;;  %vm1925_vm7 = vmand %vm10393_vm2, %vm1921_vm4  ;;  %vm5435_vm4 = vcmask 89088  }
 0x126   : > { %v1271_v61 = vadd.f32 %v1190_v56, %v1099_v28  ;;  %v10345_v11 = vpop.permute.xlu1 %1425  ;;  %v733_v55 = vmul.f32 %v10354_v2, %v10049_v18  ;;  %vm1926_vm8 = vmand %vm10393_vm2, %vm1922_vm5  ;;  %vm1923_vm9 = vcmp.eq.s32.totalorder %v1912_v51, %v1920_v12  ;;  %v1311_v12 = vmul.f32 %v10138_v49, %v10236_v26 }
 0x127   : > { %1209 = vrot.lane.b32.xlu0 %v1141_v57, %s9912_s10  ;;  %v1142_v57 = vmul.f32 %v10354_v2, %v10056_v21  ;;  %vm1928_vm10 = vmand %vm10393_vm2, %vm1924_vm6  ;;  %v1508_v51 = vadd.f32 %v10345_v11, %v10323_v40  ;;  %vm6423_vm5 = vcmask 48128   ;;  %vm7165_vm6 = vcmask 130112  }
 0x128   : > { %801 = vrot.lane.b32.xlu1 %v732_v62, %s9912_s10  ;;  %v1337_v3 = vadd.f32 %v1309_v0, %v1271_v61  ;;  %v1310_v61 = vmul.f32 %v10124_v44, %v10236_v26  ;;  %v1932_v0 = vsel %vm1928_vm10, 1.0, %v9915_v52  ;;  %vm10427_vm12 = vmpackc.low %vm1926_vm8, %vm1925_vm7  ;;  %vm7698_vm7 = vcmask 1041409  }
 0x129   : > { %v784_v4 = vpop.permute.xlu0 %783  ;;  %vm1927_vm13 = vmand %vm10393_vm2, %vm1923_vm9  ;;  %vm7700_vm8 = vcmask 1042434   ;;  %vm7702_vm9 = vcmask 1043459   ;;  %vm7704_vm10 = vcmask 1044484  }
 0x12a   : > { %v863_v9 = vadd.f32 %v784_v4, %v691_v1  ;;  %v1020_v10 = vpop.permute.xlu1 %1019  ;;  %vm10451_vm14 = vmpackc.low %vm1937_vm11, %vm1927_vm13  ;;  %vm7849_vm13 = vcmask 1046534  }
 0x12b   : > { %1447 = vrot.lane.b32.xlu0 %v1379_v5, %s9911_s26  ;;  %v1100_v53 = vadd.f32 %v1020_v10, %v928_v59  ;;  %v1741_v5 = vmax.f32 %v10407_v38, 0.0  ;;  %v9916_v10 = vmov 1.0|1.0  }
 0x12c   : > { %1445 = vrot.lane.b32.xlu1 %v1378_v15, %s9911_s26  ;;  %v10364_v17 = vadd.f32 %v901_v35, %v863_v9  ;;  %v10433_v9 = vld [vmem:[%s10029_s25 + $0xf] ss:$0 sm:$0xff]  ;;  %8855 = vmatpush3.bf16.msk.msra.mxu0 %vm10427_vm12, %v9916_v10  ;;  %v13896_v15 = vmov 1.0  }
 0x12d   : > { %v1428_v23 = vpop.permute.xlu0 %1427  ;;  %v10439_v35 = vpack.c.bf16 %v1932_v0, %v13896_v15  ;;  %8862 = vmatpush3.bf16.msk.msra.mxu1 %vm10427_vm12, %v9916_v10  ;;  %8856 = vmatprep.subr.bf16.mxu0 %v9913_v19  ;;  %v1552_v48 = vmul.f32 %v10433_v9, %v10083_v30 }
 0x12e   : > { %v10374_v36 = vpop.permute.xlu1 %1597  ;;  %v1509_v59 = vadd.f32 %v1428_v23, %v1337_v3  ;;  %v1380_v23 = vmul.f32 %v10433_v9, %v10068_v25  ;;  %8863 = vmatprep.subr.bf16.mxu1 %v9913_v19 }
 0x12f   : > { %1619 = vrot.lane.b32.xlu0 %v1551_v27, %s9912_s10 }
 0x130   : > { %1039 = vrot.lane.b32.xlu1 %v970_v37, %s9911_s26  ;;  %8859 = vmatpush3.bf16.msk.msra.mxu0 %vm10451_vm14, %v10439_v35 }
 0x131   : > { %v1022_v46 = vpop.permute.xlu0 %1021  ;;  %8866 = vmatpush3.bf16.msk.msra.mxu1 %vm10451_vm14, %v10439_v35  ;;  %8867 = vmatprep.subr.bf16.mxu0 %v9913_v19 }
 0x132   : > { %v614_v7 = vpop.permute.xlu1 %613  ;;  %v1101_v20 = vadd.f32 %v1022_v46, %v10364_v17  ;;  %8874 = vmatprep.subr.bf16.mxu1 %v9913_v19 }
 0x133   : > { %631 = vrot.lane.b32.xlu0 %v561_v6, %s9911_s26  ;;  %v692_v62 = vadd.f32 %v614_v7, %v520_v54  ;;  %v971_v7 = vmul.f32 %v10433_v9, %v10039_v14 }
 0x134   : > { %1617 = vrot.lane.b32.xlu1 %v1550_v47, %s9912_s10 }
 0x135   : > { %v1600_v28 = vpop.permute.xlu0 %1599 }
 0x136   : > { %v1192_v56 = vpop.permute.xlu1 %1191  ;;  %v1681_v3 = vadd.f32 %v1600_v28, %v1509_v59  ;;  %v562_v59 = vmul.f32 %v10433_v9, %v10037_v13 }
 0x137   : > { %v1272_v60 = vadd.f32 %v1192_v56, %v1100_v53  ;;  %803 = vrot.lane.b32.xlu0 %v733_v55, %s9912_s10  ;;  %v1680_v56 = vadd.f32 %v10374_v36, %v1508_v51  ;;  %v1312_v51 = vmul.f32 %v10166_v58, %v10236_v26 }
 0x138   : > { %1211 = vrot.lane.b32.xlu1 %v1142_v57, %s9912_s10  ;;  %v10466_v45 = vadd.f32 %v10249_v33, %v1681_v3  ;;  %v734_v3 = vmul.f32 %v10433_v9, %v10049_v18 }
 0x139   : > { %v616_v4 = vpop.permute.xlu0 %615  ;;  %v1338_v44 = vadd.f32 %v1310_v61, %v1272_v60  ;;  %v10491_v60 = vld [vmem:[%s10029_s25 + $0x10] ss:$0 sm:$0xff]  ;;  %v903_v61 = vmul.f32 %v10166_v58, %v10247_v32 }
 0x13a   : > { %v786_v16 = vpop.permute.xlu1 %785  ;;  %v693_v53 = vadd.f32 %v616_v4, %v521_v43  ;;  %v1743_v28 = vmax.f32 %v10466_v45, 0.0  ;;  %v563_v36 = vmul.f32 %v10491_v60, %v10037_v13 }
 0x13b   : > { %v864_v37 = vadd.f32 %v786_v16, %v692_v62  ;;  %1797 = vrot.lane.b32.xlu0 %v1741_v5, %s9911_s26  ;;  %v10502_v62 = vadd.f32 %v10249_v33, %v1680_v56 }
 0x13c   : > { %1449 = vrot.lane.b32.xlu1 %v1380_v23, %s9911_s26 }
 0x13d   : > { %v1194_v6 = vpop.permute.xlu0 %1193  ;;  %v930_v47 = vadd.f32 %v902_v39, %v864_v37  ;;  %v1742_v23 = vmax.f32 %v10502_v62, 0.0 }
 0x13e   : > { %v1273_v17 = vadd.f32 %v1194_v6, %v1101_v20  ;;  %v1430_v46 = vpop.permute.xlu1 %1429 }
 0x13f   : > { %1041 = vrot.lane.b32.xlu0 %v971_v7, %s9911_s26  ;;  %v1510_v4 = vadd.f32 %v1430_v46, %v1338_v44  ;;  %v972_v46 = vmul.f32 %v10491_v60, %v10039_v14 }
 0x140   : > { %1621 = vrot.lane.b32.xlu1 %v1552_v48, %s9912_s10  ;;  %v1339_v54 = vadd.f32 %v1311_v12, %v1273_v17  ;;  %v522_v48 = vmul.f32 %v10166_v58, %v10234_v24 }
 0x141   : > { %v788_v55 = vpop.permute.xlu0 %787 }
 0x142   : > { %v865_v57 = vadd.f32 %v788_v55, %v693_v53  ;;  %v1024_v49 = vpop.permute.xlu1 %1023 }
 0x143   : > { %1801 = vrot.lane.b32.xlu0 %v1743_v28, %s9911_s26  ;;  %v1102_v43 = vadd.f32 %v1024_v49, %v930_v47 }
 0x144   : > { %633 = vrot.lane.b32.xlu1 %v562_v59, %s9911_s26  ;;  %v931_v40 = vadd.f32 %v903_v61, %v865_v57  ;;  %v10528_v61 = vld [vmem:[%s10029_s25 + $0x11] ss:$0 sm:$0xff] }
 0x145   : > { %v1432_v11 = vpop.permute.xlu0 %1431 }
 0x146   : > { %v1602_v0 = vpop.permute.xlu1 %1601  ;;  %v1511_v20 = vadd.f32 %v1432_v11, %v1339_v54  ;;  %v904_v11 = vmul.f32 %v10180_v63, %v10247_v32 }
 0x147   : > { %635 = vrot.lane.b32.xlu0 %v563_v36, %s9911_s26  ;;  %v1682_v37 = vadd.f32 %v1602_v0, %v1510_v4  ;;  %v523_v36 = vmul.f32 %v10180_v63, %v10234_v24 }
 0x148   : > { %805 = vrot.lane.b32.xlu1 %v734_v3, %s9912_s10 }
 0x149   : > { %v1026_v16 = vpop.permute.xlu0 %1025  ;;  %v10513_v7 = vadd.f32 %v10249_v33, %v1682_v37 }
 0x14a   : > { %v618_v39 = vpop.permute.xlu1 %617  ;;  %v1103_v58 = vadd.f32 %v1026_v16, %v931_v40  ;;  %v1143_v40 = vmul.f32 %v10433_v9, %v10056_v21  ;;  %v1313_v16 = vmul.f32 %v10180_v63, %v10236_v26 }
 0x14b   : > { %v694_v47 = vadd.f32 %v618_v39, %v522_v48  ;;  %v1744_v56 = vmax.f32 %v10513_v7, 0.0  ;;  %v564_v39 = vmul.f32 %v10528_v61, %v10037_v13 }
 0x14c   : > { %1799 = vrot.lane.b32.xlu1 %v1742_v23, %s9911_s26 }
 0x14d   : > { %v1604_v6 = vpop.permute.xlu0 %1603 }
 0x14e   : > { %v1683_v17 = vadd.f32 %v1604_v6, %v1511_v20  ;;  %v1196_v44 = vpop.permute.xlu1 %1195 }
 0x14f   : > { %v1274_v12 = vadd.f32 %v1196_v44, %v1102_v43 }
 0x150   : > { %v10522_v53 = vadd.f32 %v10249_v33, %v1683_v17  ;;  %1043 = vrot.lane.b32.xlu1 %v972_v46, %s9911_s26  ;;  %v905_v46 = vmul.f32 %v10208_v8, %v10247_v32 }
 0x151   : > { %v620_v54 = vpop.permute.xlu0 %619  ;;  %v1340_v55 = vadd.f32 %v1312_v51, %v1274_v12 }
 0x152   : > { %v1745_v57 = vmax.f32 %v10522_v53, 0.0  ;;  %v790_v49 = vpop.permute.xlu1 %789  ;;  %v695_v20 = vadd.f32 %v620_v54, %v523_v36 }
 0x153   : > { %v866_v59 = vadd.f32 %v790_v49, %v694_v47 }
 0x154   : > { %1803 = vrot.lane.b32.xlu1 %v1744_v56, %s9911_s26  ;;  %1805 = vrot.lane.b32.xlu0 %v1745_v57, %s9911_s26 }
 0x155   : > { %v1198_v0 = vpop.permute.xlu0 %1197  ;;  %v932_v3 = vadd.f32 %v904_v11, %v866_v59 }
 0x156   : > { %v1275_v4 = vadd.f32 %v1198_v0, %v1103_v58  ;;  %v1434_v37 = vpop.permute.xlu1 %1433 }
 0x157   : > { %v1512_v12 = vadd.f32 %v1434_v37, %v1340_v55  ;;  %v524_v55 = vmul.f32 %v10208_v8, %v10234_v24 }
 0x158   : > { %637 = vrot.lane.b32.xlu1 %v564_v39, %s9911_s26  ;;  %1213 = vrot.lane.b32.xlu0 %v1143_v40, %s9912_s10  ;;  %v1341_v43 = vadd.f32 %v1313_v16, %v1275_v4  ;;  %v1144_v40 = vmul.f32 %v10491_v60, %v10056_v21  ;;  %v1314_v16 = vmul.f32 %v10208_v8, %v10236_v26 }
 0x159   : > { %v792_v6 = vpop.permute.xlu0 %791  ;;  %v906_v8 = vmul.f32 %v10230_v22, %v10247_v32 }
 0x15a   : > { %v867_v17 = vadd.f32 %v792_v6, %v695_v20  ;;  %v1028_v44 = vpop.permute.xlu1 %1027 }
 0x15b   : > { %v1104_v36 = vadd.f32 %v1028_v44, %v932_v3 }
 0x15c   : > { %v933_v48 = vadd.f32 %v905_v46, %v867_v17 }
 0x15d   : > { %v1436_v51 = vpop.permute.xlu0 %1435 }
 0x15e   : > { %v1606_v47 = vpop.permute.xlu1 %1605  ;;  %v1513_v58 = vadd.f32 %v1436_v51, %v1341_v43  ;;  %v1315_v51 = vmul.f32 %v10230_v22, %v10236_v26 }
 0x15f   : > { %v1684_v49 = vadd.f32 %v1606_v47, %v1512_v12 }
 0x161   : > { %v10551_v59 = vadd.f32 %v10249_v33, %v1684_v49  ;;  %v1030_v63 = vpop.permute.xlu0 %1029 }
 0x162   : > { %v622_v54 = vpop.permute.xlu1 %621  ;;  %v1105_v20 = vadd.f32 %v1030_v63, %v933_v48 }
 0x163   : > { %v1746_v11 = vmax.f32 %v10551_v59, 0.0  ;;  %v696_v43 = vadd.f32 %v622_v54, %v524_v55 }
 0x165   : > { %1807 = vrot.lane.b32.xlu1 %v1746_v11, %s9911_s26  ;;  %v1608_v0 = vpop.permute.xlu0 %1607 }
 0x166   : > { %v1685_v4 = vadd.f32 %v1608_v0, %v1513_v58  ;;  %v1200_v39 = vpop.permute.xlu1 %1199  ;;  %v735_v58 = vmul.f32 %v10491_v60, %v10049_v18 }
 0x167   : > { %v1276_v37 = vadd.f32 %v1200_v39, %v1104_v36 }
 0x168   : > { %v10564_v3 = vadd.f32 %v10249_v33, %v1685_v4 }
 0x169   : > { %1215 = vrot.lane.b32.xlu1 %v1144_v40, %s9912_s10  ;;  %v1202_v6 = vpop.permute.xlu0 %1201  ;;  %v1342_v17 = vadd.f32 %v1314_v16, %v1276_v37 }
 0x16a   : > { %v1747_v44 = vmax.f32 %v10564_v3, 0.0  ;;  %v1277_v46 = vadd.f32 %v1202_v6, %v1105_v20  ;;  %v794_v12 = vpop.permute.xlu1 %793  ;;  %v525_v20 = vmul.f32 %v10230_v22, %v10234_v24  ;;  %v907_v22 = vmul.f32 %v10267_v42, %v10247_v32 }
 0x16b   : > { %v868_v47 = vadd.f32 %v794_v12, %v696_v43 }
 0x16c   : > { %1809 = vrot.lane.b32.xlu0 %v1747_v44, %s9911_s26  ;;  %v1343_v48 = vadd.f32 %v1315_v51, %v1277_v46 }
 0x16d   : > { %v1440_v49 = vpop.permute.xlu0 %1439  ;;  %v934_v63 = vadd.f32 %v906_v8, %v868_v47 }
 0x16e   : > { %v1438_v54 = vpop.permute.xlu1 %1437  ;;  %v1515_v36 = vadd.f32 %v1440_v49, %v1343_v48  ;;  %v1381_v48 = vmul.f32 %v10491_v60, %v10068_v25 }
 0x16f   : > { %v1514_v37 = vadd.f32 %v1438_v54, %v1342_v17 }
 0x170   : > { %807 = vrot.lane.b32.xlu0 %v735_v58, %s9912_s10  ;;  %v1316_v58 = vmul.f32 %v10267_v42, %v10236_v26 }
 0x171   : > { %v1612_v0 = vpop.permute.xlu0 %1611 }
 0x172   : > { %v1687_v4 = vadd.f32 %v1612_v0, %v1515_v36  ;;  %v1032_v39 = vpop.permute.xlu1 %1031 }
 0x173   : > { %v1106_v12 = vadd.f32 %v1032_v39, %v934_v63  ;;  %v973_v39 = vmul.f32 %v10528_v61, %v10039_v14 }
 0x174   : > { %v10579_v55 = vadd.f32 %v10249_v33, %v1687_v4 }
 0x175   : > { %v624_v40 = vpop.permute.xlu0 %623 }
 0x176   : > { %v1749_v16 = vmax.f32 %v10579_v55, 0.0  ;;  %v1610_v43 = vpop.permute.xlu1 %1609  ;;  %v697_v46 = vadd.f32 %v624_v40, %v525_v20 }
 0x177   : > { %v1686_v6 = vadd.f32 %v1610_v43, %v1514_v37  ;;  %v736_v37 = vmul.f32 %v10528_v61, %v10049_v18 }
 0x178   : > { %1813 = vrot.lane.b32.xlu0 %v1749_v16, %s9911_s26 }
 0x179   : > { %v10588_v51 = vadd.f32 %v10249_v33, %v1686_v6  ;;  %v796_v47 = vpop.permute.xlu0 %795  ;;  %v1553_v6 = vmul.f32 %v10491_v60, %v10083_v30 }
 0x17a   : > { %v869_v8 = vadd.f32 %v796_v47, %v697_v46  ;;  %v1204_v17 = vpop.permute.xlu1 %1203 }
 0x17b   : > { %v1748_v49 = vmax.f32 %v10588_v51, 0.0  ;;  %v1278_v54 = vadd.f32 %v1204_v17, %v1106_v12  ;;  %v527_v17 = vmul.f32 %v10274_v50, %v10234_v24 }
 0x17c   : > { %1451 = vrot.lane.b32.xlu0 %v1381_v48, %s9911_s26  ;;  %v935_v63 = vadd.f32 %v907_v22, %v869_v8 }
 0x17d   : > { %1811 = vrot.lane.b32.xlu1 %v1748_v49, %s9911_s26  ;;  %v1034_v36 = vpop.permute.xlu0 %1033  ;;  %v1344_v0 = vadd.f32 %v1316_v58, %v1278_v54  ;;  %v1145_v54 = vmul.f32 %v10528_v61, %v10056_v21  ;;  %v1317_v58 = vmul.f32 %v10274_v50, %v10236_v26 }
 0x17e   : > { %v1442_v4 = vpop.permute.xlu1 %1441  ;;  %v1107_v12 = vadd.f32 %v1034_v36, %v935_v63  ;;  %v526_v36 = vmul.f32 %v10267_v42, %v10234_v24  ;;  %v909_v42 = vmul.f32 %v10316_v34, %v10247_v32 }
 0x17f   : > { %v1516_v40 = vadd.f32 %v1442_v4, %v1344_v0 }
 0x180   : > { %1045 = vrot.lane.b32.xlu0 %v973_v39, %s9911_s26 }
 0x181   : > { %809 = vrot.lane.b32.xlu1 %v736_v37, %s9912_s10  ;;  %v628_v20 = vpop.permute.xlu0 %627 }
 0x182   : > { %v1614_v43 = vpop.permute.xlu1 %1613  ;;  %v699_v0 = vadd.f32 %v628_v20, %v527_v17 }
 0x183   : > { %v1688_v46 = vadd.f32 %v1614_v43, %v1516_v40  ;;  %v10627_v40 = vld [vmem:[%s10029_s25 + $0x12] ss:$0 sm:$0xff] }
 0x184   : > { %1623 = vrot.lane.b32.xlu0 %v1553_v6, %s9912_s10  ;;  %v914_v51 = vmul.f32 %v10627_v40, %v10247_v32 }
 0x185   : > { %v10611_v47 = vadd.f32 %v10249_v33, %v1688_v46  ;;  %v1206_v8 = vpop.permute.xlu0 %1205  ;;  %v1383_v46 = vmul.f32 %v10627_v40, %v10068_v25 }
 0x186   : > { %v1279_v48 = vadd.f32 %v1206_v8, %v1107_v12  ;;  %v626_v22 = vpop.permute.xlu1 %625  ;;  %v1382_v12 = vmul.f32 %v10528_v61, %v10068_v25  ;;  %v908_v8 = vmul.f32 %v10274_v50, %v10247_v32 }
 0x187   : > { %v1750_v63 = vmax.f32 %v10611_v47, 0.0  ;;  %v698_v39 = vadd.f32 %v626_v22, %v526_v36  ;;  %v974_v36 = vmul.f32 %v10627_v40, %v10039_v14 }
 0x188   : > { %1217 = vrot.lane.b32.xlu0 %v1145_v54, %s9912_s10  ;;  %v1345_v4 = vadd.f32 %v1317_v58, %v1279_v48  ;;  %v1555_v58 = vmul.f32 %v10627_v40, %v10083_v30 }
 0x189   : > { %1815 = vrot.lane.b32.xlu1 %v1750_v63, %s9911_s26  ;;  %v800_v37 = vpop.permute.xlu0 %799 }
 0x18a   : > { %v871_v43 = vadd.f32 %v800_v37, %v699_v0  ;;  %v798_v6 = vpop.permute.xlu1 %797 }
 0x18b   : > { %v870_v20 = vadd.f32 %v798_v6, %v698_v39  ;;  %v1554_v39 = vmul.f32 %v10528_v61, %v10083_v30 }
 0x18c   : > { %1455 = vrot.lane.b32.xlu0 %v1383_v46, %s9911_s26  ;;  %v937_v17 = vadd.f32 %v909_v42, %v871_v43 }
 0x18d   : > { %1453 = vrot.lane.b32.xlu1 %v1382_v12, %s9911_s26  ;;  %v1444_v48 = vpop.permute.xlu0 %1443  ;;  %v936_v22 = vadd.f32 %v908_v8, %v870_v20  ;;  %v528_v20 = vmul.f32 %v10316_v34, %v10234_v24  ;;  %v1146_v8 = vmul.f32 %v10627_v40, %v10056_v21 }
 0x18e   : > { %v1036_v54 = vpop.permute.xlu1 %1035  ;;  %v1517_v37 = vadd.f32 %v1444_v48, %v1345_v4 }
 0x18f   : > { %v1108_v43 = vadd.f32 %v1036_v54, %v936_v22 }
 0x190   : > { %1627 = vrot.lane.b32.xlu0 %v1555_v58, %s9912_s10  ;;  %v1318_v58 = vmul.f32 %v10316_v34, %v10236_v26 }
 0x191   : > { %1047 = vrot.lane.b32.xlu1 %v974_v36, %s9911_s26  ;;  %v1038_v0 = vpop.permute.xlu0 %1037 }
 0x192   : > { %v630_v50 = vpop.permute.xlu1 %629  ;;  %v1109_v36 = vadd.f32 %v1038_v0, %v937_v17  ;;  %v910_v17 = vmul.f32 %v10354_v2, %v10247_v32 }
 0x193   : > { %v700_v48 = vadd.f32 %v630_v50, %v528_v20 }
 0x195   : > { %1625 = vrot.lane.b32.xlu1 %v1554_v39, %s9912_s10  ;;  %v1616_v6 = vpop.permute.xlu0 %1615 }
 0x196   : > { %v1689_v46 = vadd.f32 %v1616_v6, %v1517_v37  ;;  %v1208_v42 = vpop.permute.xlu1 %1207 }
 0x197   : > { %v1280_v12 = vadd.f32 %v1208_v42, %v1108_v43  ;;  %v10660_v43 = vld [vmem:[%s10029_s25 + $0x13] ss:$0 sm:$0xff]  ;;  %v1319_v42 = vmul.f32 %v10354_v2, %v10236_v26 }
 0x198   : > { %v10655_v4 = vadd.f32 %v10249_v33, %v1689_v46  ;;  %v1384_v34 = vmul.f32 %v10660_v43, %v10068_v25  ;;  %v975_v38 = vmul.f32 %v10660_v43, %v10039_v14 }
 0x199   : > { %1219 = vrot.lane.b32.xlu1 %v1146_v8, %s9912_s10  ;;  %v1210_v22 = vpop.permute.xlu0 %1209  ;;  %v1346_v54 = vadd.f32 %v1318_v58, %v1280_v12  ;;  %v1556_v12 = vmul.f32 %v10660_v43, %v10083_v30 }
 0x19a   : > { %v13897_v39 = vmax.f32 %v10655_v4, 0.0  ;;  %v1281_v37 = vadd.f32 %v1210_v22, %v1109_v36  ;;  %v802_v6 = vpop.permute.xlu1 %801 }
 0x19b   : > { %v872_v15 = vadd.f32 %v802_v6, %v700_v48 }
 0x19c   : > { %1817 = vrot.lane.b32.xlu0 %v13897_v39, %s9911_s26  ;;  %v1347_v0 = vadd.f32 %v1319_v42, %v1281_v37 }
 0x19d   : > { %1457 = vrot.lane.b32.xlu1 %v1384_v34, %s9911_s26  ;;  %v1448_v50 = vpop.permute.xlu0 %1447  ;;  %v938_v46 = vadd.f32 %v910_v17, %v872_v15  ;;  %v529_v15 = vmul.f32 %v10354_v2, %v10234_v24  ;;  %v911_v2 = vmul.f32 %v10433_v9, %v10247_v32 }
 0x19e   : > { %v1446_v20 = vpop.permute.xlu1 %1445  ;;  %v1519_v8 = vadd.f32 %v1448_v50, %v1347_v0 }
 0x19f   : > { %v1518_v6 = vadd.f32 %v1446_v20, %v1346_v54  ;;  %v565_v20 = vmul.f32 %v10627_v40, %v10037_v13 }
 0x1a1   : > { %1629 = vrot.lane.b32.xlu1 %v1556_v12, %s9912_s10  ;;  %v1620_v58 = vpop.permute.xlu0 %1619 }
 0x1a2   : > { %v1691_v36 = vadd.f32 %v1620_v58, %v1519_v8  ;;  %v1040_v48 = vpop.permute.xlu1 %1039 }
 0x1a3   : > { %v1110_v0 = vadd.f32 %v1040_v48, %v938_v46 }
 0x1a4   : > { %v10676_v22 = vadd.f32 %v10249_v33, %v1691_v36  ;;  %v1320_v36 = vmul.f32 %v10433_v9, %v10236_v26 }
 0x1a5   : > { %v632_v39 = vpop.permute.xlu0 %631 }
 0x1a6   : > { %v1753_v37 = vmax.f32 %v10676_v22, 0.0  ;;  %v1618_v42 = vpop.permute.xlu1 %1617  ;;  %v701_v17 = vadd.f32 %v632_v39, %v529_v15  ;;  %v533_v22 = vmul.f32 %v10627_v40, %v10234_v24 }
 0x1a7   : > { %v1690_v34 = vadd.f32 %v1618_v42, %v1518_v6 }
 0x1a8   : > { %1821 = vrot.lane.b32.xlu0 %v1753_v37, %s9911_s26 }
 0x1a9   : > { %v10685_v50 = vadd.f32 %v10249_v33, %v1690_v34  ;;  %v804_v12 = vpop.permute.xlu0 %803  ;;  %v737_v34 = vmul.f32 %v10627_v40, %v10049_v18 }
 0x1aa   : > { %v873_v8 = vadd.f32 %v804_v12, %v701_v17  ;;  %v1212_v54 = vpop.permute.xlu1 %1211 }
 0x1ab   : > { %v1752_v58 = vmax.f32 %v10685_v50, 0.0  ;;  %v1282_v39 = vadd.f32 %v1212_v54, %v1110_v0  ;;  %v915_v50 = vmul.f32 %v10660_v43, %v10247_v32 }
 0x1ac   : > { %639 = vrot.lane.b32.xlu0 %v565_v20, %s9911_s26  ;;  %v10695_v46 = vadd.f32 %v911_v2, %v873_v8  ;;  %v10715_v8 = vld [vmem:[%s10029_s25 + $0x14] ss:$0 sm:$0xff] }
 0x1ad   : > { %1819 = vrot.lane.b32.xlu1 %v1752_v58, %s9911_s26  ;;  %v1798_v48 = vpop.permute.xlu0 %1797  ;;  %v1348_v6 = vadd.f32 %v1320_v36, %v1282_v39  ;;  %v567_v36 = vmul.f32 %v10715_v8, %v10037_v13  ;;  %v1385_v62 = vmul.f32 %v10715_v8, %v10068_v25  ;;  %v1557_v53 = vmul.f32 %v10715_v8, %v10083_v30 }
 0x1ae   : > { %v1881_v15 = vmax.f32 %v1741_v5, %v1798_v48  ;;  %v1450_v42 = vpop.permute.xlu1 %1449 }
 0x1af   : > { %v1520_v17 = vadd.f32 %v1450_v42, %v1348_v6  ;;  %v530_v6 = vmul.f32 %v10433_v9, %v10234_v24  ;;  %v566_v42 = vmul.f32 %v10660_v43, %v10037_v13 }
 0x1b0   : > { %811 = vrot.lane.b32.xlu0 %v737_v34, %s9912_s10  ;;  %8470 = vmatmul.mubr.msk.f32.vlgmr.msra.gmra.mrb[0].mxu0 %vm1933_vm15, %v1881_v15  ;;  %v912_v34 = vmul.f32 %v10491_v60, %v10247_v32 }
 0x1b1   : > { %8869 = vmatpush3.bf16.msk.msra.mxu0 %vm10427_vm12, %v9916_v10  ;;  %v1042_v0 = vpop.permute.xlu0 %1041  ;;  %8491 = vmatprep.mubr.msk.f32.mxu0 %vm9914_vm3, %v9915_v52 }
 0x1b2   : > { %v1622_v12 = vpop.permute.xlu1 %1621  ;;  %8870 = vmatprep.subr.bf16.mxu0 %v9913_v19 }
 0x1b3   : > { %v1692_v5 = vadd.f32 %v1622_v12, %v1520_v17 }
 0x1b4   : > { %1049 = vrot.lane.b32.xlu0 %v975_v38, %s9911_s26  ;;  %v739_v38 = vmul.f32 %v10715_v8, %v10049_v18 }
 0x1b5   : > { %v10719_v54 = vadd.f32 %v10249_v33, %v1692_v5  ;;  %8873 = vmatpush3.bf16.msk.msra.mxu0 %vm10451_vm14, %v10439_v35  ;;  %v1802_v20 = vpop.permute.xlu0 %1801 }
 0x1b6   : > { %v1883_v2 = vmax.f32 %v1743_v28, %v1802_v20  ;;  %v634_v39 = vpop.permute.xlu1 %633  ;;  %8881 = vmatprep.subr.bf16.mxu0 %v9913_v19  ;;  %v1147_v28 = vmul.f32 %v10660_v43, %v10056_v21  ;;  %v738_v20 = vmul.f32 %v10660_v43, %v10049_v18 }
 0x1b7   : > { %v1754_v48 = vmax.f32 %v10719_v54, 0.0  ;;  %v702_v15 = vadd.f32 %v634_v39, %v530_v6 }
 0x1b8   : > { %643 = vrot.lane.b32.xlu0 %v567_v36, %s9911_s26  ;;  %8492 = vmatmul.mubr.msk.f32.vlgmr.msra.gmra.mrb[2].mxu0 %vm1933_vm15, %v1883_v2  ;;  %v10780_v36 = vld [vmem:[%s10029_s25 + $0x15] ss:$0 sm:$0xff] }
 0x1b9   : > { %1823 = vrot.lane.b32.xlu1 %v1754_v48, %s9911_s26  ;;  %8883 = vmatpush3.bf16.msk.msra.mxu0 %vm10427_vm12, %v9916_v10  ;;  %v10766_v2 = vpop.permute.xlu0 %635 }
 0x1ba   : > { %v806_v45 = vpop.permute.xlu1 %805  ;;  %8884 = vmatprep.subr.bf16.mxu0 %v9913_v19  ;;  %8513 = vmatprep.mubr.msk.f32.mxu0 %vm9914_vm3, %v9915_v52 }
 0x1bb   : > { %v874_v9 = vadd.f32 %v806_v45, %v702_v15  ;;  %v977_v45 = vmul.f32 %v10780_v36, %v10039_v14 }
 0x1bc   : > { %1221 = vrot.lane.b32.xlu0 %v1147_v28, %s9912_s10 }
 0x1bd   : > { %641 = vrot.lane.b32.xlu1 %v566_v42, %s9911_s26  ;;  %v10751_v17 = vadd.f32 %v912_v34, %v874_v9  ;;  %8887 = vmatpush3.bf16.msk.msra.mxu0 %vm10451_vm14, %v10439_v35  ;;  %v568_v42 = vmul.f32 %v10780_v36, %v10037_v13  ;;  %v1111_v34 = vadd.f32 %v1042_v0, %v10695_v46 }
 0x1be   : > { %v1800_v12 = vpop.permute.xlu1 %1799  ;;  %8895 = vmatprep.subr.bf16.mxu0 %v9913_v19  ;;  %v1321_v46 = vmul.f32 %v10491_v60, %v10236_v26 }
 0x1bf   : > { %v1882_v5 = vmax.f32 %v1742_v23, %v1800_v12  ;;  %v976_v23 = vmul.f32 %v10715_v8, %v10039_v14  ;;  %v1149_v12 = vmul.f32 %v10780_v36, %v10056_v21 }
 0x1c0   : > { %815 = vrot.lane.b32.xlu0 %v739_v38, %s9912_s10  ;;  %v740_v38 = vmul.f32 %v10780_v36, %v10049_v18 }
 0x1c1   : > { %813 = vrot.lane.b32.xlu1 %v738_v20, %s9912_s10  ;;  %8481 = vmatmul.mubr.msk.f32.vlgmr.msra.gmra.mrb[0].mxu1 %vm1933_vm15, %v1882_v5  ;;  %v10836_v5 = vld [vmem:[%s10029_s25 + $0x16] ss:$0 sm:$0xff] }
 0x1c2   : > { %8876 = vmatpush3.bf16.msk.msra.mxu1 %vm10427_vm12, %v9916_v10  ;;  %v1044_v39 = vpop.permute.xlu1 %1043  ;;  %8502 = vmatprep.mubr.msk.f32.mxu1 %vm9914_vm3, %v9915_v52  ;;  %v1387_v20 = vmul.f32 %v10836_v5, %v10068_v25 }
 0x1c3   : > { %8877 = vmatprep.subr.bf16.mxu1 %v9913_v19 }
 0x1c4   : > { %1459 = vrot.lane.b32.xlu0 %v1385_v62, %s9911_s26 }
 0x1c5   : > { %1051 = vrot.lane.b32.xlu1 %v976_v23, %s9911_s26  ;;  %v1386_v23 = vmul.f32 %v10780_v36, %v10068_v25 }
 0x1c6   : > { %8880 = vmatpush3.bf16.msk.msra.mxu1 %vm10451_vm14, %v10439_v35  ;;  %v1804_v6 = vpop.permute.xlu1 %1803  ;;  %v1806_v15 = vpop.permute.xlu0 %1805 }
 0x1c7   : > { %v1884_v28 = vmax.f32 %v1744_v56, %v1804_v6  ;;  %v1885_v9 = vmax.f32 %v1745_v57, %v1806_v15  ;;  %8888 = vmatprep.subr.bf16.mxu1 %v9913_v19  ;;  %v1148_v57 = vmul.f32 %v10715_v8, %v10056_v21  ;;  %v1559_v6 = vmul.f32 %v10836_v5, %v10083_v30 }
 0x1c8   : > { %1053 = vrot.lane.b32.xlu0 %v977_v45, %s9911_s26  ;;  %v978_v45 = vmul.f32 %v10836_v5, %v10039_v14 }
 0x1c9   : > { %645 = vrot.lane.b32.xlu1 %v568_v42, %s9911_s26  ;;  %8503 = vmatmul.mubr.msk.f32.vlgmr.msra.gmra.mrb[2].mxu1 %vm1933_vm15, %v1884_v28 }
 0x1ca   : > { %8514 = vmatmul.mubr.msk.f32.vlgmr.msra.gmra.mrb[4].mxu0 %vm1933_vm15, %v1885_v9  ;;  %v1214_v7 = vpop.permute.xlu0 %1213  ;;  %8890 = vmatpush3.bf16.msk.msra.mxu1 %vm10427_vm12, %v9916_v10  ;;  %v638_v62 = vpop.permute.xlu1 %637  ;;  %v1112_v9 = vadd.f32 %v1044_v39, %v10751_v17 }
 0x1cb   : > { %v1283_v56 = vadd.f32 %v1214_v7, %v1111_v34  ;;  %8891 = vmatprep.subr.bf16.mxu1 %v9913_v19  ;;  %8524 = vmatprep.mubr.msk.f32.mxu1 %vm9914_vm3, %v9915_v52  ;;  %v1558_v34 = vmul.f32 %v10780_v36, %v10083_v30  ;;  %v531_v7 = vmul.f32 %v10491_v60, %v10234_v24  ;;  %v10882_v60 = vld [vmem:[%s10029_s25 + $0x17] ss:$0 sm:$0xff] }
 0x1cc   : > { %1631 = vrot.lane.b32.xlu0 %v1557_v53, %s9912_s10  ;;  %8897 = vmatpush3.bf16.msk.msra.mxu0 %vm10427_vm12, %v9916_v10 }
 0x1cd   : > { %1223 = vrot.lane.b32.xlu1 %v1148_v57, %s9912_s10  ;;  %8898 = vmatprep.subr.bf16.mxu0 %v9913_v19  ;;  %v10818_v0 = vadd.f32 %v1321_v46, %v1283_v56  ;;  %v1150_v56 = vmul.f32 %v10836_v5, %v10056_v21  ;;  %v703_v57 = vadd.f32 %v10766_v2, %v531_v7 }
 0x1ce   : > { %8894 = vmatpush3.bf16.msk.msra.mxu1 %vm10451_vm14, %v10439_v35  ;;  %8535 = vmatprep.mubr.msk.f32.mxu0 %vm9914_vm3, %v9915_v52  ;;  %v913_v2 = vmul.f32 %v10528_v61, %v10247_v32 }
 0x1cf   : > { %8902 = vmatprep.subr.bf16.mxu1 %v9913_v19 }
 0x1d0   : > { %1225 = vrot.lane.b32.xlu0 %v1149_v12, %s9912_s10  ;;  %8901 = vmatpush3.bf16.msk.msra.mxu0 %vm10451_vm14, %v10439_v35 }
 0x1d1   : > { %817 = vrot.lane.b32.xlu1 %v740_v38, %s9912_s10  ;;  %8909 = vmatprep.subr.bf16.mxu0 %v9913_v19  ;;  %v1560_v38 = vmul.f32 %v10882_v60, %v10083_v30 }
 0x1d4   : > { %1463 = vrot.lane.b32.xlu0 %v1387_v20, %s9911_s26 }
 0x1d5   : > { %1461 = vrot.lane.b32.xlu1 %v1386_v23, %s9911_s26 }
 0x1d7   : > { %v1808_v15 = vpop.permute.xlu1 %1807 }
 0x1d8   : > { %v1886_v28 = vmax.f32 %v1746_v11, %v1808_v15  ;;  %1635 = vrot.lane.b32.xlu0 %v1559_v6, %s9912_s10  ;;  %v1322_v11 = vmul.f32 %v10528_v61, %v10236_v26 }
 0x1d9   : > { %1055 = vrot.lane.b32.xlu1 %v978_v45, %s9911_s26  ;;  %v532_v45 = vmul.f32 %v10528_v61, %v10234_v24 }
 0x1da   : > { %8525 = vmatmul.mubr.msk.f32.vlgmr.msra.gmra.mrb[4].mxu1 %vm1933_vm15, %v1886_v28 }
 0x1db   : > { %v1216_v42 = vpop.permute.xlu1 %1215  ;;  %8904 = vmatpush3.bf16.msk.msra.mxu1 %vm10427_vm12, %v9916_v10  ;;  %8546 = vmatprep.mubr.msk.f32.mxu1 %vm9914_vm3, %v9915_v52 }
 0x1dc   : > { %v1284_v59 = vadd.f32 %v1216_v42, %v1112_v9  ;;  %8905 = vmatprep.subr.bf16.mxu1 %v9913_v19 }
 0x1dd   : > { %1633 = vrot.lane.b32.xlu1 %v1558_v34, %s9912_s10 }
 0x1de   : > { %v1810_v17 = vpop.permute.xlu0 %1809  ;;  %v10866_v39 = vadd.f32 %v1322_v11, %v1284_v59 }
 0x1df   : > { %v1887_v53 = vmax.f32 %v1747_v44, %v1810_v17  ;;  %8908 = vmatpush3.bf16.msk.msra.mxu1 %vm10451_vm14, %v10439_v35  ;;  %v1388_v44 = vmul.f32 %v10882_v60, %v10068_v25 }
 0x1e0   : > { %8916 = vmatprep.subr.bf16.mxu1 %v9913_v19 }
 0x1e1   : > { %1227 = vrot.lane.b32.xlu1 %v1150_v56, %s9912_s10  ;;  %8536 = vmatmul.mubr.msk.f32.vlgmr.msra.gmra.mrb[6].mxu0 %vm1933_vm15, %v1887_v53 }
 0x1e2   : > { %v808_v46 = vpop.permute.xlu0 %807  ;;  %8911 = vmatpush3.bf16.msk.msra.mxu0 %vm10427_vm12, %v9916_v10  ;;  %8557 = vmatprep.mubr.msk.f32.mxu0 %vm9914_vm3, %v9915_v52 }
 0x1e3   : > { %v875_v3 = vadd.f32 %v808_v46, %v703_v57  ;;  %8912 = vmatprep.subr.bf16.mxu0 %v9913_v19 }
 0x1e5   : > { %1465 = vrot.lane.b32.xlu1 %v1388_v44, %s9911_s26  ;;  %v941_v12 = vadd.f32 %v913_v2, %v875_v3 }
 0x1e6   : > { %8915 = vmatpush3.bf16.msk.msra.mxu0 %vm10451_vm14, %v10439_v35 }
 0x1e7   : > { %8923 = vmatprep.subr.bf16.mxu0 %v9913_v19 }
 0x1e9   : > { %1637 = vrot.lane.b32.xlu1 %v1560_v38, %s9912_s10 }
 0x1ea   : > { %v1814_v20 = vpop.permute.xlu0 %1813 }
 0x1eb   : > { %v1889_v23 = vmax.f32 %v1749_v16, %v1814_v20  ;;  %v704_v16 = vadd.f32 %v638_v62, %v532_v45 }
 0x1ed   : > { %8558 = vmatmul.mubr.msk.f32.vlgmr.msra.gmra.mrb[8].mxu0 %vm1933_vm15, %v1889_v23 }
 0x1ee   : > { %v1452_v6 = vpop.permute.xlu0 %1451  ;;  %8925 = vmatpush3.bf16.msk.msra.mxu0 %vm10427_vm12, %v9916_v10  ;;  %8579 = vmatprep.mubr.msk.f32.mxu0 %vm9914_vm3, %v9915_v52 }
 0x1ef   : > { %v1812_v15 = vpop.permute.xlu1 %1811  ;;  %8926 = vmatprep.subr.bf16.mxu0 %v9913_v19 }
 0x1f0   : > { %v1888_v55 = vmax.f32 %v1748_v49, %v1812_v15  ;;  %v1521_v49 = vadd.f32 %v1452_v6, %v10818_v0  ;;  %v1323_v0 = vmul.f32 %v10627_v40, %v10236_v26 }
 0x1f2   : > { %8547 = vmatmul.mubr.msk.f32.vlgmr.msra.gmra.mrb[6].mxu1 %vm1933_vm15, %v1888_v55  ;;  %v1046_v28 = vpop.permute.xlu0 %1045  ;;  %8929 = vmatpush3.bf16.msk.msra.mxu0 %vm10451_vm14, %v10439_v35 }
 0x1f3   : > { %v810_v9 = vpop.permute.xlu1 %809  ;;  %8918 = vmatpush3.bf16.msk.msra.mxu1 %vm10427_vm12, %v9916_v10  ;;  %8568 = vmatprep.mubr.msk.f32.mxu1 %vm9914_vm3, %v9915_v52  ;;  %v1113_v59 = vadd.f32 %v1046_v28, %v941_v12  ;;  %v569_v28 = vmul.f32 %v10836_v5, %v10037_v13 }
 0x1f4   : > { %v876_v61 = vadd.f32 %v810_v9, %v704_v16  ;;  %8919 = vmatprep.subr.bf16.mxu1 %v9913_v19  ;;  %8937 = vmatprep.subr.bf16.mxu0 %v9913_v19 }
 0x1f6   : > { %v1624_v62 = vpop.permute.xlu0 %1623  ;;  %v942_v42 = vadd.f32 %v914_v51, %v876_v61 }
 0x1f7   : > { %v1693_v34 = vadd.f32 %v1624_v62, %v1521_v49  ;;  %8922 = vmatpush3.bf16.msk.msra.mxu1 %vm10451_vm14, %v10439_v35  ;;  %v13906_v62 = vmax.f32 %v10655_v4, 0.0  ;;  %v979_v4 = vmul.f32 %v10882_v60, %v10039_v14 }
 0x1f8   : > { %8930 = vmatprep.subr.bf16.mxu1 %v9913_v19 }
 0x1f9   : > { %v10934_v11 = vadd.f32 %v10249_v33, %v1693_v34 }
 0x1fa   : > { %v1218_v17 = vpop.permute.xlu0 %1217 }
 0x1fb   : > { %v1755_v7 = vmax.f32 %v10934_v11, 0.0  ;;  %v1285_v53 = vadd.f32 %v1218_v17, %v1113_v59  ;;  %v1816_v56 = vpop.permute.xlu1 %1815  ;;  %v741_v59 = vmul.f32 %v10836_v5, %v10049_v18 }
 0x1fc   : > { %v1890_v57 = vmax.f32 %v1750_v63, %v1816_v56 }
 0x1fd   : > { %1825 = vrot.lane.b32.xlu0 %v1755_v7, %s9911_s26  ;;  %v1351_v46 = vadd.f32 %v1323_v0, %v1285_v53  ;;  %v10990_v0 = vld [vmem:[%s10029_s25 + $0x18] ss:$0 sm:$0xff] }
 0x1fe   : > { %8569 = vmatmul.mubr.msk.f32.vlgmr.msra.gmra.mrb[8].mxu1 %vm1933_vm15, %v1890_v57  ;;  %v1456_v3 = vpop.permute.xlu0 %1455 }
 0x1ff   : > { %v1454_v44 = vpop.permute.xlu1 %1453  ;;  %8932 = vmatpush3.bf16.msk.msra.mxu1 %vm10427_vm12, %v9916_v10  ;;  %8590 = vmatprep.mubr.msk.f32.mxu1 %vm9914_vm3, %v9915_v52  ;;  %v1523_v47 = vadd.f32 %v1456_v3, %v1351_v46  ;;  %v571_v46 = vmul.f32 %v10990_v0, %v10037_v13 }
 0x200   : > { %8933 = vmatprep.subr.bf16.mxu1 %v9913_v19  ;;  %v1522_v20 = vadd.f32 %v1454_v44, %v10866_v39  ;;  %v1324_v39 = vmul.f32 %v10660_v43, %v10236_v26 }
 0x202   : > { %v1628_v63 = vpop.permute.xlu0 %1627 }
 0x203   : > { %v1695_v2 = vadd.f32 %v1628_v63, %v1523_v47  ;;  %v1048_v12 = vpop.permute.xlu1 %1047  ;;  %8936 = vmatpush3.bf16.msk.msra.mxu1 %vm10451_vm14, %v10439_v35  ;;  %v1151_v63 = vmul.f32 %v10882_v60, %v10056_v21 }
 0x204   : > { %8944 = vmatprep.subr.bf16.mxu1 %v9913_v19  ;;  %v1114_v45 = vadd.f32 %v1048_v12, %v942_v42 }
 0x205   : > { %v10956_v38 = vadd.f32 %v10249_v33, %v1695_v2  ;;  %v570_v2 = vmul.f32 %v10882_v60, %v10037_v13 }
 0x207   : > { %v1757_v23 = vmax.f32 %v10956_v38, 0.0  ;;  %v1626_v6 = vpop.permute.xlu1 %1625 }
 0x208   : > { %v1694_v15 = vadd.f32 %v1626_v6, %v1522_v20  ;;  %v743_v20 = vmul.f32 %v10990_v0, %v10049_v18 }
 0x209   : > { %1829 = vrot.lane.b32.xlu0 %v1757_v23, %s9911_s26 }
 0x20a   : > { %v10964_v55 = vadd.f32 %v10249_v33, %v1694_v15  ;;  %v742_v15 = vmul.f32 %v10882_v60, %v10049_v18 }
 0x20b   : > { %v1220_v16 = vpop.permute.xlu1 %1219 }
 0x20c   : > { %v1756_v9 = vmax.f32 %v10964_v55, 0.0  ;;  %v1286_v61 = vadd.f32 %v1220_v16, %v1114_v45 }
 0x20d   : > { %647 = vrot.lane.b32.xlu0 %v569_v28, %s9911_s26  ;;  %v1389_v28 = vmul.f32 %v10990_v0, %v10068_v25 }
 0x20e   : > { %1827 = vrot.lane.b32.xlu1 %v1756_v9, %s9911_s26  ;;  %v1818_v51 = vpop.permute.xlu0 %1817  ;;  %v1352_v49 = vadd.f32 %v1324_v39, %v1286_v61  ;;  %v11050_v39 = vld [vmem:[%s10029_s25 + $0x19] ss:$0 sm:$0xff] }
 0x20f   : > { %v1891_v42 = vmax.f32 %v13906_v62, %v1818_v51  ;;  %v1458_v34 = vpop.permute.xlu1 %1457  ;;  %v572_v62 = vmul.f32 %v11050_v39, %v10037_v13  ;;  %v1153_v54 = vmul.f32 %v11050_v39, %v10056_v21 }
 0x210   : > { %v1524_v17 = vadd.f32 %v1458_v34, %v1352_v49  ;;  %v981_v49 = vmul.f32 %v11050_v39, %v10039_v14 }
 0x211   : > { %819 = vrot.lane.b32.xlu0 %v741_v59, %s9912_s10  ;;  %8580 = vmatmul.mubr.msk.f32.vlgmr.msra.gmra.mrb[10].mxu0 %vm1933_vm15, %v1891_v42  ;;  %v1561_v59 = vmul.f32 %v10990_v0, %v10083_v30 }
 0x212   : > { %8939 = vmatpush3.bf16.msk.msra.mxu0 %vm10427_vm12, %v9916_v10  ;;  %8601 = vmatprep.mubr.msk.f32.mxu0 %vm9914_vm3, %v9915_v52 }
 0x213   : > { %v1630_v53 = vpop.permute.xlu1 %1629  ;;  %8940 = vmatprep.subr.bf16.mxu0 %v9913_v19 }
 0x214   : > { %v1696_v56 = vadd.f32 %v1630_v53, %v1524_v17  ;;  %v1152_v53 = vmul.f32 %v10990_v0, %v10056_v21 }
 0x215   : > { %1057 = vrot.lane.b32.xlu0 %v979_v4, %s9911_s26 }
 0x216   : > { %v10994_v57 = vadd.f32 %v10249_v33, %v1696_v56  ;;  %8943 = vmatpush3.bf16.msk.msra.mxu0 %vm10451_vm14, %v10439_v35  ;;  %v535_v56 = vmul.f32 %v10715_v8, %v10234_v24 }
 0x217   : > { %8951 = vmatprep.subr.bf16.mxu0 %v9913_v19 }
 0x218   : > { %v1758_v3 = vmax.f32 %v10994_v57, 0.0  ;;  %v538_v57 = vmul.f32 %v10882_v60, %v10234_v24 }
 0x219   : > { %651 = vrot.lane.b32.xlu0 %v571_v46, %s9911_s26 }
 0x21a   : > { %1831 = vrot.lane.b32.xlu1 %v1758_v3, %s9911_s26  ;;  %v1822_v44 = vpop.permute.xlu0 %1821 }
 0x21b   : > { %v1893_v47 = vmax.f32 %v1753_v37, %v1822_v44 }
 0x21d   : > { %1229 = vrot.lane.b32.xlu0 %v1151_v63, %s9912_s10  ;;  %8602 = vmatmul.mubr.msk.f32.vlgmr.msra.gmra.mrb[12].mxu0 %vm1933_vm15, %v1893_v47  ;;  %v534_v63 = vmul.f32 %v10660_v43, %v10234_v24 }
 0x21e   : > { %649 = vrot.lane.b32.xlu1 %v570_v2, %s9911_s26  ;;  %v640_v12 = vpop.permute.xlu0 %639  ;;  %8953 = vmatpush3.bf16.msk.msra.mxu0 %vm10427_vm12, %v9916_v10  ;;  %v744_v2 = vmul.f32 %v11050_v39, %v10049_v18 }
 0x21f   : > { %v1820_v37 = vpop.permute.xlu1 %1819  ;;  %8954 = vmatprep.subr.bf16.mxu0 %v9913_v19  ;;  %8623 = vmatprep.mubr.msk.f32.mxu0 %vm9914_vm3, %v9915_v52  ;;  %v705_v45 = vadd.f32 %v640_v12, %v533_v22 }
 0x220   : > { %v1892_v6 = vmax.f32 %v1752_v58, %v1820_v37  ;;  %v980_v58 = vmul.f32 %v10990_v0, %v10039_v14 }
 0x221   : > { %823 = vrot.lane.b32.xlu0 %v743_v20, %s9912_s10 }
 0x222   : > { %821 = vrot.lane.b32.xlu1 %v742_v15, %s9912_s10  ;;  %8591 = vmatmul.mubr.msk.f32.vlgmr.msra.gmra.mrb[10].mxu1 %vm1933_vm15, %v1892_v6  ;;  %v812_v40 = vpop.permute.xlu0 %811  ;;  %v11092_v6 = vld [vmem:[%s10029_s25 + $0x1a] ss:$0 sm:$0xff] }
 0x223   : > { %v877_v16 = vadd.f32 %v812_v40, %v705_v45  ;;  %8946 = vmatpush3.bf16.msk.msra.mxu1 %vm10427_vm12, %v9916_v10  ;;  %8612 = vmatprep.mubr.msk.f32.mxu1 %vm9914_vm3, %v9915_v52  ;;  %v1391_v43 = vmul.f32 %v11092_v6, %v10068_v25  ;;  %v917_v40 = vmul.f32 %v10780_v36, %v10247_v32 }
 0x224   : > { %8947 = vmatprep.subr.bf16.mxu1 %v9913_v19  ;;  %8957 = vmatpush3.bf16.msk.msra.mxu0 %vm10451_vm14, %v10439_v35 }
 0x225   : > { %1467 = vrot.lane.b32.xlu0 %v1389_v28, %s9911_s26  ;;  %v943_v61 = vadd.f32 %v915_v50, %v877_v16  ;;  %8965 = vmatprep.subr.bf16.mxu0 %v9913_v19  ;;  %v1390_v28 = vmul.f32 %v11050_v39, %v10068_v25  ;;  %v916_v50 = vmul.f32 %v10715_v8, %v10247_v32 }
 0x226   : > { %1059 = vrot.lane.b32.xlu1 %v980_v58, %s9911_s26  ;;  %v1050_v51 = vpop.permute.xlu0 %1049 }
 0x227   : > { %8950 = vmatpush3.bf16.msk.msra.mxu1 %vm10451_vm14, %v10439_v35  ;;  %v1115_v4 = vadd.f32 %v1050_v51, %v943_v61 }
 0x228   : > { %8958 = vmatprep.subr.bf16.mxu1 %v9913_v19 }
 0x229   : > { %1061 = vrot.lane.b32.xlu0 %v981_v49, %s9911_s26 }
 0x22a   : > { %653 = vrot.lane.b32.xlu1 %v572_v62, %s9911_s26  ;;  %v644_v42 = vpop.permute.xlu0 %643  ;;  %v1563_v62 = vmul.f32 %v11092_v6, %v10083_v30 }
 0x22b   : > { %v1824_v34 = vpop.permute.xlu1 %1823  ;;  %v707_v12 = vadd.f32 %v644_v42, %v535_v56  ;;  %v982_v42 = vmul.f32 %v11092_v6, %v10039_v14 }
 0x22c   : > { %v1894_v17 = vmax.f32 %v1754_v48, %v1824_v34  ;;  %v1325_v48 = vmul.f32 %v10715_v8, %v10236_v26 }
 0x22d   : > { %1639 = vrot.lane.b32.xlu0 %v1561_v59, %s9912_s10  ;;  %v1562_v59 = vmul.f32 %v11050_v39, %v10083_v30 }
 0x22e   : > { %1231 = vrot.lane.b32.xlu1 %v1152_v53, %s9912_s10  ;;  %8613 = vmatmul.mubr.msk.f32.vlgmr.msra.gmra.mrb[12].mxu1 %vm1933_vm15, %v1894_v17  ;;  %v1222_v46 = vpop.permute.xlu0 %1221 }
 0x22f   : > { %v1287_v44 = vadd.f32 %v1222_v46, %v1115_v4  ;;  %v642_v47 = vpop.permute.xlu1 %641  ;;  %8960 = vmatpush3.bf16.msk.msra.mxu1 %vm10427_vm12, %v9916_v10  ;;  %8634 = vmatprep.mubr.msk.f32.mxu1 %vm9914_vm3, %v9915_v52 }
 0x230   : > { %8961 = vmatprep.subr.bf16.mxu1 %v9913_v19  ;;  %v706_v37 = vadd.f32 %v642_v47, %v534_v63 }
 0x231   : > { %1233 = vrot.lane.b32.xlu0 %v1153_v54, %s9912_s10  ;;  %v1353_v22 = vadd.f32 %v1325_v48, %v1287_v44  ;;  %v536_v44 = vmul.f32 %v10780_v36, %v10234_v24  ;;  %v1154_v54 = vmul.f32 %v11092_v6, %v10056_v21  ;;  %v1326_v48 = vmul.f32 %v10780_v36, %v10236_v26 }
 0x232   : > { %825 = vrot.lane.b32.xlu1 %v744_v2, %s9912_s10  ;;  %v816_v20 = vpop.permute.xlu0 %815 }
 0x233   : > { %v879_v15 = vadd.f32 %v816_v20, %v707_v12  ;;  %v814_v45 = vpop.permute.xlu1 %813  ;;  %8964 = vmatpush3.bf16.msk.msra.mxu1 %vm10451_vm14, %v10439_v35 }
 0x234   : > { %v878_v16 = vadd.f32 %v814_v45, %v706_v37  ;;  %8972 = vmatprep.subr.bf16.mxu1 %v9913_v19 }
 0x235   : > { %1471 = vrot.lane.b32.xlu0 %v1391_v43, %s9911_s26  ;;  %v945_v58 = vadd.f32 %v917_v40, %v879_v15  ;;  %v11129_v43 = vld [vmem:[%s10029_s25 + $0x1b] ss:$0 sm:$0xff]  ;;  %v1327_v40 = vmul.f32 %v10836_v5, %v10236_v26 }
 0x236   : > { %1469 = vrot.lane.b32.xlu1 %v1390_v28, %s9911_s26  ;;  %v1460_v61 = vpop.permute.xlu0 %1459  ;;  %v944_v51 = vadd.f32 %v916_v50, %v878_v16  ;;  %v1392_v36 = vmul.f32 %v11129_v43, %v10068_v25  ;;  %v918_v28 = vmul.f32 %v10836_v5, %v10247_v32 }
 0x237   : > { %v1052_v49 = vpop.permute.xlu1 %1051  ;;  %v1525_v17 = vadd.f32 %v1460_v61, %v1353_v22 }
 0x238   : > { %v1116_v53 = vadd.f32 %v1052_v49, %v944_v51  ;;  %v1564_v49 = vmul.f32 %v11129_v43, %v10083_v30 }
 0x239   : > { %1643 = vrot.lane.b32.xlu0 %v1563_v62, %s9912_s10 }
 0x23a   : > { %1063 = vrot.lane.b32.xlu1 %v982_v42, %s9911_s26  ;;  %v1054_v8 = vpop.permute.xlu0 %1053 }
 0x23b   : > { %v646_v34 = vpop.permute.xlu1 %645  ;;  %v1117_v63 = vadd.f32 %v1054_v8, %v945_v58 }
 0x23c   : > { %v708_v12 = vadd.f32 %v646_v34, %v536_v44 }
 0x23e   : > { %1641 = vrot.lane.b32.xlu1 %v1562_v59, %s9912_s10  ;;  %v1632_v4 = vpop.permute.xlu0 %1631 }
 0x23f   : > { %v1697_v56 = vadd.f32 %v1632_v4, %v1525_v17  ;;  %v1224_v46 = vpop.permute.xlu1 %1223 }
 0x240   : > { %v1288_v47 = vadd.f32 %v1224_v46, %v1116_v53 }
 0x241   : > { %v11124_v2 = vadd.f32 %v10249_v33, %v1697_v56 }
 0x242   : > { %1235 = vrot.lane.b32.xlu1 %v1154_v54, %s9912_s10  ;;  %v1226_v22 = vpop.permute.xlu0 %1225  ;;  %v1354_v37 = vadd.f32 %v1326_v48, %v1288_v47  ;;  %v573_v54 = vmul.f32 %v11092_v6, %v10037_v13 }
 0x243   : > { %v1759_v20 = vmax.f32 %v11124_v2, 0.0  ;;  %v1289_v15 = vadd.f32 %v1226_v22, %v1117_v63  ;;  %v818_v45 = vpop.permute.xlu1 %817 }
 0x244   : > { %v880_v16 = vadd.f32 %v818_v45, %v708_v12  ;;  %v1328_v12 = vmul.f32 %v10882_v60, %v10236_v26 }
 0x245   : > { %1833 = vrot.lane.b32.xlu0 %v1759_v20, %s9911_s26  ;;  %v1355_v50 = vadd.f32 %v1327_v40, %v1289_v15  ;;  %v745_v15 = vmul.f32 %v11092_v6, %v10049_v18 }
 0x246   : > { %1473 = vrot.lane.b32.xlu1 %v1392_v36, %s9911_s26  ;;  %v1464_v58 = vpop.permute.xlu0 %1463  ;;  %v946_v61 = vadd.f32 %v918_v28, %v880_v16  ;;  %v983_v16 = vmul.f32 %v11129_v43, %v10039_v14 }
 0x247   : > { %v1462_v51 = vpop.permute.xlu1 %1461  ;;  %v1527_v62 = vadd.f32 %v1464_v58, %v1355_v50  ;;  %v1155_v50 = vmul.f32 %v11129_v43, %v10056_v21 }
 0x248   : > { %v1526_v17 = vadd.f32 %v1462_v51, %v1354_v37 }
 0x24a   : > { %1645 = vrot.lane.b32.xlu1 %v1564_v49, %s9912_s10  ;;  %v1636_v42 = vpop.permute.xlu0 %1635  ;;  %v574_v49 = vmul.f32 %v11129_v43, %v10037_v13 }
 0x24b   : > { %v1699_v8 = vadd.f32 %v1636_v42, %v1527_v62  ;;  %v1056_v34 = vpop.permute.xlu1 %1055  ;;  %v746_v42 = vmul.f32 %v11129_v43, %v10049_v18 }
 0x24c   : > { %v1118_v46 = vadd.f32 %v1056_v34, %v946_v61  ;;  %v11180_v61 = vld [vmem:[%s10029_s25 + $0x1c] ss:$0 sm:$0xff] }
 0x24d   : > { %v11145_v59 = vadd.f32 %v10249_v33, %v1699_v8  ;;  %v1393_v51 = vmul.f32 %v11180_v61, %v10068_v25  ;;  %v1565_v62 = vmul.f32 %v11180_v61, %v10083_v30  ;;  %v984_v8 = vmul.f32 %v11180_v61, %v10039_v14 }
 0x24f   : > { %v1761_v53 = vmax.f32 %v11145_v59, 0.0  ;;  %v1634_v4 = vpop.permute.xlu1 %1633 }
 0x250   : > { %v1698_v56 = vadd.f32 %v1634_v4, %v1526_v17  ;;  %v1156_v17 = vmul.f32 %v11180_v61, %v10056_v21  ;;  %v11202_v4 = vld [vmem:[%s10029_s25 + $0x1d] ss:$0 sm:$0xff] }
 0x251   : > { %1837 = vrot.lane.b32.xlu0 %v1761_v53, %s9911_s26  ;;  %v1394_v14 = vmul.f32 %v11202_v4, %v10068_v25  ;;  %v1566_v18 = vmul.f32 %v11202_v4, %v10083_v30  ;;  %v537_v30 = vmul.f32 %v10836_v5, %v10234_v24  ;;  %v919_v5 = vmul.f32 %v10882_v60, %v10247_v32 }
 0x252   : > { %v11152_v44 = vadd.f32 %v10249_v33, %v1698_v56 }
 0x253   : > { %v1228_v47 = vpop.permute.xlu1 %1227 }
 0x254   : > { %v1760_v48 = vmax.f32 %v11152_v44, 0.0  ;;  %v1290_v63 = vadd.f32 %v1228_v47, %v1118_v46 }
 0x255   : > { %655 = vrot.lane.b32.xlu0 %v573_v54, %s9911_s26 }
 0x256   : > { %1835 = vrot.lane.b32.xlu1 %v1760_v48, %s9911_s26  ;;  %v1356_v22 = vadd.f32 %v1328_v12, %v1290_v63 }
 0x257   : > { %v1466_v37 = vpop.permute.xlu1 %1465 }
 0x258   : > { %v1528_v45 = vadd.f32 %v1466_v37, %v1356_v22 }
 0x259   : > { %827 = vrot.lane.b32.xlu0 %v745_v15, %s9912_s10 }
 0x25b   : > { %v1638_v40 = vpop.permute.xlu1 %1637 }
 0x25c   : > { %v1700_v36 = vadd.f32 %v1638_v40, %v1528_v45 }
 0x25d   : > { %1065 = vrot.lane.b32.xlu0 %v983_v16, %s9911_s26  ;;  %v539_v16 = vmul.f32 %v10990_v0, %v10234_v24 }
 0x25e   : > { %v11170_v28 = vadd.f32 %v10249_v33, %v1700_v36 }
 0x260   : > { %v1762_v58 = vmax.f32 %v11170_v28, 0.0 }
 0x261   : > { %1237 = vrot.lane.b32.xlu0 %v1155_v50, %s9912_s10 }
 0x262   : > { %1839 = vrot.lane.b32.xlu1 %v1762_v58, %s9911_s26 }
 0x265   : > { %1475 = vrot.lane.b32.xlu0 %v1393_v51, %s9911_s26  ;;  %v1329_v51 = vmul.f32 %v10990_v0, %v10236_v26 }
 0x266   : > { %657 = vrot.lane.b32.xlu1 %v574_v49, %s9911_s26 }
 0x269   : > { %1647 = vrot.lane.b32.xlu0 %v1565_v62, %s9912_s10 }
 0x26a   : > { %829 = vrot.lane.b32.xlu1 %v746_v42, %s9912_s10 }
 0x26e   : > { %1067 = vrot.lane.b32.xlu1 %v984_v8, %s9911_s26 }
 0x26f   : > { %v1826_v13 = vpop.permute.xlu0 %1825 }
 0x270   : > { %v1895_v34 = vmax.f32 %v1755_v7, %v1826_v13 }
 0x272   : > { %1239 = vrot.lane.b32.xlu1 %v1156_v17, %s9912_s10  ;;  %8624 = vmatmul.mubr.msk.f32.vlgmr.msra.gmra.mrb[14].mxu0 %vm1933_vm15, %v1895_v34  ;;  %v921_v17 = vmul.f32 %v11050_v39, %v10247_v32 }
 0x273   : > { %8967 = vmatpush3.bf16.msk.msra.mxu0 %vm10427_vm12, %v9916_v10  ;;  %8645 = vmatprep.mubr.msk.f32.mxu0 %vm9914_vm3, %v9915_v52 }
 0x274   : > { %8968 = vmatprep.subr.bf16.mxu0 %v9913_v19 }
 0x276   : > { %1477 = vrot.lane.b32.xlu1 %v1394_v14, %s9911_s26 }
 0x277   : > { %8971 = vmatpush3.bf16.msk.msra.mxu0 %vm10451_vm14, %v10439_v35 }
 0x278   : > { %8979 = vmatprep.subr.bf16.mxu0 %v9913_v19 }
 0x27a   : > { %1649 = vrot.lane.b32.xlu1 %v1566_v18, %s9912_s10 }
 0x27b   : > { %v1830_v21 = vpop.permute.xlu0 %1829 }
 0x27c   : > { %v1897_v11 = vmax.f32 %v1757_v23, %v1830_v21  ;;  %v920_v21 = vmul.f32 %v10990_v0, %v10247_v32  ;;  %v540_v0 = vmul.f32 %v11050_v39, %v10234_v24 }
 0x27e   : > { %8646 = vmatmul.mubr.msk.f32.vlgmr.msra.gmra.mrb[16].mxu0 %vm1933_vm15, %v1897_v11 }
 0x27f   : > { %v648_v25 = vpop.permute.xlu0 %647  ;;  %8981 = vmatpush3.bf16.msk.msra.mxu0 %vm10427_vm12, %v9916_v10  ;;  %8667 = vmatprep.mubr.msk.f32.mxu0 %vm9914_vm3, %v9915_v52 }
 0x280   : > { %v1828_v7 = vpop.permute.xlu1 %1827  ;;  %8982 = vmatprep.subr.bf16.mxu0 %v9913_v19  ;;  %v709_v23 = vadd.f32 %v648_v25, %v537_v30 }
 0x281   : > { %v1896_v38 = vmax.f32 %v1756_v9, %v1828_v7 }
 0x283   : > { %v2007_v56 = vpop.f32.mrb[0].mxu0  ;;  %8635 = vmatmul.mubr.msk.f32.vlgmr.msra.gmra.mrb[14].mxu1 %vm1933_vm15, %v1896_v38  ;;  %v820_v46 = vpop.permute.xlu0 %819  ;;  %8985 = vmatpush3.bf16.msk.msra.mxu0 %vm10451_vm14, %v10439_v35 }
 0x284   : > { %v881_v47 = vadd.f32 %v820_v46, %v709_v23  ;;  %v8471_v54 = vpop.f32.mrb[1].mxu0  ;;  %8974 = vmatpush3.bf16.msk.msra.mxu1 %vm10427_vm12, %v9916_v10  ;;  %8656 = vmatprep.mubr.msk.f32.mxu1 %vm9914_vm3, %v9915_v52 }
 0x285   : > { %8975 = vmatprep.subr.bf16.mxu1 %v9913_v19  ;;  %8993 = vmatprep.subr.bf16.mxu0 %v9913_v19 }
 0x286   : > { %v947_v55 = vadd.f32 %v919_v5, %v881_v47 }
 0x287   : > { %v1058_v9 = vpop.permute.xlu0 %1057 }
 0x288   : > { %8978 = vmatpush3.bf16.msk.msra.mxu1 %vm10451_vm14, %v10439_v35  ;;  %v1119_v45 = vadd.f32 %v1058_v9, %v947_v55 }
 0x289   : > { %8986 = vmatprep.subr.bf16.mxu1 %v9913_v19 }
 0x28b   : > { %v2153_v63 = vpop.f32.mrb[2].mxu0  ;;  %v652_v12 = vpop.permute.xlu0 %651 }
 0x28c   : > { %v1832_v22 = vpop.permute.xlu1 %1831  ;;  %v8493_v37 = vpop.f32.mrb[3].mxu0 }
 0x28d   : > { %v1898_v15 = vmax.f32 %v1758_v3, %v1832_v22  ;;  %v711_v3 = vadd.f32 %v652_v12, %v539_v16 }
 0x28f   : > { %8657 = vmatmul.mubr.msk.f32.vlgmr.msra.gmra.mrb[16].mxu1 %vm1933_vm15, %v1898_v15  ;;  %v1230_v40 = vpop.permute.xlu0 %1229 }
 0x290   : > { %v1291_v36 = vadd.f32 %v1230_v40, %v1119_v45  ;;  %v650_v50 = vpop.permute.xlu1 %649  ;;  %8988 = vmatpush3.bf16.msk.msra.mxu1 %vm10427_vm12, %v9916_v10  ;;  %8678 = vmatprep.mubr.msk.f32.mxu1 %vm9914_vm3, %v9915_v52  ;;  %v1330_v45 = vmul.f32 %v11050_v39, %v10236_v26 }
 0x291   : > { %8989 = vmatprep.subr.bf16.mxu1 %v9913_v19  ;;  %v710_v62 = vadd.f32 %v650_v50, %v538_v57 }
 0x292   : > { %v1357_v49 = vadd.f32 %v1329_v51, %v1291_v36 }
 0x293   : > { %v824_v42 = vpop.permute.xlu0 %823 }
 0x294   : > { %v883_v8 = vadd.f32 %v824_v42, %v711_v3  ;;  %v2080_v13 = vpop.f32.mrb[0].mxu1  ;;  %v822_v34 = vpop.permute.xlu1 %821  ;;  %8992 = vmatpush3.bf16.msk.msra.mxu1 %vm10451_vm14, %v10439_v35  ;;  %v922_v42 = vmul.f32 %v11092_v6, %v10247_v32 }
 0x295   : > { %v11272_v14 = vmax.f32 %v2007_v56, %v2080_v13  ;;  %v882_v18 = vadd.f32 %v822_v34, %v710_v62  ;;  %v8482_v60 = vpop.f32.mrb[1].mxu1  ;;  %9000 = vmatprep.subr.bf16.mxu1 %v9913_v19 }
 0x296   : > { %v949_v11 = vadd.f32 %v921_v17, %v883_v8 }
 0x297   : > { %v1468_v25 = vpop.permute.xlu0 %1467  ;;  %v948_v30 = vadd.f32 %v920_v21, %v882_v18 }
 0x298   : > { %v1060_v7 = vpop.permute.xlu1 %1059  ;;  %v1529_v56 = vadd.f32 %v1468_v25, %v1357_v49  ;;  %v1331_v49 = vmul.f32 %v11092_v6, %v10236_v26 }
 0x299   : > { %v1120_v9 = vadd.f32 %v1060_v7, %v948_v30 }
 0x29b   : > { %v1062_v38 = vpop.permute.xlu0 %1061 }
 0x29c   : > { %v2226_v23 = vpop.f32.mrb[2].mxu1  ;;  %v654_v46 = vpop.permute.xlu1 %653  ;;  %v1121_v40 = vadd.f32 %v1062_v38, %v949_v11 }
 0x29d   : > { %v11277_v47 = vmax.f32 %v2153_v63, %v2226_v23  ;;  %v2299_v54 = vpop.f32.mrb[4].mxu0  ;;  %v8504_v5 = vpop.f32.mrb[3].mxu1  ;;  %v712_v63 = vadd.f32 %v654_v46, %v540_v0  ;;  %v1332_v0 = vmul.f32 %v11129_v43, %v10236_v26 }
 0x29e   : > { %v8515_v55 = vpop.f32.mrb[5].mxu0 }
 0x29f   : > { %v1640_v12 = vpop.permute.xlu0 %1639 }
 0x2a0   : > { %v1701_v22 = vadd.f32 %v1640_v12, %v1529_v56  ;;  %v1232_v37 = vpop.permute.xlu1 %1231 }
 0x2a1   : > { %v1292_v15 = vadd.f32 %v1232_v37, %v1120_v9 }
 0x2a2   : > { %v11284_v16 = vadd.f32 %v10249_v33, %v1701_v22 }
 0x2a3   : > { %v1234_v36 = vpop.permute.xlu0 %1233  ;;  %v1358_v50 = vadd.f32 %v1330_v45, %v1292_v15 }
 0x2a4   : > { %v1763_v51 = vmax.f32 %v11284_v16, 0.0  ;;  %v1293_v57 = vadd.f32 %v1234_v36, %v1121_v40  ;;  %v826_v3 = vpop.permute.xlu1 %825 }
 0x2a5   : > { %v884_v62 = vadd.f32 %v826_v3, %v712_v63 }
 0x2a6   : > { %1841 = vrot.lane.b32.xlu0 %v1763_v51, %s9911_s26  ;;  %v1359_v39 = vadd.f32 %v1331_v49, %v1293_v57 }
 0x2a7   : > { %v1472_v8 = vpop.permute.xlu0 %1471  ;;  %v950_v13 = vadd.f32 %v922_v42, %v884_v62 }
 0x2a8   : > { %v1470_v34 = vpop.permute.xlu1 %1469  ;;  %v1531_v17 = vadd.f32 %v1472_v8, %v1359_v39 }
 0x2a9   : > { %v1530_v38 = vadd.f32 %v1470_v34, %v1358_v50 }
 0x2ab   : > { %v1644_v18 = vpop.permute.xlu0 %1643 }
 0x2ac   : > { %v1703_v60 = vadd.f32 %v1644_v18, %v1531_v17  ;;  %v1064_v21 = vpop.permute.xlu1 %1063  ;;  %v541_v17 = vmul.f32 %v11092_v6, %v10234_v24 }
 0x2ad   : > { %v2372_v11 = vpop.f32.mrb[4].mxu1  ;;  %v1122_v56 = vadd.f32 %v1064_v21, %v950_v13 }
 0x2ae   : > { %v11295_v25 = vadd.f32 %v10249_v33, %v1703_v60  ;;  %v11297_v30 = vmax.f32 %v2299_v54, %v2372_v11  ;;  %v8526_v7 = vpop.f32.mrb[5].mxu1  ;;  %v923_v11 = vmul.f32 %v11129_v43, %v10247_v32 }
 0x2b0   : > { %v1765_v23 = vmax.f32 %v11295_v25, 0.0  ;;  %v1642_v46 = vpop.permute.xlu1 %1641 }
 0x2b1   : > { %v1702_v5 = vadd.f32 %v1642_v46, %v1530_v38 }
 0x2b2   : > { %1845 = vrot.lane.b32.xlu0 %v1765_v23, %s9911_s26 }
 0x2b3   : > { %v11304_v55 = vadd.f32 %v10249_v33, %v1702_v5 }
 0x2b4   : > { %v1236_v9 = vpop.permute.xlu1 %1235  ;;  %v2445_v12 = vpop.f32.mrb[6].mxu0 }
 0x2b5   : > { %v1764_v22 = vmax.f32 %v11304_v55, 0.0  ;;  %v1294_v54 = vadd.f32 %v1236_v9, %v1122_v56  ;;  %v8537_v37 = vpop.f32.mrb[7].mxu0 }
 0x2b7   : > { %1843 = vrot.lane.b32.xlu1 %v1764_v22, %s9911_s26  ;;  %v1834_v15 = vpop.permute.xlu0 %1833  ;;  %v1360_v45 = vadd.f32 %v1332_v0, %v1294_v54 }
 0x2b8   : > { %v1899_v40 = vmax.f32 %v1759_v20, %v1834_v15  ;;  %v1474_v63 = vpop.permute.xlu1 %1473 }
 0x2b9   : > { %v1532_v36 = vadd.f32 %v1474_v63, %v1360_v45  ;;  %v542_v45 = vmul.f32 %v11129_v43, %v10234_v24 }
 0x2ba   : > { %8668 = vmatmul.mubr.msk.f32.vlgmr.msra.gmra.mrb[18].mxu0 %vm1933_vm15, %v1899_v40 }
 0x2bb   : > { %8995 = vmatpush3.bf16.msk.msra.mxu0 %vm10427_vm12, %v9916_v10  ;;  %8689 = vmatprep.mubr.msk.f32.mxu0 %vm9914_vm3, %v9915_v52 }
 0x2bc   : > { %v1646_v50 = vpop.permute.xlu1 %1645  ;;  %8996 = vmatprep.subr.bf16.mxu0 %v9913_v19 }
 0x2bd   : > { %v1704_v57 = vadd.f32 %v1646_v50, %v1532_v36 }
 0x2bf   : > { %v11322_v3 = vadd.f32 %v10249_v33, %v1704_v57  ;;  %8999 = vmatpush3.bf16.msk.msra.mxu0 %vm10451_vm14, %v10439_v35  ;;  %v924_v57 = vmul.f32 %v11180_v61, %v10247_v32 }
 0x2c0   : > { %v2591_v2 = vpop.f32.mrb[8].mxu0  ;;  %9007 = vmatprep.subr.bf16.mxu0 %v9913_v19 }
 0x2c1   : > { %v1766_v20 = vmax.f32 %v11322_v3, 0.0  ;;  %v8559_v49 = vpop.f32.mrb[9].mxu0 }
 0x2c3   : > { %1847 = vrot.lane.b32.xlu1 %v1766_v20, %s9911_s26  ;;  %v1838_v62 = vpop.permute.xlu0 %1837 }
 0x2c4   : > { %v1901_v42 = vmax.f32 %v1761_v53, %v1838_v62 }
 0x2c5   : > { %v2518_v39 = vpop.f32.mrb[6].mxu1 }
 0x2c6   : > { %v11334_v8 = vmax.f32 %v2445_v12, %v2518_v39  ;;  %v8548_v13 = vpop.f32.mrb[7].mxu1  ;;  %8690 = vmatmul.mubr.msk.f32.vlgmr.msra.gmra.mrb[20].mxu0 %vm1933_vm15, %v1901_v42  ;;  %v1333_v12 = vmul.f32 %v11180_v61, %v10236_v26 }
 0x2c7   : > { %v656_v34 = vpop.permute.xlu0 %655  ;;  %9009 = vmatpush3.bf16.msk.msra.mxu0 %vm10427_vm12, %v9916_v10  ;;  %8711 = vmatprep.mubr.msk.f32.mxu0 %vm9914_vm3, %v9915_v52 }
 0x2c8   : > { %v1836_v18 = vpop.permute.xlu1 %1835  ;;  %9010 = vmatprep.subr.bf16.mxu0 %v9913_v19  ;;  %v713_v53 = vadd.f32 %v656_v34, %v541_v17  ;;  %v9631_v13 = vpack.i.bf16 %v11334_v8, %v11297_v30  ;;  %v1334_v34 = vmul.f32 %v11202_v4, %v10236_v26 }
 0x2c9   : > { %v1900_v59 = vmax.f32 %v1760_v48, %v1836_v18 }
 0x2cb   : > { %8679 = vmatmul.mubr.msk.f32.vlgmr.msra.gmra.mrb[18].mxu1 %vm1933_vm15, %v1900_v59  ;;  %v828_v60 = vpop.permute.xlu0 %827  ;;  %9013 = vmatpush3.bf16.msk.msra.mxu0 %vm10451_vm14, %v10439_v35 }
 0x2cc   : > { %v885_v21 = vadd.f32 %v828_v60, %v713_v53  ;;  %9002 = vmatpush3.bf16.msk.msra.mxu1 %vm10427_vm12, %v9916_v10  ;;  %8700 = vmatprep.mubr.msk.f32.mxu1 %vm9914_vm3, %v9915_v52 }
 0x2cd   : > { %9003 = vmatprep.subr.bf16.mxu1 %v9913_v19  ;;  %9021 = vmatprep.subr.bf16.mxu0 %v9913_v19 }
 0x2ce   : > { %v951_v6 = vadd.f32 %v923_v11, %v885_v21 }
 0x2cf   : > { %v1066_v44 = vpop.permute.xlu0 %1065 }
 0x2d0   : > { %9006 = vmatpush3.bf16.msk.msra.mxu1 %vm10451_vm14, %v10439_v35  ;;  %v1123_v7 = vadd.f32 %v1066_v44, %v951_v6  ;;  %v9651_v44 = vpack.i.bf16 %v11277_v47, %v11272_v14 }
 0x2d1   : > { %v2664_v48 = vpop.f32.mrb[8].mxu1  ;;  %9014 = vmatprep.subr.bf16.mxu1 %v9913_v19 }
 0x2d2   : > { %v11364_v38 = vmax.f32 %v2591_v2, %v2664_v48  ;;  %v8570_v46 = vpop.f32.mrb[9].mxu1 }
 0x2d3   : > { %v1238_v5 = vpop.permute.xlu0 %1237 }
 0x2d4   : > { %v1295_v56 = vadd.f32 %v1238_v5, %v1123_v7  ;;  %v1840_v9 = vpop.permute.xlu1 %1839  ;;  %v9641_v60 = vpack.i.bf16 %v11364_v38, %v11334_v8 }
 0x2d5   : > { %v1902_v54 = vmax.f32 %v1762_v58, %v1840_v9  ;;  %v9676_v9 = vpack.i.bf16 %v11297_v30, %v11277_v47 }
 0x2d6   : > { %v1361_v37 = vadd.f32 %v1333_v12, %v1295_v56  ;;  %v9646_v56 = vpack.i.bf16 %v9915_v52, %v11364_v38 }
 0x2d7   : > { %8701 = vmatmul.mubr.msk.f32.vlgmr.msra.gmra.mrb[20].mxu1 %vm1933_vm15, %v1902_v54  ;;  %v1476_v0 = vpop.permute.xlu0 %1475 }
 0x2d8   : > { %v658_v15 = vpop.permute.xlu1 %657  ;;  %9016 = vmatpush3.bf16.msk.msra.mxu1 %vm10427_vm12, %v9916_v10  ;;  %8722 = vmatprep.mubr.msk.f32.mxu1 %vm9914_vm3, %v9915_v52  ;;  %v1533_v40 = vadd.f32 %v1476_v0, %v1361_v37 }
 0x2d9   : > { %9017 = vmatprep.subr.bf16.mxu1 %v9913_v19  ;;  %v714_v28 = vadd.f32 %v658_v15, %v542_v45 }
 0x2db   : > { %v1648_v58 = vpop.permute.xlu0 %1647 }
 0x2dc   : > { %v1705_v63 = vadd.f32 %v1648_v58, %v1533_v40  ;;  %v830_v36 = vpop.permute.xlu1 %829  ;;  %9020 = vmatpush3.bf16.msk.msra.mxu1 %vm10451_vm14, %v10439_v35 }
 0x2dd   : > { %v886_v50 = vadd.f32 %v830_v36, %v714_v28  ;;  %9028 = vmatprep.subr.bf16.mxu1 %v9913_v19 }
 0x2de   : > { %v11386_v2 = vadd.f32 %v10249_v33, %v1705_v63 }
 0x2df   : > { %v952_v24 = vadd.f32 %v924_v57, %v886_v50 }
 0x2e0   : > { %v1767_v43 = vmax.f32 %v11386_v2, 0.0  ;;  %v1068_v49 = vpop.permute.xlu1 %1067 }
 0x2e1   : > { %v1124_v62 = vadd.f32 %v1068_v49, %v952_v24 }
 0x2e2   : > { %1849 = vrot.lane.b32.xlu0 %v1767_v43, %s9911_s26 }
 0x2e4   : > { %v1240_v42 = vpop.permute.xlu1 %1239  ;;  %v2737_v39 = vpop.f32.mrb[10].mxu0 }
 0x2e5   : > { %v1296_v32 = vadd.f32 %v1240_v42, %v1124_v62  ;;  %v8581_v61 = vpop.f32.mrb[11].mxu0 }
 0x2e6   : > { %9632 = vrot.lane.b32.xlu0 %v9631_v13, %s9911_s26 }
 0x2e7   : > { %v1362_v17 = vadd.f32 %v1334_v34, %v1296_v32 }
 0x2e8   : > { %v1478_v18 = vpop.permute.xlu1 %1477 }
 0x2e9   : > { %v1534_v59 = vadd.f32 %v1478_v18, %v1362_v17 }
 0x2ea   : > { %4086 = vrot.lane.b32.xlu0 %v11297_v30, %s9918_s12 }
 0x2ec   : > { %v1650_v53 = vpop.permute.xlu1 %1649 }
 0x2ed   : > { %v1706_v21 = vadd.f32 %v1650_v53, %v1534_v59 }
 0x2ee   : > { %9642 = vrot.lane.b32.xlu0 %v9641_v60, %s9919_s13 }
 0x2ef   : > { %v11403_v11 = vadd.f32 %v10249_v33, %v1706_v21  ;;  %v9661_v33 = vpack.i.bf16 %v11272_v14, %v9915_v52 }
 0x2f0   : > { %v2883_v26 = vpop.f32.mrb[12].mxu0 }
 0x2f1   : > { %v1768_v4 = vmax.f32 %v11403_v11, 0.0  ;;  %v8603_v6 = vpop.f32.mrb[13].mxu0 }
 0x2f2   : > { %4054 = vrot.lane.b32.xlu0 %v11364_v38, %s9912_s10 }
 0x2f3   : > { %1851 = vrot.lane.b32.xlu1 %v1768_v4, %s9911_s26 }
 0x2f5   : > { %v2810_v48 = vpop.f32.mrb[10].mxu1 }
 0x2f6   : > { %v11413_v7 = vmax.f32 %v2737_v39, %v2810_v48  ;;  %v8592_v46 = vpop.f32.mrb[11].mxu1  ;;  %9652 = vrot.lane.b32.xlu0 %v9651_v44, %s9911_s26 }
 0x2f7   : > { %9637 = vrot.lane.b32.xlu1 %v9631_v13, %s9912_s10  ;;  %v11546_v46 = vld [vmem:[%s13890_s3 + $0x8] sm:$0xff] }
 0x2f8   : > { %v9671_v5 = vpack.i.bf16 %v11413_v7, %v11277_v47 }
 0x2fa   : > { %9662 = vrot.lane.b32.xlu0 %v9661_v33, %s9918_s12 }
 0x2fb   : > { %4088 = vrot.lane.b32.xlu1 %v11334_v8, %s9918_s12 }
 0x2fe   : > { %9672 = vrot.lane.b32.xlu0 %v9671_v5, %s9912_s10 }
 0x2ff   : > { %9647 = vrot.lane.b32.xlu1 %v9646_v56, %s9911_s26 }
 0x301   : > { %v2956_v12 = vpop.f32.mrb[12].mxu1 }
 0x302   : > { %v11430_v54 = vmax.f32 %v2883_v26, %v2956_v12  ;;  %v8614_v37 = vpop.f32.mrb[13].mxu1  ;;  %9677 = vrot.lane.b32.xlu0 %v9676_v9, %s9920_s17 }
 0x303   : > { %4090 = vrot.lane.b32.xlu1 %v11364_v38, %s9918_s12 }
 0x304   : > { %v9686_v57 = vpack.i.bf16 %v11430_v54, %v11413_v7 }
 0x306   : > { %4092 = vrot.lane.b32.xlu0 %v11413_v7, %s9918_s12 }
 0x307   : > { %9657 = vrot.lane.b32.xlu1 %v9661_v33, %s9912_s10 }
 0x30b   : > { %9667 = vrot.lane.b32.xlu1 %v9661_v33, %s9920_s17 }
 0x30f   : > { %4084 = vrot.lane.b32.xlu1 %v11277_v47, %s9918_s12 }
 0x318   : > { %v1842_v0 = vpop.permute.xlu0 %1841 }
 0x319   : > { %v1903_v15 = vmax.f32 %v1763_v51, %v1842_v0 }
 0x31b   : > { %8712 = vmatmul.mubr.msk.f32.vlgmr.msra.gmra.mrb[22].mxu0 %vm1933_vm15, %v1903_v15 }
 0x31c   : > { %9023 = vmatpush3.bf16.msk.msra.mxu0 %vm10427_vm12, %v9916_v10  ;;  %8733 = vmatprep.mubr.msk.f32.mxu0 %vm9914_vm3, %v9915_v52 }
 0x31d   : > { %9024 = vmatprep.subr.bf16.mxu0 %v9913_v19 }
 0x320   : > { %9027 = vmatpush3.bf16.msk.msra.mxu0 %vm10451_vm14, %v10439_v35 }
 0x321   : > { %9035 = vmatprep.subr.bf16.mxu0 %v9913_v19 }
 0x324   : > { %v1846_v45 = vpop.permute.xlu0 %1845 }
 0x325   : > { %v1905_v16 = vmax.f32 %v1765_v23, %v1846_v45 }
 0x327   : > { %8734 = vmatmul.mubr.msk.f32.vlgmr.msra.gmra.mrb[24].mxu0 %vm1933_vm15, %v1905_v16 }
 0x328   : > { %9037 = vmatpush3.bf16.msk.msra.mxu0 %vm10427_vm12, %v9916_v10  ;;  %8755 = vmatprep.mubr.msk.f32.mxu0 %vm9914_vm3, %v9915_v52 }
 0x329   : > { %v1844_v51 = vpop.permute.xlu1 %1843  ;;  %9038 = vmatprep.subr.bf16.mxu0 %v9913_v19 }
 0x32a   : > { %v1904_v40 = vmax.f32 %v1764_v22, %v1844_v51 }
 0x32c   : > { %8723 = vmatmul.mubr.msk.f32.vlgmr.msra.gmra.mrb[22].mxu1 %vm1933_vm15, %v1904_v40  ;;  %9041 = vmatpush3.bf16.msk.msra.mxu0 %vm10451_vm14, %v10439_v35 }
 0x32d   : > { %9030 = vmatpush3.bf16.msk.msra.mxu1 %vm10427_vm12, %v9916_v10  ;;  %8744 = vmatprep.mubr.msk.f32.mxu1 %vm9914_vm3, %v9915_v52 }
 0x32e   : > { %9031 = vmatprep.subr.bf16.mxu1 %v9913_v19  ;;  %9049 = vmatprep.subr.bf16.mxu0 %v9913_v19 }
 0x331   : > { %9034 = vmatpush3.bf16.msk.msra.mxu1 %vm10451_vm14, %v10439_v35 }
 0x332   : > { %9042 = vmatprep.subr.bf16.mxu1 %v9913_v19 }
 0x335   : > { %v1848_v25 = vpop.permute.xlu1 %1847 }
 0x336   : > { %v1906_v23 = vmax.f32 %v1766_v20, %v1848_v25 }
 0x338   : > { %8745 = vmatmul.mubr.msk.f32.vlgmr.msra.gmra.mrb[24].mxu1 %vm1933_vm15, %v1906_v23 }
 0x339   : > { %9044 = vmatpush3.bf16.msk.msra.mxu1 %vm10427_vm12, %v9916_v10  ;;  %8766 = vmatprep.mubr.msk.f32.mxu1 %vm9914_vm3, %v9915_v52  ;;  %vm7763_vm12 = vcmask 128000  }
 0x33a   : > { %9045 = vmatprep.subr.bf16.mxu1 %v9913_v19 }
 0x33d   : > { %9048 = vmatpush3.bf16.msk.msra.mxu1 %vm10451_vm14, %v10439_v35  ;;  %vm7851_vm14 = vcmask 1047559  }
 0x33e   : > { %9085 = vmatprep.subr.bf16.mxu1 %v9913_v19 }
 0x345   : > { %v3029_v55 = vpop.f32.mrb[14].mxu0 }
 0x346   : > { %v8625_v22 = vpop.f32.mrb[15].mxu0 }
 0x351   : > { %v3175_v3 = vpop.f32.mrb[16].mxu0 }
 0x352   : > { %v8647_v20 = vpop.f32.mrb[17].mxu0 }
 0x354   : > { %v1850_v28 = vpop.permute.xlu0 %1849 }
 0x355   : > { %v1907_v1 = vmax.f32 %v1767_v43, %v1850_v28 }
 0x356   : > { %v3102_v10 = vpop.f32.mrb[14].mxu1 }
 0x357   : > { %v11495_v58 = vmax.f32 %v3029_v55, %v3102_v10  ;;  %v8636_v63 = vpop.f32.mrb[15].mxu1  ;;  %8756 = vmatmul.mubr.msk.f32.vlgmr.msra.gmra.mrb[26].mxu0 %vm1933_vm15, %v1907_v1 }
 0x358   : > { %v9633_v36 = vpop.permute.xlu0 %9632  ;;  %8196 = vmatprep.mubr.msk.f32.mxu0 %vm4379_vm0, %v11546_v46 }
 0x359   : > { %v11498_v50 = vunpack.i.l.bf16 %v9633_v36  ;;  %v11525_v53 = vunpack.i.h.bf16 %v9633_v36 }
 0x35b   : > { %v9681_v35 = vpack.i.bf16 %v11498_v50, %v11413_v7 }
 0x35c   : > { %v11502_v27 = vpop.permute.xlu0 %4086 }
 0x35d   : > { %9682 = vrot.lane.b32.xlu1 %v9681_v35, %s9911_s26 }
 0x360   : > { %v9643_v2 = vpop.permute.xlu0 %9642 }
 0x361   : > { %9687 = vrot.lane.b32.xlu1 %v9686_v57, %s9919_s13  ;;  %v9644_v34 = vunpack.i.l.bf16 %v9643_v2  ;;  %v9645_v26 = vunpack.i.h.bf16 %v9643_v2 }
 0x362   : > { %v3248_v24 = vpop.f32.mrb[16].mxu1 }
 0x363   : > { %v11508_v43 = vmax.f32 %v3175_v3, %v3248_v24  ;;  %v8658_v49 = vpop.f32.mrb[17].mxu1 }
 0x364   : > { %v11510_v62 = vpop.permute.xlu0 %4054  ;;  %v11616_v49 = vpack.c.bf16 %v11498_v50, %v11297_v30 }
 0x365   : > { %v1852_v42 = vpop.permute.xlu1 %1851  ;;  %4058 = vrot.lane.b32.xlu1 %v11430_v54, %s9912_s10  ;;  %v11605_v2 = vpack.i.bf16 %v11508_v43, %v11495_v58 }
 0x366   : > { %v1908_v39 = vmax.f32 %v1768_v4, %v1852_v42  ;;  %v9696_v4 = vpack.i.bf16 %v11430_v54, %v11525_v53 }
 0x368   : > { %8767 = vmatmul.mubr.msk.f32.vlgmr.msra.gmra.mrb[26].mxu1 %vm1933_vm15, %v1908_v39  ;;  %v11517_v13 = vpop.permute.xlu0 %9652  ;;  %vm7859_vm15 = vcmask 41984  }
 0x369   : > { %v9654_v32 = vunpack.i.l.bf16 %v11517_v13  ;;  %v9638_v61 = vpop.permute.xlu1 %9637  ;;  %8198 = vmatprep.mubr.msk.f32.mxu1 %vm4379_vm0, %v11546_v46  ;;  %v9655_v28 = vunpack.i.h.bf16 %v11517_v13 }
 0x36a   : > { %v11520_v17 = vunpack.i.h.bf16 %v9638_v61  ;;  %v11522_v18 = vunpack.i.l.bf16 %v9638_v61 }
 0x36b   : > { %v9086_v59 = vpack.c.bf16 %v9654_v32, %v11272_v14  ;;  %v11611_v24 = vpack.c.bf16 %v9655_v28, %v11277_v47 }
 0x36c   : > { %v9691_v60 = vpack.i.bf16 %v11502_v27, %v11522_v18  ;;  %v9701_v21 = vpack.i.bf16 %v9644_v34, %v11520_v17  ;;  %v11560_v9 = vpop.permute.xlu0 %9662 }
 0x36d   : > { %v11530_v11 = vpop.permute.xlu1 %4088  ;;  %9087 = vmatpush1.bf16.msra.mxu1 %v9086_v59  ;;  %v9665_v37 = vunpack.i.h.bf16 %v11560_v9  ;;  %v9664_v0 = vunpack.i.l.bf16 %v11560_v9 }
 0x36e   : > { %9692 = vrot.lane.b32.xlu0 %v9691_v60, %s9911_s26  ;;  %9702 = vrot.lane.b32.xlu1 %v9701_v21, %s9911_s26 }
 0x36f   : > { %9088 = vmatprep.subr.bf16.mxu1 %v9913_v19 }
 0x370   : > { %v11578_v40 = vpop.permute.xlu0 %9672 }
 0x371   : > { %v9648_v6 = vpop.permute.xlu1 %9647  ;;  %v9674_v22 = vunpack.i.l.bf16 %v11578_v40 }
 0x372   : > { %v11537_v44 = vunpack.i.h.bf16 %v9648_v6  ;;  %v11539_v48 = vunpack.i.l.bf16 %v9648_v6  ;;  %9697 = vrot.lane.b32.xlu0 %v9696_v4, %s9911_s26  ;;  %4223 = vrot.lane.b32.xlu1 %v9645_v26, %s9911_s26 }
 0x373   : > { %v9095_v10 = vpack.c.bf16 %v9674_v22, %v9655_v28 }
 0x374   : > { %v9050_v33 = vpack.c.bf16 %v11537_v44, %v9915_v52  ;;  %v9706_v5 = vpack.i.bf16 %v11510_v62, %v11539_v48  ;;  %v11590_v1 = vpop.permute.xlu0 %9677 }
 0x375   : > { %v11556_v56 = vpop.permute.xlu1 %4090  ;;  %v9679_v36 = vunpack.i.l.bf16 %v11590_v1 }
 0x376   : > { %9051 = vmatpush1.bf16.msra.mxu0 %v9050_v33  ;;  %4221 = vrot.lane.b32.xlu0 %v11530_v11, %s9911_s26 }
 0x377   : > { %9707 = vrot.lane.b32.xlu1 %v9706_v5, %s9911_s26  ;;  %9052 = vmatprep.subr.bf16.mxu0 %v9913_v19  ;;  %v11644_v59 = vpack.c.bf16 %v11297_v30, %v9679_v36 }
 0x378   : > { %v11631_v61 = vpop.permute.xlu0 %4092 }
 0x379   : > { %v11564_v12 = vpop.permute.xlu1 %9657 }
 0x37a   : > { %v9660_v15 = vunpack.i.h.bf16 %v11564_v12  ;;  %v9659_v45 = vunpack.i.l.bf16 %v11564_v12  ;;  %4094 = vrot.lane.b32.xlu0 %v11430_v54, %s9918_s12 }
 0x37b   : > { %4124 = vrot.lane.b32.xlu1 %v11334_v8, %s9920_s17 }
 0x37c   : > { %v9053_v16 = vpack.c.bf16 %v9664_v0, %v9659_v45  ;;  %v9089_v51 = vpack.c.bf16 %v9665_v37, %v9660_v15  ;;  %v9059_v63 = vpack.c.bf16 %v9660_v15, %v9654_v32  ;;  %v11629_v32 = vpack.c.bf16 %v11502_v27, %v11522_v18 }
 0x37d   : > { %v9668_v25 = vpop.permute.xlu1 %9667 }
 0x37e   : > { %v9670_v23 = vunpack.i.h.bf16 %v9668_v25  ;;  %v9669_v55 = vunpack.i.l.bf16 %v9668_v25  ;;  %9054 = vmatpush1.bf16.msra.mxu0 %v9053_v16  ;;  %9090 = vmatpush1.bf16.msra.mxu1 %v9089_v51 }
 0x37f   : > { %4229 = vrot.lane.b32.xlu0 %v11556_v56, %s9911_s26  ;;  %4060 = vrot.lane.b32.xlu1 %v11495_v58, %s9912_s10 }
 0x380   : > { %v9092_v3 = vpack.c.bf16 %v11277_v47, %v9670_v23  ;;  %v9056_v20 = vpack.c.bf16 %v11272_v14, %v9669_v55  ;;  %9055 = vmatprep.subr.bf16.mxu0 %v9913_v19  ;;  %9091 = vmatprep.subr.bf16.mxu1 %v9913_v19  ;;  %v9062_v35 = vpack.c.bf16 %v9670_v23, %v9665_v37  ;;  %v9680_v47 = vunpack.i.h.bf16 %v11590_v1 }
 0x381   : > { %v4085_v14 = vpop.permute.xlu1 %4084  ;;  %v11663_v55 = vunpack.i.h.bf16 %v11578_v40  ;;  %v9167_v1 = vpack.c.bf16 %v11520_v17, %v11525_v53 }
 0x382   : > { %9057 = vmatpush1.bf16.msra.mxu0 %v9056_v20  ;;  %9093 = vmatpush1.bf16.msra.mxu1 %v9092_v3  ;;  %v9098_v57 = vpack.c.bf16 %v9679_v36, %v4085_v14  ;;  %v11624_v13 = vpack.c.bf16 %v4085_v14, %v9674_v22  ;;  %v11641_v34 = vpack.c.bf16 %v11334_v8, %v9680_v47 }
 0x383   : > { %4024 = vrot.lane.b32.xlu0 %v11495_v58, %s9911_s26  ;;  %4126 = vrot.lane.b32.xlu1 %v11364_v38, %s9920_s17 }
 0x384   : > { %9058 = vmatprep.subr.bf16.mxu0 %v9913_v19  ;;  %9094 = vmatprep.subr.bf16.mxu1 %v9913_v19 }
 0x386   : > { %9060 = vmatpush1.bf16.msra.mxu0 %v9059_v63  ;;  %9096 = vmatpush1.bf16.msra.mxu1 %v9095_v10 }
 0x387   : > { %4096 = vrot.lane.b32.xlu0 %v11495_v58, %s9918_s12  ;;  %9061 = vmatprep.subr.bf16.mxu0 %v9913_v19 }
 0x388   : > { %9097 = vmatprep.subr.bf16.mxu1 %v9913_v19 }
 0x38a   : > { %9063 = vmatpush1.bf16.msra.mxu0 %v9062_v35  ;;  %9099 = vmatpush1.bf16.msra.mxu1 %v9098_v57 }
 0x38b   : > { %9712 = vrot.lane.b32.xlu0 %v11605_v2, %s9919_s13  ;;  %9064 = vmatprep.subr.bf16.mxu0 %v9913_v19 }
 0x38c   : > { %9100 = vmatprep.subr.bf16.mxu1 %v9913_v19 }
 0x38d   : > { %v3321_v42 = vpop.f32.mrb[18].mxu0 }
 0x38e   : > { %v8669_v39 = vpop.f32.mrb[19].mxu0  ;;  %9066 = vmatpush1.bf16.msra.mxu0 %v11611_v24  ;;  %9102 = vmatpush1.bf16.msra.mxu1 %v11616_v49 }
 0x38f   : > { %4062 = vrot.lane.b32.xlu0 %v11508_v43, %s9912_s10  ;;  %9067 = vmatprep.subr.bf16.mxu0 %v9913_v19 }
 0x390   : > { %9103 = vmatprep.subr.bf16.mxu1 %v9913_v19 }
 0x392   : > { %9069 = vmatpush1.bf16.msra.mxu0 %v11624_v13  ;;  %9105 = vmatpush1.bf16.msra.mxu1 %v11629_v32 }
 0x393   : > { %4237 = vrot.lane.b32.xlu0 %v11631_v61, %s9911_s26  ;;  %9070 = vmatprep.subr.bf16.mxu0 %v9913_v19 }
 0x394   : > { %9106 = vmatprep.subr.bf16.mxu1 %v9913_v19 }
 0x396   : > { %9072 = vmatpush1.bf16.msra.mxu0 %v11644_v59  ;;  %9108 = vmatpush1.bf16.msra.mxu1 %v11641_v34 }
 0x397   : > { %4098 = vrot.lane.b32.xlu0 %v11508_v43, %s9918_s12  ;;  %9073 = vmatprep.subr.bf16.mxu0 %v9913_v19 }
 0x398   : > { %9109 = vmatprep.subr.bf16.mxu1 %v9913_v19 }
 0x399   : > { %v3467_v60 = vpop.f32.mrb[20].mxu0 }
 0x39a   : > { %v8691_v21 = vpop.f32.mrb[21].mxu0 }
 0x39e   : > { %v3394_v26 = vpop.f32.mrb[18].mxu1 }
 0x39f   : > { %v11653_v4 = vmax.f32 %v3321_v42, %v3394_v26  ;;  %v8680_v30 = vpop.f32.mrb[19].mxu1 }
 0x3aa   : > { %v3540_v6 = vpop.f32.mrb[20].mxu1 }
 0x3ab   : > { %v11655_v33 = vmax.f32 %v3467_v60, %v3540_v6  ;;  %v8702_v5 = vpop.f32.mrb[21].mxu1 }
 0x3cf   : > { %v9683_v37 = vpop.permute.xlu1 %9682 }
 0x3d0   : > { %v9685_v15 = vunpack.i.h.bf16 %v9683_v37  ;;  %v11657_v16 = vunpack.i.l.bf16 %v9683_v37 }
 0x3d2   : > { %v9074_v51 = vpack.c.bf16 %v9685_v15, %v11498_v50  ;;  %v9716_v25 = vpack.i.bf16 %v11508_v43, %v11657_v16 }
 0x3d3   : > { %v9688_v23 = vpop.permute.xlu1 %9687 }
 0x3d4   : > { %v9689_v22 = vunpack.i.l.bf16 %v9688_v23  ;;  %9075 = vmatpush1.bf16.msra.mxu0 %v9074_v51  ;;  %9717 = vrot.lane.b32.xlu1 %v9716_v25, %s9911_s26  ;;  %v9690_v20 = vunpack.i.h.bf16 %v9688_v23 }
 0x3d5   : > { %9076 = vmatprep.subr.bf16.mxu0 %v9913_v19 }
 0x3d6   : > { %v9721_v3 = vpack.i.bf16 %v9689_v22, %v11663_v55 }
 0x3d7   : > { %v11669_v28 = vpop.permute.xlu1 %4058 }
 0x3d8   : > { %9722 = vrot.lane.b32.xlu1 %v9721_v3, %s9911_s26 }
 0x3dc   : > { %4239 = vrot.lane.b32.xlu1 %v9690_v20, %s9911_s26 }
 0x3e0   : > { %v9693_v10 = vpop.permute.xlu0 %9692  ;;  %v9703_v63 = vpop.permute.xlu1 %9702 }
 0x3e1   : > { %v9695_v14 = vunpack.i.h.bf16 %v9693_v10  ;;  %v9694_v40 = vunpack.i.l.bf16 %v9693_v10  ;;  %v9705_v35 = vunpack.i.h.bf16 %v9703_v63  ;;  %v9704_v5 = vunpack.i.l.bf16 %v9703_v63  ;;  %v11698_v63 = vld [vmem:[%s13890_s3] sm:$0xff] }
 0x3e3   : > { %v9077_v36 = vpack.c.bf16 %v9695_v14, %v9694_v40  ;;  %v9080_v60 = vpack.c.bf16 %v11525_v53, %v9705_v35 }
 0x3e4   : > { %v9698_v57 = vpop.permute.xlu0 %9697  ;;  %v4224_v26 = vpop.permute.xlu1 %4223 }
 0x3e5   : > { %v11672_v42 = vunpack.i.h.bf16 %v9698_v57  ;;  %v9699_v39 = vunpack.i.l.bf16 %v9698_v57  ;;  %9078 = vmatpush1.bf16.msra.mxu0 %v9077_v36  ;;  %v9116_v3 = vpack.c.bf16 %v11539_v48, %v4224_v26  ;;  %v11717_v36 = vld [vmem:[%s13890_s3 + $0x18] sm:$0xff] }
 0x3e6   : > { %9079 = vmatprep.subr.bf16.mxu0 %v9913_v19 }
 0x3e7   : > { %v9110_v21 = vpack.c.bf16 %v9699_v39, %v11525_v53  ;;  %v9726_v30 = vpack.i.bf16 %v11669_v28, %v11672_v42  ;;  %v9083_v37 = vpack.c.bf16 %v9704_v5, %v9699_v39 }
 0x3e8   : > { %v4222_v6 = vpop.permute.xlu0 %4221 }
 0x3e9   : > { %9081 = vmatpush1.bf16.msra.mxu0 %v9080_v60  ;;  %9111 = vmatpush1.bf16.msra.mxu1 %v9110_v21  ;;  %v9113_v15 = vpack.c.bf16 %v4222_v6, %v9704_v5  ;;  %v11684_v25 = vpop.permute.xlu1 %9707  ;;  %v9131_v5 = vpack.c.bf16 %v11522_v18, %v11498_v50  ;;  %v9134_v18 = vpack.c.bf16 %v9680_v47, %v11502_v27 }
 0x3ea   : > { %9727 = vrot.lane.b32.xlu1 %v9726_v30, %s9911_s26  ;;  %9112 = vmatprep.subr.bf16.mxu1 %v9913_v19  ;;  %v9710_v20 = vunpack.i.h.bf16 %v11684_v25  ;;  %v9709_v10 = vunpack.i.l.bf16 %v11684_v25  ;;  %v11787_v27 = vpack.c.bf16 %v11525_v53, %v11334_v8 }
 0x3eb   : > { %9082 = vmatprep.subr.bf16.mxu0 %v9913_v19 }
 0x3ec   : > { %v11682_v51 = vpop.permute.xlu0 %4094  ;;  %v9119_v40 = vpack.c.bf16 %v9710_v20, %v9709_v10 }
 0x3ed   : > { %4245 = vrot.lane.b32.xlu0 %v11682_v51, %s9911_s26  ;;  %9084 = vmatpush1.bf16.msra.mxu0 %v9083_v37  ;;  %v4125_v39 = vpop.permute.xlu1 %4124 }
 0x3ee   : > { %9114 = vmatpush1.bf16.msra.mxu1 %v9113_v15  ;;  %4128 = vrot.lane.b32.xlu1 %v11413_v7, %s9920_s17  ;;  %v3613_v23 = vpop.f32.mrb[22].mxu0  ;;  %v9170_v8 = vpack.c.bf16 %v4125_v39, %v11530_v11 }
 0x3ef   : > { %v8713_v22 = vpop.f32.mrb[23].mxu0  ;;  %4434 = vmatprep.subr.mxu0 %v9915_v52  ;;  %9115 = vmatprep.subr.bf16.mxu1 %v9913_v19 }
 0x3f1   : > { %v11700_v14 = vpop.permute.xlu0 %4229  ;;  %4028 = vrot.lane.b32.xlu0 %v11653_v4, %s9911_s26  ;;  %4435 = vmatpush1.msra.mxu0 %v4222_v6  ;;  %v11756_v37 = vpop.permute.xlu1 %4060 }
 0x3f2   : > { %9117 = vmatpush1.bf16.msra.mxu1 %v9116_v3  ;;  %4064 = vrot.lane.b32.xlu1 %v11653_v4, %s9912_s10 }
 0x3f3   : > { %9121 = vmatprep.subr.bf16.mxu0 %v9913_v19  ;;  %4451 = vmatmul.mubr.f32.vlgmr.msra.gmra.mrb[28].mxu0 %v11698_v63 }
 0x3f4   : > { %9123 = vmatpush1.bf16.msra.mxu0 %v11611_v24  ;;  %9118 = vmatprep.subr.bf16.mxu1 %v9913_v19  ;;  %v9731_v24 = vpack.i.bf16 %v11655_v33, %v11653_v4 }
 0x3f5   : > { %v11719_v35 = vpop.permute.xlu0 %4024  ;;  %4100 = vrot.lane.b32.xlu0 %v11653_v4, %s9918_s12  ;;  %9124 = vmatprep.subr.bf16.mxu0 %v9913_v19 }
 0x3f6   : > { %9120 = vmatpush1.bf16.msra.mxu1 %v9119_v40  ;;  %4130 = vrot.lane.b32.xlu1 %v11430_v54, %s9920_s17  ;;  %v9736_v57 = vpack.i.bf16 %v11655_v33, %v11719_v35 }
 0x3f7   : > { %4509 = vmatprep.subr.mxu1 %v9915_v52  ;;  %8197 = vmatprep.mubr.msk.f32.mxu0 %vm4379_vm0, %v11717_v36 }
 0x3f8   : > { %9126 = vmatpush1.bf16.msra.mxu0 %v11624_v13  ;;  %v11745_v13 = vld [vmem:[%s13890_s3 + $0x10] sm:$0xff] }
 0x3f9   : > { %v11734_v60 = vpop.permute.xlu0 %4096  ;;  %9732 = vrot.lane.b32.xlu0 %v9731_v24, %s9919_s13  ;;  %9127 = vmatprep.subr.bf16.mxu0 %v9913_v19  ;;  %v11811_v24 = vpack.c.bf16 %v11364_v38, %v4125_v39  ;;  %v9149_v39 = vpack.c.bf16 %v11700_v14, %v9710_v20 }
 0x3fa   : > { %4510 = vmatpush1.msra.mxu1 %v11700_v14  ;;  %9737 = vrot.lane.b32.xlu1 %v9736_v57, %s9911_s26  ;;  %v3759_v21 = vpop.f32.mrb[24].mxu0  ;;  %v9146_v57 = vpack.c.bf16 %v9709_v10, %v11539_v48 }
 0x3fb   : > { %9157 = vmatprep.subr.bf16.mxu1 %v9913_v19  ;;  %v8735_v26 = vpop.f32.mrb[25].mxu0  ;;  %4526 = vmatmul.mubr.f32.vlgmr.msra.gmra.mrb[28].mxu1 %v11698_v63 }
 0x3fc   : > { %9129 = vmatpush1.bf16.msra.mxu0 %v11644_v59  ;;  %9159 = vmatpush1.bf16.msra.mxu1 %v11616_v49 }
 0x3fd   : > { %v9713_v30 = vpop.permute.xlu0 %9712  ;;  %4066 = vrot.lane.b32.xlu0 %v11655_v33, %s9912_s10  ;;  %9130 = vmatprep.subr.bf16.mxu0 %v9913_v19 }
 0x3fe   : > { %v9714_v6 = vunpack.i.l.bf16 %v9713_v30  ;;  %9160 = vmatprep.subr.bf16.mxu1 %v9913_v19  ;;  %4456 = vmatmul.mubr.f32.gmra.mrb[30].mxu0 %v11745_v13 }
 0x3ff   : > { %v3686_v15 = vpop.f32.mrb[22].mxu1  ;;  %8200 = vmatprep.mubr.msk.f32.mxu0 %vm4379_vm0, %v11546_v46  ;;  %8199 = vmatprep.mubr.msk.f32.mxu1 %vm4379_vm0, %v11717_v36 }
 0x400   : > { %v9741_v49 = vpack.i.bf16 %v9714_v6, %v11756_v37  ;;  %v11763_v59 = vmax.f32 %v3613_v23, %v3686_v15  ;;  %9132 = vmatpush1.bf16.msra.mxu0 %v9131_v5  ;;  %9162 = vmatpush1.bf16.msra.mxu1 %v11629_v32  ;;  %v8724_v22 = vpop.f32.mrb[23].mxu1  ;;  %v9715_v23 = vunpack.i.h.bf16 %v9713_v30 }
 0x401   : > { %v11766_v50 = vpop.permute.xlu0 %4062  ;;  %4253 = vrot.lane.b32.xlu0 %v11734_v60, %s9911_s26  ;;  %9133 = vmatprep.subr.bf16.mxu0 %v9913_v19 }
 0x402   : > { %9742 = vrot.lane.b32.xlu1 %v9741_v49, %s9911_s26  ;;  %9163 = vmatprep.subr.bf16.mxu1 %v9913_v19 }
 0x403   : > { %4531 = vmatmul.mubr.f32.gmra.mrb[30].mxu1 %v11745_v13 }
 0x404   : > { %9135 = vmatpush1.bf16.msra.mxu0 %v9134_v18  ;;  %9165 = vmatpush1.bf16.msra.mxu1 %v11641_v34  ;;  %v11800_v34 = vpack.c.bf16 %v11530_v11, %v11520_v17  ;;  %v11817_v17 = vpack.c.bf16 %v11539_v48, %v11364_v38  ;;  %v11825_v11 = vpack.c.bf16 %v11556_v56, %v11510_v62  ;;  %v11832_v38 = vpop.permute.xlu1 %4126 }
 0x405   : > { %v11778_v32 = vpop.permute.xlu0 %4237  ;;  %4102 = vrot.lane.b32.xlu0 %v11655_v33, %s9918_s12  ;;  %9136 = vmatprep.subr.bf16.mxu0 %v9913_v19 }
 0x406   : > { %4255 = vrot.lane.b32.xlu1 %v9715_v23, %s9911_s26  ;;  %9166 = vmatprep.subr.bf16.mxu1 %v9913_v19 }
 0x407   : > { %8202 = vmatprep.mubr.msk.f32.mxu1 %vm4379_vm0, %v11546_v46 }
 0x408   : > { %9138 = vmatpush1.bf16.msra.mxu0 %v11787_v27  ;;  %9168 = vmatpush1.bf16.msra.mxu1 %v9167_v1 }
 0x409   : > { %v11794_v47 = vpop.permute.xlu0 %4098  ;;  %9139 = vmatprep.subr.bf16.mxu0 %v9913_v19  ;;  %9169 = vmatprep.subr.bf16.mxu1 %v9913_v19 }
 0x40a   : > { %4261 = vrot.lane.b32.xlu0 %v11794_v47, %s9911_s26 }
 0x40b   : > { %v3832_v53 = vpop.f32.mrb[24].mxu1 }
 0x40c   : > { %v11805_v3 = vmax.f32 %v3759_v21, %v3832_v53  ;;  %9141 = vmatpush1.bf16.msra.mxu0 %v11800_v34  ;;  %9171 = vmatpush1.bf16.msra.mxu1 %v9170_v8  ;;  %v8746_v40 = vpop.f32.mrb[25].mxu1  ;;  %v11842_v21 = vpack.c.bf16 %v11413_v7, %v11832_v38 }
 0x40d   : > { %9142 = vmatprep.subr.bf16.mxu0 %v9913_v19  ;;  %9172 = vmatprep.subr.bf16.mxu1 %v9913_v19 }
 0x40e   : > { %4153 = vrot.lane.b32.xlu0 %v11763_v59, %s9911_s26 }
 0x410   : > { %9144 = vmatpush1.bf16.msra.mxu0 %v11811_v24  ;;  %9174 = vmatpush1.bf16.msra.mxu1 %v11817_v17 }
 0x411   : > { %9145 = vmatprep.subr.bf16.mxu0 %v9913_v19  ;;  %9175 = vmatprep.subr.bf16.mxu1 %v9913_v19 }
 0x412   : > { %4159 = vrot.lane.b32.xlu0 %v11763_v59, %s9918_s12 }
 0x414   : > { %9147 = vmatpush1.bf16.msra.mxu0 %v9146_v57  ;;  %9177 = vmatpush1.bf16.msra.mxu1 %v11825_v11 }
 0x415   : > { %9148 = vmatprep.subr.bf16.mxu0 %v9913_v19  ;;  %9178 = vmatprep.subr.bf16.mxu1 %v9913_v19 }
 0x418   : > { %9150 = vmatpush1.bf16.msra.mxu0 %v9149_v39  ;;  %9180 = vmatpush1.bf16.msra.mxu1 %v11842_v21  ;;  %v9756_v39 = vpack.i.bf16 %v11805_v3, %v11763_v59 }
 0x419   : > { %9181 = vmatprep.subr.bf16.mxu1 %v9913_v19  ;;  %9151 = vmatprep.subr.bf16.mxu0 %v9913_v19 }
 0x42a   : > { %v3905_v10 = vpop.f32.mrb[26].mxu0 }
 0x42b   : > { %v8757_v26 = vpop.f32.mrb[27].mxu0 }
 0x43b   : > { %v3978_v30 = vpop.f32.mrb[26].mxu1 }
 0x43c   : > { %v11847_v6 = vmax.f32 %v3905_v10, %v3978_v30  ;;  %v8768_v5 = vpop.f32.mrb[27].mxu1 }
 0x446   : > { %v9718_v25 = vpop.permute.xlu1 %9717 }
 0x447   : > { %v11849_v15 = vunpack.i.h.bf16 %v9718_v25  ;;  %v9719_v20 = vunpack.i.l.bf16 %v9718_v25 }
 0x449   : > { %v9182_v14 = vpack.c.bf16 %v9719_v20, %v11657_v16  ;;  %v9746_v49 = vpack.i.bf16 %v11766_v50, %v11849_v15  ;;  %v9347_v12 = vpack.c.bf16 %v11766_v50, %v11849_v15 }
 0x44a   : > { %v9723_v22 = vpop.permute.xlu1 %9722 }
 0x44b   : > { %v9725_v18 = vunpack.i.h.bf16 %v9723_v22  ;;  %v9724_v23 = vunpack.i.l.bf16 %v9723_v22  ;;  %9747 = vrot.lane.b32.xlu1 %v9746_v49, %s9911_s26  ;;  %9183 = vmatpush1.bf16.msra.mxu1 %v9182_v14 }
 0x44c   : > { %9184 = vmatprep.subr.bf16.mxu1 %v9913_v19 }
 0x44d   : > { %v9152_v1 = vpack.c.bf16 %v11657_v16, %v9725_v18  ;;  %v9185_v8 = vpack.c.bf16 %v11778_v32, %v9724_v23  ;;  %v9155_v40 = vpack.c.bf16 %v9724_v23, %v9719_v20  ;;  %v9239_v18 = vpack.c.bf16 %v11663_v55, %v11657_v16 }
 0x44e   : > { %v4240_v53 = vpop.permute.xlu1 %4239 }
 0x44f   : > { %9153 = vmatpush1.bf16.msra.mxu0 %v9152_v1  ;;  %9752 = vrot.lane.b32.xlu1 %v11605_v2, %s9920_s17  ;;  %v9188_v57 = vpack.c.bf16 %v11672_v42, %v4240_v53 }
 0x450   : > { %9186 = vmatpush1.bf16.msra.mxu1 %v9185_v8  ;;  %9154 = vmatprep.subr.bf16.mxu0 %v9913_v19 }
 0x451   : > { %9187 = vmatprep.subr.bf16.mxu1 %v9913_v19 }
 0x453   : > { %4156 = vrot.lane.b32.xlu1 %v11763_v59, %s9912_s10  ;;  %9156 = vmatpush1.bf16.msra.mxu0 %v9155_v40 }
 0x454   : > { %9189 = vmatpush1.bf16.msra.mxu1 %v9188_v57  ;;  %4584 = vmatprep.subr.mxu0 %v9915_v52 }
 0x455   : > { %9190 = vmatprep.subr.bf16.mxu1 %v9913_v19 }
 0x457   : > { %9757 = vrot.lane.b32.xlu1 %v9756_v39, %s9919_s13  ;;  %4585 = vmatpush1.msra.mxu0 %v11778_v32 }
 0x458   : > { %9193 = vmatprep.subr.bf16.mxu0 %v9913_v19  ;;  %4601 = vmatmul.mubr.f32.vlgmr.msra.gmra.mrb[32].mxu0 %v11698_v63 }
 0x459   : > { %9195 = vmatpush1.bf16.msra.mxu0 %v11787_v27  ;;  %8201 = vmatprep.mubr.msk.f32.mxu0 %vm4379_vm0, %v11717_v36 }
 0x45a   : > { %9196 = vmatprep.subr.bf16.mxu0 %v9913_v19 }
 0x45b   : > { %4169 = vrot.lane.b32.xlu1 %v11805_v3, %s9912_s10 }
 0x45c   : > { %v11879_v2 = vpop.permute.xlu1 %9727  ;;  %4606 = vmatmul.mubr.f32.gmra.mrb[34].mxu0 %v11745_v13 }
 0x45d   : > { %v9730_v32 = vunpack.i.h.bf16 %v11879_v2  ;;  %v9729_v10 = vunpack.i.l.bf16 %v11879_v2  ;;  %9198 = vmatpush1.bf16.msra.mxu0 %v11800_v34  ;;  %8204 = vmatprep.mubr.msk.f32.mxu0 %vm4379_vm0, %v11546_v46  ;;  %v9203_v34 = vpack.c.bf16 %v11510_v62, %v11539_v48 }
 0x45e   : > { %9199 = vmatprep.subr.bf16.mxu0 %v9913_v19 }
 0x45f   : > { %v9191_v27 = vpack.c.bf16 %v9730_v32, %v9729_v10  ;;  %v11890_v26 = vpop.permute.xlu0 %4245 }
 0x460   : > { %v4129_v30 = vpop.permute.xlu1 %4128  ;;  %v9221_v57 = vpack.c.bf16 %v11890_v26, %v9730_v32 }
 0x461   : > { %9192 = vmatpush1.bf16.msra.mxu1 %v9191_v27  ;;  %9201 = vmatpush1.bf16.msra.mxu0 %v11811_v24  ;;  %v9206_v24 = vpack.c.bf16 %v11832_v38, %v11556_v56  ;;  %v11923_v56 = vpack.c.bf16 %v11657_v16, %v11413_v7  ;;  %v11937_v7 = vpack.c.bf16 %v11631_v61, %v11663_v55 }
 0x462   : > { %4659 = vmatprep.subr.mxu1 %v9915_v52  ;;  %9202 = vmatprep.subr.bf16.mxu0 %v9913_v19  ;;  %v11949_v23 = vpack.c.bf16 %v11430_v54, %v4129_v30  ;;  %v9218_v55 = vpack.c.bf16 %v9729_v10, %v11672_v42 }
 0x463   : > { %v11895_v5 = vpop.permute.xlu0 %4028 }
 0x464   : > { %v9761_v25 = vpack.i.bf16 %v11805_v3, %v11895_v5  ;;  %v11901_v20 = vpop.permute.xlu1 %4064  ;;  %v12215_v9 = vpack.c.bf16 %v11895_v5, %v11653_v4 }
 0x465   : > { %4660 = vmatpush1.msra.mxu1 %v11890_v26  ;;  %9204 = vmatpush1.bf16.msra.mxu0 %v9203_v34  ;;  %v9776_v34 = vpack.i.bf16 %v9915_v52, %v11847_v6 }
 0x466   : > { %9229 = vmatprep.subr.bf16.mxu1 %v9913_v19  ;;  %9762 = vrot.lane.b32.xlu0 %v9761_v25, %s9911_s26 }
 0x467   : > { %4676 = vmatmul.mubr.f32.vlgmr.msra.gmra.mrb[32].mxu1 %v11698_v63  ;;  %v11909_v14 = vpop.permute.xlu0 %4100  ;;  %9205 = vmatprep.subr.bf16.mxu0 %v9913_v19 }
 0x468   : > { %9231 = vmatpush1.bf16.msra.mxu1 %v11817_v17  ;;  %4269 = vrot.lane.b32.xlu1 %v11909_v14, %s9911_s26  ;;  %v11919_v62 = vpop.permute.xlu1 %4130 }
 0x469   : > { %9207 = vmatpush1.bf16.msra.mxu0 %v9206_v24  ;;  %9232 = vmatprep.subr.bf16.mxu1 %v9913_v19  ;;  %v11996_v26 = vpack.c.bf16 %v11495_v58, %v11919_v62 }
 0x46a   : > { %9208 = vmatprep.subr.bf16.mxu0 %v9913_v19  ;;  %8203 = vmatprep.mubr.msk.f32.mxu1 %vm4379_vm0, %v11717_v36 }
 0x46b   : > { %v9733_v48 = vpop.permute.xlu0 %9732  ;;  %4681 = vmatmul.mubr.f32.gmra.mrb[34].mxu1 %v11745_v13 }
 0x46c   : > { %9234 = vmatpush1.bf16.msra.mxu1 %v11825_v11  ;;  %v9734_v17 = vunpack.i.l.bf16 %v9733_v48  ;;  %4172 = vrot.lane.b32.xlu1 %v11805_v3, %s9918_s12  ;;  %v9738_v49 = vpop.permute.xlu1 %9737  ;;  %v9735_v22 = vunpack.i.h.bf16 %v9733_v48 }
 0x46d   : > { %9210 = vmatpush1.bf16.msra.mxu0 %v11923_v56  ;;  %9235 = vmatprep.subr.bf16.mxu1 %v9913_v19  ;;  %v11951_v8 = vunpack.i.h.bf16 %v9738_v49  ;;  %v9739_v27 = vunpack.i.l.bf16 %v9738_v49 }
 0x46e   : > { %v9766_v38 = vpack.i.bf16 %v9734_v17, %v11901_v20  ;;  %9211 = vmatprep.subr.bf16.mxu0 %v9913_v19  ;;  %8206 = vmatprep.mubr.msk.f32.mxu1 %vm4379_vm0, %v11546_v46 }
 0x46f   : > { %v11939_v11 = vpop.permute.xlu0 %4066  ;;  %v9254_v24 = vpack.c.bf16 %v9739_v27, %v11719_v35 }
 0x470   : > { %9237 = vmatpush1.bf16.msra.mxu1 %v11842_v21  ;;  %9767 = vrot.lane.b32.xlu0 %v9766_v38, %s9911_s26  ;;  %v9242_v21 = vpack.c.bf16 %v4129_v30, %v11631_v61  ;;  %v9771_v16 = vpack.i.bf16 %v11939_v11, %v11951_v8  ;;  %v11969_v61 = vpack.c.bf16 %v11672_v42, %v11430_v54 }
 0x471   : > { %9213 = vmatpush1.bf16.msra.mxu0 %v11937_v7  ;;  %9238 = vmatprep.subr.bf16.mxu1 %v9913_v19  ;;  %v11982_v54 = vpack.c.bf16 %v11682_v51, %v11669_v28 }
 0x472   : > { %9214 = vmatprep.subr.bf16.mxu0 %v9913_v19 }
 0x473   : > { %v4254_v1 = vpop.permute.xlu0 %4253 }
 0x474   : > { %9240 = vmatpush1.bf16.msra.mxu1 %v9239_v18  ;;  %4271 = vrot.lane.b32.xlu0 %v9735_v22, %s9911_s26  ;;  %v9743_v40 = vpop.permute.xlu1 %9742  ;;  %v12042_v22 = vpack.c.bf16 %v11719_v35, %v11495_v58 }
 0x475   : > { %9216 = vmatpush1.bf16.msra.mxu0 %v11949_v23  ;;  %9241 = vmatprep.subr.bf16.mxu1 %v9913_v19  ;;  %v9745_v39 = vunpack.i.h.bf16 %v9743_v40  ;;  %v9744_v32 = vunpack.i.l.bf16 %v9743_v40 }
 0x476   : > { %9217 = vmatprep.subr.bf16.mxu0 %v9913_v19 }
 0x477   : > { %v11961_v53 = vpop.permute.xlu0 %4102  ;;  %v9224_v2 = vpack.c.bf16 %v11719_v35, %v9745_v39  ;;  %v9227_v30 = vpack.c.bf16 %v9744_v32, %v9739_v27  ;;  %v9257_v48 = vpack.c.bf16 %v4254_v1, %v9744_v32  ;;  %v12095_v32 = vpack.c.bf16 %v11849_v15, %v11508_v43 }
 0x478   : > { %9243 = vmatpush1.bf16.msra.mxu1 %v9242_v21  ;;  %9772 = vrot.lane.b32.xlu0 %v9771_v16, %s9911_s26  ;;  %v4256_v17 = vpop.permute.xlu1 %4255 }
 0x479   : > { %4277 = vrot.lane.b32.xlu1 %v11961_v53, %s9911_s26  ;;  %9219 = vmatpush1.bf16.msra.mxu0 %v9218_v55  ;;  %v9260_v49 = vpack.c.bf16 %v11849_v15, %v4256_v17 }
 0x47a   : > { %9244 = vmatprep.subr.bf16.mxu1 %v9913_v19  ;;  %9220 = vmatprep.subr.bf16.mxu0 %v9913_v19 }
 0x47c   : > { %9246 = vmatpush1.bf16.msra.mxu1 %v11969_v61  ;;  %4136 = vrot.lane.b32.xlu0 %v11653_v4, %s9920_s17  ;;  %v11987_v10 = vpop.permute.xlu0 %4261 }
 0x47d   : > { %4179 = vrot.lane.b32.xlu1 %v11847_v6, %s9911_s26  ;;  %9222 = vmatpush1.bf16.msra.mxu0 %v9221_v57 }
 0x47e   : > { %9247 = vmatprep.subr.bf16.mxu1 %v9913_v19  ;;  %9223 = vmatprep.subr.bf16.mxu0 %v9913_v19 }
 0x480   : > { %9249 = vmatpush1.bf16.msra.mxu1 %v11982_v54  ;;  %4138 = vrot.lane.b32.xlu0 %v11655_v33, %s9920_s17  ;;  %v12005_v25 = vpop.permute.xlu0 %4153 }
 0x481   : > { %4181 = vrot.lane.b32.xlu1 %v11847_v6, %s9912_s10  ;;  %9225 = vmatpush1.bf16.msra.mxu0 %v9224_v2 }
 0x482   : > { %9250 = vmatprep.subr.bf16.mxu1 %v9913_v19  ;;  %9226 = vmatprep.subr.bf16.mxu0 %v9913_v19 }
 0x484   : > { %9252 = vmatpush1.bf16.msra.mxu1 %v11996_v26  ;;  %4183 = vrot.lane.b32.xlu0 %v11847_v6, %s9918_s12  ;;  %v12016_v38 = vpop.permute.xlu0 %4159 }
 0x485   : > { %9777 = vrot.lane.b32.xlu1 %v9776_v34, %s9919_s13  ;;  %9228 = vmatpush1.bf16.msra.mxu0 %v9227_v30  ;;  %s9555_s13 = smul.u32 1536, %s9991_s9 }
 0x486   : > { %9253 = vmatprep.subr.bf16.mxu1 %v9913_v19  ;;  %4734 = vmatprep.subr.mxu0 %v9915_v52 }
 0x487   : > { %s13810_s19 = scalar_lea.hbm %s13895_s8, %s9555_s13 }
 0x488   : > { %9255 = vmatpush1.bf16.msra.mxu1 %v9254_v24  ;;  %4281 = vrot.lane.b32.xlu0 %v12005_v25, %s9911_s26 }
 0x489   : > { %4735 = vmatpush1.msra.mxu0 %v4254_v1  ;;  %9256 = vmatprep.subr.bf16.mxu1 %v9913_v19 }
 0x48a   : > { %9265 = vmatprep.subr.bf16.mxu0 %v9913_v19  ;;  %4751 = vmatmul.mubr.f32.vlgmr.msra.gmra.mrb[36].mxu0 %v11698_v63 }
 0x48b   : > { %9267 = vmatpush1.bf16.msra.mxu0 %v11923_v56  ;;  %8205 = vmatprep.mubr.msk.f32.mxu0 %vm4379_vm0, %v11717_v36  ;;  %v9275_v56 = vpack.c.bf16 %v11669_v28, %v11672_v42  ;;  %v12048_v28 = vpack.c.bf16 %v11734_v60, %v11756_v37 }
 0x48c   : > { %9258 = vmatpush1.bf16.msra.mxu1 %v9257_v48  ;;  %4285 = vrot.lane.b32.xlu0 %v12016_v38, %s9911_s26 }
 0x48d   : > { %9259 = vmatprep.subr.bf16.mxu1 %v9913_v19  ;;  %9268 = vmatprep.subr.bf16.mxu0 %v9913_v19 }
 0x48e   : > { %4756 = vmatmul.mubr.f32.gmra.mrb[38].mxu0 %v11745_v13 }
 0x48f   : > { %9270 = vmatpush1.bf16.msra.mxu0 %v11937_v7  ;;  %8208 = vmatprep.mubr.msk.f32.mxu0 %vm4379_vm0, %v11546_v46  ;;  %v9278_v7 = vpack.c.bf16 %v11919_v62, %v11682_v51 }
 0x490   : > { %9261 = vmatpush1.bf16.msra.mxu1 %v9260_v49  ;;  %9271 = vmatprep.subr.bf16.mxu0 %v9913_v19 }
 0x491   : > { %9262 = vmatprep.subr.bf16.mxu1 %v9913_v19 }
 0x493   : > { %9273 = vmatpush1.bf16.msra.mxu0 %v11949_v23 }
 0x494   : > { %9274 = vmatprep.subr.bf16.mxu0 %v9913_v19 }
 0x497   : > { %9276 = vmatpush1.bf16.msra.mxu0 %v9275_v56 }
 0x498   : > { %9277 = vmatprep.subr.bf16.mxu0 %v9913_v19 }
 0x49b   : > { %9279 = vmatpush1.bf16.msra.mxu0 %v9278_v7 }
 0x49c   : > { %9280 = vmatprep.subr.bf16.mxu0 %v9913_v19 }
 0x49f   : > { %9282 = vmatpush1.bf16.msra.mxu0 %v12042_v22 }
 0x4a0   : > { %9283 = vmatprep.subr.bf16.mxu0 %v9913_v19 }
 0x4a3   : > { %9285 = vmatpush1.bf16.msra.mxu0 %v12048_v28 }
 0x4a4   : > { %9286 = vmatprep.subr.bf16.mxu0 %v9913_v19 }
 0x4bd   : > { %v9748_v42 = vpop.permute.xlu1 %9747 }
 0x4be   : > { %v9750_v51 = vunpack.i.h.bf16 %v9748_v42  ;;  %v9749_v62 = vunpack.i.l.bf16 %v9748_v42 }
 0x4c0   : > { %v9263_v18 = vpack.c.bf16 %v9750_v51, %v9749_v62  ;;  %v9290_v16 = vpack.c.bf16 %v9749_v62, %v11849_v15  ;;  %v9293_v40 = vpack.c.bf16 %v11987_v10, %v9750_v51  ;;  %v4368_v15 = vld [vmem:[%s13891_s4 + $0x8] sm:$0xff] }
 0x4c1   : > { %v12052_v23 = vpop.permute.xlu1 %9752 }
 0x4c2   : > { %v9754_v58 = vunpack.i.l.bf16 %v12052_v23  ;;  %9264 = vmatpush1.bf16.msra.mxu1 %v9263_v18 }
 0x4c3   : > { %4809 = vmatprep.subr.mxu1 %v9915_v52 }
 0x4c4   : > { %v12057_v1 = vpack.c.bf16 %v11508_v43, %v9754_v58  ;;  %v9314_v57 = vpack.c.bf16 %v9754_v58, %v11734_v60  ;;  %v12106_v60 = vpack.c.bf16 %v11794_v47, %v11766_v50 }
 0x4c5   : > { %v12059_v21 = vpop.permute.xlu1 %4156 }
 0x4c6   : > { %4283 = vrot.lane.b32.xlu1 %v12059_v21, %s9911_s26  ;;  %4810 = vmatpush1.msra.mxu1 %v11987_v10  ;;  %v9755_v10 = vunpack.i.h.bf16 %v12052_v23  ;;  %v12122_v34 = vpop.f32.mrb[28].mxu0  ;;  %v12249_v23 = vpack.c.bf16 %v11961_v53, %v11939_v11 }
 0x4c7   : > { %9288 = vmatpush1.bf16.msra.mxu0 %v12057_v1  ;;  %4826 = vmatmul.mubr.f32.vlgmr.msra.gmra.mrb[36].mxu1 %v11698_v63  ;;  %v4454_v48 = vpop.f32.mrb[29].mxu0 }
 0x4c8   : > { %9301 = vmatprep.subr.bf16.mxu1 %v9913_v19  ;;  %9289 = vmatprep.subr.bf16.mxu0 %v9913_v19  ;;  %v12118_v27 = vpack.c.bf16 %v11653_v4, %v9755_v10  ;;  %v9350_v50 = vpack.c.bf16 %v9755_v10, %v11794_v47  ;;  %v12224_v47 = vpack.c.bf16 %v11909_v14, %v11901_v20 }
 0x4c9   : > { %9303 = vmatpush1.bf16.msra.mxu1 %v11969_v61  ;;  %v9758_v55 = vpop.permute.xlu1 %9757  ;;  %8207 = vmatprep.mubr.msk.f32.mxu1 %vm4379_vm0, %v11717_v36  ;;  %v9311_v61 = vpack.c.bf16 %v11756_v37, %v11719_v35 }
 0x4ca   : > { %9304 = vmatprep.subr.bf16.mxu1 %v9913_v19  ;;  %9782 = vrot.lane.b32.xlu1 %v9758_v55, %s9911_s26 }
 0x4cb   : > { %9291 = vmatpush1.bf16.msra.mxu0 %v9290_v16  ;;  %4831 = vmatmul.mubr.f32.gmra.mrb[38].mxu1 %v11745_v13 }
 0x4cc   : > { %9292 = vmatprep.subr.bf16.mxu0 %v9913_v19  ;;  %8210 = vmatprep.mubr.msk.f32.mxu1 %vm4379_vm0, %v11546_v46 }
 0x4cd   : > { %9306 = vmatpush1.bf16.msra.mxu1 %v11982_v54  ;;  %v12086_v46 = vpop.permute.xlu1 %4169 }
 0x4ce   : > { %9307 = vmatprep.subr.bf16.mxu1 %v9913_v19  ;;  %v12124_v24 = vpop.f32.mrb[28].mxu1 }
 0x4cf   : > { %9294 = vmatpush1.bf16.msra.mxu0 %v9293_v40  ;;  %v4529_v17 = vpop.f32.mrb[29].mxu1 }
 0x4d0   : > { %9295 = vmatprep.subr.bf16.mxu0 %v9913_v19  ;;  %v9796_v17 = vpack.i.bf16 %v9659_v45, %v11537_v44  ;;  %v4367_v45 = vld [vmem:[%s13891_s4] sm:$0xff] }
 0x4d1   : > { %9309 = vmatpush1.bf16.msra.mxu1 %v11996_v26 }
 0x4d2   : > { %9310 = vmatprep.subr.bf16.mxu1 %v9913_v19 }
 0x4d5   : > { %9312 = vmatpush1.bf16.msra.mxu1 %v9311_v61 }
 0x4d6   : > { %9313 = vmatprep.subr.bf16.mxu1 %v9913_v19 }
 0x4d8   : > { %v9763_v39 = vpop.permute.xlu0 %9762 }
 0x4d9   : > { %v12090_v54 = vunpack.i.h.bf16 %v9763_v39  ;;  %9315 = vmatpush1.bf16.msra.mxu1 %v9314_v57  ;;  %v9764_v26 = vunpack.i.l.bf16 %v9763_v39 }
 0x4da   : > { %v4270_v2 = vpop.permute.xlu1 %4269  ;;  %9316 = vmatprep.subr.bf16.mxu1 %v9913_v19 }
 0x4db   : > { %v9786_v35 = vpack.i.bf16 %v12086_v46, %v12090_v54  ;;  %v9326_v42 = vpack.c.bf16 %v9764_v26, %v11895_v5 }
 0x4dd   : > { %9318 = vmatpush1.bf16.msra.mxu1 %v12095_v32  ;;  %9787 = vrot.lane.b32.xlu0 %v9786_v35, %s9911_s26 }
 0x4de   : > { %v12101_v37 = vpop.permute.xlu1 %4172  ;;  %9319 = vmatprep.subr.bf16.mxu1 %v9913_v19 }
 0x4df   : > { %4293 = vrot.lane.b32.xlu1 %v12101_v37, %s9911_s26 }
 0x4e1   : > { %9321 = vmatpush1.bf16.msra.mxu1 %v12106_v60  ;;  %4162 = vrot.lane.b32.xlu0 %v11763_v59, %s9920_s17 }
 0x4e2   : > { %v9768_v43 = vpop.permute.xlu0 %9767  ;;  %9322 = vmatprep.subr.bf16.mxu1 %v9913_v19 }
 0x4e3   : > { %v9770_v30 = vunpack.i.h.bf16 %v9768_v43  ;;  %4175 = vrot.lane.b32.xlu1 %v11805_v3, %s9920_s17  ;;  %v9769_v56 = vunpack.i.l.bf16 %v9768_v43 }
 0x4e5   : > { %v9296_v49 = vpack.c.bf16 %v11895_v5, %v9770_v30  ;;  %9324 = vmatpush1.bf16.msra.mxu1 %v12118_v27  ;;  %v9299_v51 = vpack.c.bf16 %v9769_v56, %v9764_v26  ;;  %v9329_v18 = vpack.c.bf16 %v4270_v2, %v9769_v56  ;;  %v12173_v30 = vpop.f32.mrb[30].mxu0 }
 0x4e6   : > { %v4272_v7 = vpop.permute.xlu0 %4271  ;;  %9325 = vmatprep.subr.bf16.mxu1 %v9913_v19  ;;  %v4459_v48 = vpop.f32.mrb[31].mxu0 }
 0x4e7   : > { %9297 = vmatpush1.bf16.msra.mxu0 %v9296_v49  ;;  %v9332_v55 = vpack.c.bf16 %v11951_v8, %v4272_v7 }
 0x4e8   : > { %9298 = vmatprep.subr.bf16.mxu0 %v9913_v19 }
 0x4e9   : > { %9327 = vmatpush1.bf16.msra.mxu1 %v9326_v42 }
 0x4ea   : > { %v12131_v62 = vpop.permute.xlu0 %9772  ;;  %9328 = vmatprep.subr.bf16.mxu1 %v9913_v19 }
 0x4eb   : > { %v12134_v58 = vpop.permute.xlu1 %4277  ;;  %9300 = vmatpush1.bf16.msra.mxu0 %v9299_v51  ;;  %v9775_v40 = vunpack.i.h.bf16 %v12131_v62  ;;  %v9774_v61 = vunpack.i.l.bf16 %v12131_v62 }
 0x4ec   : > { %4884 = vmatprep.subr.mxu0 %v9915_v52 }
 0x4ed   : > { %9330 = vmatpush1.bf16.msra.mxu1 %v9329_v18 }
 0x4ee   : > { %v12137_v16 = vpop.permute.xlu0 %4136  ;;  %9331 = vmatprep.subr.bf16.mxu1 %v9913_v19 }
 0x4ef   : > { %v12143_v57 = vpop.permute.xlu1 %4179  ;;  %4885 = vmatpush1.msra.mxu0 %v4270_v2  ;;  %v9335_v2 = vpack.c.bf16 %v9775_v40, %v9774_v61  ;;  %v9386_v4 = vpack.c.bf16 %v12137_v16, %v11909_v14  ;;  %v9362_v14 = vpack.c.bf16 %v9774_v61, %v11951_v8 }
 0x4f0   : > { %4297 = vrot.lane.b32.xlu0 %v12143_v57, %s9911_s26  ;;  %4901 = vmatmul.mubr.f32.vlgmr.msra.gmra.mrb[40].mxu0 %v11698_v63 }
 0x4f1   : > { %9333 = vmatpush1.bf16.msra.mxu1 %v9332_v55  ;;  %9337 = vmatprep.subr.bf16.mxu0 %v9913_v19 }
 0x4f2   : > { %9339 = vmatpush1.bf16.msra.mxu0 %v12042_v22  ;;  %v12150_v39 = vpop.permute.xlu0 %4138  ;;  %8209 = vmatprep.mubr.msk.f32.mxu0 %vm4379_vm0, %v11717_v36  ;;  %v12165_v22 = vld [vmem:[%s13890_s3 + $0x8] sm:$0xff] }
 0x4f3   : > { %v4182_v35 = vpop.permute.xlu1 %4181  ;;  %9334 = vmatprep.subr.bf16.mxu1 %v9913_v19  ;;  %9340 = vmatprep.subr.bf16.mxu0 %v9913_v19 }
 0x4f4   : > { %4299 = vrot.lane.b32.xlu1 %v4182_v35, %s9911_s26  ;;  %4906 = vmatmul.mubr.f32.gmra.mrb[42].mxu0 %v11745_v13 }
 0x4f5   : > { %9336 = vmatpush1.bf16.msra.mxu1 %v9335_v2  ;;  %8212 = vmatprep.mubr.msk.f32.mxu0 %vm4379_vm0, %v12165_v22 }
 0x4f6   : > { %9342 = vmatpush1.bf16.msra.mxu0 %v12048_v28  ;;  %v4184_v43 = vpop.permute.xlu0 %4183  ;;  %4959 = vmatprep.subr.mxu1 %v9915_v52  ;;  %v12183_v28 = vpop.f32.mrb[30].mxu1 }
 0x4f7   : > { %v9778_v26 = vpop.permute.xlu1 %9777  ;;  %4301 = vrot.lane.b32.xlu0 %v4184_v43, %s9911_s26  ;;  %9343 = vmatprep.subr.bf16.mxu0 %v9913_v19  ;;  %v4534_v49 = vpop.f32.mrb[31].mxu1 }
 0x4f8   : > { %9792 = vrot.lane.b32.xlu1 %v9778_v26, %s9911_s26  ;;  %v9419_v49 = vpack.c.bf16 %v11939_v11, %v11951_v8  ;;  %v9422_v11 = vpack.c.bf16 %v12150_v39, %v11961_v53  ;;  %v9455_v53 = vpack.c.bf16 %v12059_v21, %v12005_v25 }
 0x4f9   : > { %4960 = vmatpush1.msra.mxu1 %v12134_v58 }
 0x4fa   : > { %4976 = vmatmul.mubr.f32.vlgmr.msra.gmra.mrb[40].mxu1 %v11698_v63  ;;  %9345 = vmatpush1.bf16.msra.mxu0 %v12057_v1  ;;  %v12259_v1 = vpack.c.bf16 %v11763_v59, %v12150_v39  ;;  %v9428_v39 = vpack.c.bf16 %v12016_v38, %v12059_v21 }
 0x4fb   : > { %9373 = vmatprep.subr.bf16.mxu1 %v9913_v19  ;;  %9797 = vrot.lane.b32.xlu0 %v9796_v17, %s9911_s26 }
 0x4fc   : > { %9375 = vmatpush1.bf16.msra.mxu1 %v12095_v32  ;;  %8211 = vmatprep.mubr.msk.f32.mxu1 %vm4379_vm0, %v11717_v36  ;;  %v4282_v32 = vpop.permute.xlu0 %4281 }
 0x4fd   : > { %9346 = vmatprep.subr.bf16.mxu0 %v9913_v19  ;;  %9376 = vmatprep.subr.bf16.mxu1 %v9913_v19 }
 0x4fe   : > { %4981 = vmatmul.mubr.f32.gmra.mrb[42].mxu1 %v11745_v13  ;;  %9348 = vmatpush1.bf16.msra.mxu0 %v9347_v12 }
 0x4ff   : > { %4371 = vperm.xlu0 %9630, %v4367_v45   ;;  %4309 = vrot.lane.b32.xlu1 %v9664_v0, %s9911_s26  ;;  %v9383_v0 = vpack.c.bf16 %v11901_v20, %v11895_v5  ;;  %v12233_v5 = vpack.c.bf16 %v11655_v33, %v12137_v16  ;;  %v12239_v20 = vpack.c.bf16 %v11951_v8, %v11655_v33 }
 0x500   : > { %9378 = vmatpush1.bf16.msra.mxu1 %v12106_v60  ;;  %9349 = vmatprep.subr.bf16.mxu0 %v9913_v19  ;;  %v9365_v33 = vpack.c.bf16 %v12134_v58, %v9775_v40  ;;  %v9398_v60 = vpack.c.bf16 %v4282_v32, %v12005_v25  ;;  %v4286_v42 = vpop.permute.xlu0 %4285 }
 0x501   : > { %9379 = vmatprep.subr.bf16.mxu1 %v9913_v19  ;;  %8214 = vmatprep.mubr.msk.f32.mxu1 %vm4379_vm0, %v12165_v22 }
 0x502   : > { %9351 = vmatpush1.bf16.msra.mxu0 %v9350_v50  ;;  %v12305_v50 = vld [vmem:[%s13890_s3] sm:$0xff] }
 0x503   : > { %9352 = vmatprep.subr.bf16.mxu0 %v9913_v19  ;;  %4376 = vperm.xlu1 %9801, %v4368_v15  }
 0x504   : > { %9381 = vmatpush1.bf16.msra.mxu1 %v12118_v27 }
 0x505   : > { %9382 = vmatprep.subr.bf16.mxu1 %v9913_v19 }
 0x506   : > { %9354 = vmatpush1.bf16.msra.mxu0 %v12215_v9 }
 0x507   : > { %9355 = vmatprep.subr.bf16.mxu0 %v9913_v19 }
 0x508   : > { %9384 = vmatpush1.bf16.msra.mxu1 %v9383_v0 }
 0x509   : > { %9385 = vmatprep.subr.bf16.mxu1 %v9913_v19 }
 0x50a   : > { %9357 = vmatpush1.bf16.msra.mxu0 %v12224_v47 }
 0x50b   : > { %9358 = vmatprep.subr.bf16.mxu0 %v9913_v19 }
 0x50c   : > { %9387 = vmatpush1.bf16.msra.mxu1 %v9386_v4 }
 0x50d   : > { %9388 = vmatprep.subr.bf16.mxu1 %v9913_v19 }
 0x50e   : > { %9360 = vmatpush1.bf16.msra.mxu0 %v12233_v5 }
 0x50f   : > { %9361 = vmatprep.subr.bf16.mxu0 %v9913_v19 }
 0x510   : > { %9390 = vmatpush1.bf16.msra.mxu1 %v12239_v20 }
 0x511   : > { %9391 = vmatprep.subr.bf16.mxu1 %v9913_v19 }
 0x512   : > { %9363 = vmatpush1.bf16.msra.mxu0 %v9362_v14 }
 0x513   : > { %9364 = vmatprep.subr.bf16.mxu0 %v9913_v19 }
 0x514   : > { %9393 = vmatpush1.bf16.msra.mxu1 %v12249_v23 }
 0x515   : > { %9394 = vmatprep.subr.bf16.mxu1 %v9913_v19 }
 0x516   : > { %9366 = vmatpush1.bf16.msra.mxu0 %v9365_v33 }
 0x517   : > { %9367 = vmatprep.subr.bf16.mxu0 %v9913_v19 }
 0x518   : > { %9396 = vmatpush1.bf16.msra.mxu1 %v12259_v1 }
 0x519   : > { %9397 = vmatprep.subr.bf16.mxu1 %v9913_v19 }
 0x51c   : > { %9399 = vmatpush1.bf16.msra.mxu1 %v9398_v60 }
 0x51d   : > { %9400 = vmatprep.subr.bf16.mxu1 %v9913_v19 }
 0x52b   : > { %v12266_v10 = vpop.f32.mrb[32].mxu0 }
 0x52c   : > { %v4604_v27 = vpop.f32.mrb[33].mxu0 }
 0x52f   : > { %v12268_v56 = vpop.f32.mrb[34].mxu0 }
 0x530   : > { %v4609_v7 = vpop.f32.mrb[35].mxu0 }
 0x531   : > { %v13907_v7 = vmov 1.0  }
 0x538   : > { %v4284_v51 = vpop.permute.xlu1 %4283 }
 0x539   : > { %v9401_v62 = vpack.c.bf16 %v4286_v42, %v4284_v51  ;;  %v9371_v26 = vpack.c.bf16 %v4284_v51, %v4282_v32 }
 0x53a   : > { %v12270_v18 = vpop.f32.mrb[32].mxu1 }
 0x53b   : > { %9402 = vmatpush1.bf16.msra.mxu1 %v9401_v62  ;;  %v4679_v58 = vpop.f32.mrb[33].mxu1 }
 0x53c   : > { %9403 = vmatprep.subr.bf16.mxu1 %v9913_v19  ;;  %v9783_v40 = vpop.permute.xlu1 %9782 }
 0x53d   : > { %v9785_v61 = vunpack.i.h.bf16 %v9783_v40  ;;  %v9784_v2 = vunpack.i.l.bf16 %v9783_v40 }
 0x53e   : > { %v12273_v16 = vpop.f32.mrb[34].mxu1 }
 0x53f   : > { %v4684_v55 = vpop.f32.mrb[35].mxu1  ;;  %v9404_v35 = vpack.c.bf16 %v12090_v54, %v9785_v61  ;;  %v9368_v43 = vpack.c.bf16 %v12005_v25, %v9784_v2 }
 0x541   : > { %9369 = vmatpush1.bf16.msra.mxu0 %v9368_v43  ;;  %9405 = vmatpush1.bf16.msra.mxu1 %v9404_v35  ;;  %v9805_v43 = vld [vmem:[%s13890_s3 + $0x10] sm:$0xff] }
 0x542   : > { %9370 = vmatprep.subr.bf16.mxu0 %v9913_v19  ;;  %9406 = vmatprep.subr.bf16.mxu1 %v9913_v19 }
 0x545   : > { %9372 = vmatpush1.bf16.msra.mxu0 %v9371_v26 }
 0x546   : > { %5034 = vmatprep.subr.mxu0 %v9915_v52 }
 0x549   : > { %5035 = vmatpush1.msra.mxu0 %v4286_v42 }
 0x54a   : > { %5051 = vmatmul.mubr.f32.vlgmr.msra.gmra.mrb[44].mxu0 %v11698_v63  ;;  %9409 = vmatprep.subr.bf16.mxu0 %v9913_v19 }
 0x54b   : > { %9411 = vmatpush1.bf16.msra.mxu0 %v12215_v9  ;;  %8213 = vmatprep.mubr.msk.f32.mxu0 %vm4379_vm0, %v11717_v36 }
 0x54c   : > { %9412 = vmatprep.subr.bf16.mxu0 %v9913_v19 }
 0x54e   : > { %5056 = vmatmul.mubr.f32.gmra.mrb[46].mxu0 %v11745_v13 }
 0x54f   : > { %v12282_v48 = vpop.permute.xlu0 %9787  ;;  %9414 = vmatpush1.bf16.msra.mxu0 %v12224_v47  ;;  %8216 = vmatprep.mubr.msk.f32.mxu0 %vm4379_vm0, %v12165_v22 }
 0x550   : > { %v9790_v17 = vunpack.i.h.bf16 %v12282_v48  ;;  %v9789_v12 = vunpack.i.l.bf16 %v12282_v48  ;;  %9415 = vmatprep.subr.bf16.mxu0 %v9913_v19 }
 0x551   : > { %v4294_v63 = vpop.permute.xlu1 %4293 }
 0x552   : > { %v9407_v45 = vpack.c.bf16 %v9790_v17, %v9789_v12  ;;  %v9434_v21 = vpack.c.bf16 %v9789_v12, %v12090_v54  ;;  %v9437_v14 = vpack.c.bf16 %v4294_v63, %v9790_v17 }
 0x553   : > { %9417 = vmatpush1.bf16.msra.mxu0 %v12233_v5 }
 0x554   : > { %9408 = vmatpush1.bf16.msra.mxu1 %v9407_v45  ;;  %9418 = vmatprep.subr.bf16.mxu0 %v9913_v19 }
 0x555   : > { %5109 = vmatprep.subr.mxu1 %v9915_v52  ;;  %v4176_v0 = vpop.permute.xlu1 %4175 }
 0x557   : > { %9420 = vmatpush1.bf16.msra.mxu0 %v9419_v49 }
 0x558   : > { %5110 = vmatpush1.msra.mxu1 %v4294_v63  ;;  %9421 = vmatprep.subr.bf16.mxu0 %v9913_v19 }
 0x559   : > { %5126 = vmatmul.mubr.f32.vlgmr.msra.gmra.mrb[44].mxu1 %v12305_v50  ;;  %9445 = vmatprep.subr.bf16.mxu1 %v9913_v19 }
 0x55a   : > { %9447 = vmatpush1.bf16.msra.mxu1 %v12239_v20  ;;  %8215 = vmatprep.mubr.msk.f32.mxu1 %vm4379_vm0, %v11717_v36  ;;  %v9425_v36 = vpack.c.bf16 %v12005_v25, %v11763_v59  ;;  %v9461_v25 = vpack.c.bf16 %v12090_v54, %v11805_v3 }
 0x55b   : > { %9448 = vmatprep.subr.bf16.mxu1 %v9913_v19  ;;  %9423 = vmatpush1.bf16.msra.mxu0 %v9422_v11 }
 0x55c   : > { %9424 = vmatprep.subr.bf16.mxu0 %v9913_v19 }
 0x55d   : > { %5131 = vmatmul.mubr.f32.gmra.mrb[46].mxu1 %v11745_v13  ;;  %v12317_v8 = vpop.f32.mrb[36].mxu0 }
 0x55e   : > { %9450 = vmatpush1.bf16.msra.mxu1 %v12249_v23  ;;  %8218 = vmatprep.mubr.msk.f32.mxu1 %vm4379_vm0, %v12165_v22  ;;  %v4754_v15 = vpop.f32.mrb[37].mxu0  ;;  %v4163_v22 = vpop.permute.xlu0 %4162 }
 0x55f   : > { %9451 = vmatprep.subr.bf16.mxu1 %v9913_v19  ;;  %9426 = vmatpush1.bf16.msra.mxu0 %v9425_v36  ;;  %v9458_v59 = vpack.c.bf16 %v4163_v22, %v12016_v38  ;;  %v9431_v47 = vpack.c.bf16 %v11805_v3, %v4163_v22  ;;  %v9464_v38 = vpack.c.bf16 %v12101_v37, %v12086_v46  ;;  %v5430_v46 = vmul.u32 2, %v10371_v31 }
 0x560   : > { %9427 = vmatprep.subr.bf16.mxu0 %v9913_v19  ;;  %v9467_v3 = vpack.c.bf16 %v11847_v6, %v4176_v0 }
 0x561   : > { %v12326_v9 = vpop.f32.mrb[38].mxu0  ;;  %vm5432_vm1 = vcmp.eq.s32.totalorder %v10384_v41, %v5430_v46  ;;  %vm5431_vm2 = vcmp.eq.s32.totalorder %v10369_v29, %v5430_v46 }
 0x562   : > { %9453 = vmatpush1.bf16.msra.mxu1 %v12259_v1  ;;  %v4759_v13 = vpop.f32.mrb[39].mxu0  ;;  %v4298_v20 = vpop.permute.xlu0 %4297  ;;  %v5434_v6 = vsel %vm5432_vm1, 1.0, %v9915_v52  ;;  %vm12367_vm3 = vmpackc.low %vm1937_vm11, %vm5431_vm2  ;;  %vm7706_vm11 = vcmask 1045509  }
 0x563   : > { %9454 = vmatprep.subr.bf16.mxu1 %v9913_v19  ;;  %9429 = vmatpush1.bf16.msra.mxu0 %v9428_v39  ;;  %v9470_v37 = vpack.c.bf16 %v4298_v20, %v12143_v57 }
 0x564   : > { %9430 = vmatprep.subr.bf16.mxu0 %v9913_v19 }
 0x566   : > { %9456 = vmatpush1.bf16.msra.mxu1 %v9455_v53  ;;  %v4300_v4 = vpop.permute.xlu1 %4299 }
 0x567   : > { %9457 = vmatprep.subr.bf16.mxu1 %v9913_v19  ;;  %9432 = vmatpush1.bf16.msra.mxu0 %v9431_v47  ;;  %v9443_v1 = vpack.c.bf16 %v4300_v4, %v4298_v20 }
 0x568   : > { %9433 = vmatprep.subr.bf16.mxu0 %v9913_v19 }
 0x569   : > { %v4302_v54 = vpop.permute.xlu0 %4301 }
 0x56a   : > { %9459 = vmatpush1.bf16.msra.mxu1 %v9458_v59  ;;  %v9793_v5 = vpop.permute.xlu1 %9792  ;;  %v9473_v60 = vpack.c.bf16 %v4302_v54, %v4300_v4 }
 0x56b   : > { %9460 = vmatprep.subr.bf16.mxu1 %v9913_v19  ;;  %9435 = vmatpush1.bf16.msra.mxu0 %v9434_v21  ;;  %v9794_v23 = vunpack.i.l.bf16 %v9793_v5  ;;  %v9795_v27 = vunpack.i.h.bf16 %v9793_v5 }
 0x56c   : > { %9436 = vmatprep.subr.bf16.mxu0 %v9913_v19 }
 0x56d   : > { %v9440_v33 = vpack.c.bf16 %v12143_v57, %v9794_v23  ;;  %v9798_v32 = vpop.permute.xlu0 %9797  ;;  %v12364_v57 = vpack.c.bf16 %v5434_v6, %v13907_v7  ;;  %v9476_v40 = vpack.c.bf16 %v11537_v44, %v9795_v27 }
 0x56e   : > { %9462 = vmatpush1.bf16.msra.mxu1 %v9461_v25  ;;  %v9800_v58 = vunpack.i.h.bf16 %v9798_v32  ;;  %v9799_v55 = vunpack.i.l.bf16 %v9798_v32 }
 0x56f   : > { %9463 = vmatprep.subr.bf16.mxu1 %v9913_v19  ;;  %9438 = vmatpush1.bf16.msra.mxu0 %v9437_v14 }
 0x570   : > { %9439 = vmatprep.subr.bf16.mxu0 %v9913_v19  ;;  %v9479_v35 = vpack.c.bf16 %v9800_v58, %v9799_v55 }
 0x571   : > { %v4310_v51 = vpop.permute.xlu1 %4309 }
 0x572   : > { %9465 = vmatpush1.bf16.msra.mxu1 %v9464_v38 }
 0x573   : > { %9466 = vmatprep.subr.bf16.mxu1 %v9913_v19  ;;  %9441 = vmatpush1.bf16.msra.mxu0 %v9440_v33 }
 0x574   : > { %9442 = vmatprep.subr.bf16.mxu0 %v9913_v19 }
 0x576   : > { %9468 = vmatpush1.bf16.msra.mxu1 %v9467_v3 }
 0x577   : > { %9469 = vmatprep.subr.bf16.mxu1 %v9913_v19  ;;  %9444 = vmatpush1.bf16.msra.mxu0 %v9443_v1 }
 0x578   : > { %5184 = vmatprep.subr.mxu0 %v9915_v52 }
 0x57a   : > { %9471 = vmatpush1.bf16.msra.mxu1 %v9470_v37 }
 0x57b   : > { %9472 = vmatprep.subr.bf16.mxu1 %v9913_v19  ;;  %5185 = vmatpush1.msra.mxu0 %v4302_v54 }
 0x57c   : > { %5201 = vmatmul.mubr.f32.vlgmr.msra.gmra.mrb[48].mxu0 %v12305_v50  ;;  %9483 = vmatprep.subr.msk.bf16.mxu0 %vm12367_vm3, %v12364_v57 }
 0x57d   : > { %9486 = vmatpush3.bf16.msk.msra.mxu0 %vm12367_vm3, %v12364_v57 }
 0x57e   : > { %v12371_v41 = vpop.permute.xlu0 %4371  ;;  %9474 = vmatpush1.bf16.msra.mxu1 %v9473_v60  ;;  %9495 = vmatprep.subr.msk.bf16.mxu0 %vm12367_vm3, %v12364_v57 }
 0x57f   : > { %9475 = vmatprep.subr.bf16.mxu1 %v9913_v19  ;;  %v12376_v62 = vadd.f32 %v12122_v34, %v12371_v41  ;;  %v12382_v61 = vadd.f32 %v12124_v24, %v12371_v41  ;;  %v9804_v34 = vld [vmem:[%s13890_s3 + $0x18] sm:$0xff]  ;;  %v12427_v45 = vadd.f32 %v12266_v10, %v12371_v41 }
 0x580   : > { %8217 = vmatprep.mubr.msk.f32.mxu0 %vm4379_vm0, %v9804_v34 }
 0x581   : > { %v5286_v2 = vmax.f32 %v12376_v62, 0.0  ;;  %v5288_v44 = vmax.f32 %v12382_v61, 0.0  ;;  %5206 = vmatmul.mubr.f32.gmra.mrb[50].mxu0 %v9805_v43 }
 0x582   : > { %9477 = vmatpush1.bf16.msra.mxu1 %v9476_v40  ;;  %v12399_v24 = vpop.permute.xlu1 %4376 }
 0x583   : > { %5334 = vrot.lane.b32.xlu0 %v5286_v2, %s9911_s26  ;;  %9478 = vmatprep.subr.bf16.mxu1 %v9913_v19  ;;  %v12413_v26 = vadd.f32 %v12183_v28, %v12399_v24  ;;  %v12417_v48 = vadd.f32 %v12173_v30, %v12399_v24  ;;  %v12421_v19 = vadd.f32 %v12270_v18, %v12371_v41 }
 0x584   : > { %5338 = vrot.lane.b32.xlu1 %v5288_v44, %s9911_s26  ;;  %v12438_v30 = vadd.f32 %v12273_v16, %v12399_v24  ;;  %v12442_v28 = vadd.f32 %v12268_v56, %v12399_v24  ;;  %v12464_v16 = vadd.f32 %v12317_v8, %v12371_v41  ;;  %v12477_v63 = vadd.f32 %v12326_v9, %v12399_v24 }
 0x585   : > { %v5289_v17 = vmax.f32 %v12413_v26, 0.0  ;;  %v5287_v12 = vmax.f32 %v12417_v48, 0.0  ;;  %v5292_v10 = vmax.f32 %v12421_v19, 0.0 }
 0x586   : > { %9480 = vmatpush1.bf16.msra.mxu1 %v9479_v35  ;;  %v5293_v18 = vmax.f32 %v12438_v30, 0.0  ;;  %v5291_v56 = vmax.f32 %v12442_v28, 0.0  ;;  %v5294_v49 = vmax.f32 %v12464_v16, 0.0 }
 0x587   : > { %5259 = vmatprep.subr.mxu1 %v9915_v52  ;;  %5336 = vrot.lane.b32.xlu0 %v5287_v12, %s9911_s26  ;;  %v5290_v52 = vmax.f32 %v12427_v45, 0.0 }
 0x588   : > { %5340 = vrot.lane.b32.xlu1 %v5289_v17, %s9911_s26 }
 0x58a   : > { %5260 = vmatpush1.msra.mxu1 %v4310_v51 }
 0x58b   : > { %5276 = vmatmul.mubr.f32.vlgmr.msra.gmra.mrb[48].mxu1 %v12305_v50  ;;  %9489 = vmatprep.subr.msk.bf16.mxu1 %vm12367_vm3, %v12364_v57  ;;  %v5295_v50 = vmax.f32 %v12477_v63, 0.0 }
 0x58c   : > { %5346 = vrot.lane.b32.xlu1 %v5292_v10, %s9911_s26  ;;  %5342 = vrot.lane.b32.xlu0 %v5290_v52, %s9911_s26 }
 0x58d   : > { %8219 = vmatprep.mubr.msk.f32.mxu1 %vm4379_vm0, %v9804_v34  ;;  %9492 = vmatpush3.bf16.msk.msra.mxu1 %vm12367_vm3, %v12364_v57 }
 0x58e   : > { %9501 = vmatprep.subr.msk.bf16.mxu1 %vm12367_vm3, %v12364_v57 }
 0x58f   : > { %5281 = vmatmul.mubr.f32.gmra.mrb[50].mxu1 %v9805_v43 }
 0x590   : > { %5348 = vrot.lane.b32.xlu1 %v5293_v18, %s9911_s26  ;;  %5344 = vrot.lane.b32.xlu0 %v5291_v56, %s9911_s26 }
 0x594   : > { %5350 = vrot.lane.b32.xlu0 %v5294_v49, %s9911_s26 }
 0x598   : > { %5352 = vrot.lane.b32.xlu0 %v5295_v50, %s9911_s26 }
 0x59a   : > { %v4827_v11 = vpop.f32.mrb[36].mxu1 }
 0x59b   : > { %v12488_v8 = vadd.f32 %v4827_v11, %v12371_v41  ;;  %v4829_v15 = vpop.f32.mrb[37].mxu1 }
 0x59d   : > { %v5296_v36 = vmax.f32 %v12488_v8, 0.0 }
 0x59e   : > { %v4832_v9 = vpop.f32.mrb[38].mxu1 }
 0x59f   : > { %v12492_v13 = vadd.f32 %v4832_v9, %v12399_v24  ;;  %5354 = vrot.lane.b32.xlu1 %v5296_v36, %s9911_s26  ;;  %v4834_v53 = vpop.f32.mrb[39].mxu1 }
 0x5a1   : > { %v5297_v39 = vmax.f32 %v12492_v13, 0.0 }
 0x5a3   : > { %5356 = vrot.lane.b32.xlu1 %v5297_v39, %s9911_s26 }
 0x5c3   : > { %v4902_v22 = vpop.f32.mrb[40].mxu0 }
 0x5c4   : > { %v12502_v0 = vadd.f32 %v4902_v22, %v12371_v41  ;;  %v4904_v59 = vpop.f32.mrb[41].mxu0 }
 0x5c6   : > { %v5298_v47 = vmax.f32 %v12502_v0, 0.0 }
 0x5c7   : > { %v4907_v4 = vpop.f32.mrb[42].mxu0 }
 0x5c8   : > { %v12506_v25 = vadd.f32 %v4907_v4, %v12399_v24  ;;  %5358 = vrot.lane.b32.xlu0 %v5298_v47, %s9911_s26  ;;  %v4909_v21 = vpop.f32.mrb[43].mxu0 }
 0x5ca   : > { %v5299_v5 = vmax.f32 %v12506_v25, 0.0 }
 0x5cc   : > { %5360 = vrot.lane.b32.xlu0 %v5299_v5, %s9911_s26 }
 0x5cd   : > { %v4977_v38 = vpop.f32.mrb[40].mxu1 }
 0x5ce   : > { %v12516_v20 = vadd.f32 %v4977_v38, %v12371_v41  ;;  %v4979_v14 = vpop.f32.mrb[41].mxu1 }
 0x5d0   : > { %v5300_v23 = vmax.f32 %v12516_v20, 0.0 }
 0x5d1   : > { %v4982_v3 = vpop.f32.mrb[42].mxu1 }
 0x5d2   : > { %v12520_v54 = vadd.f32 %v4982_v3, %v12399_v24  ;;  %5362 = vrot.lane.b32.xlu1 %v5300_v23, %s9911_s26  ;;  %v4984_v33 = vpop.f32.mrb[43].mxu1 }
 0x5d4   : > { %v5301_v46 = vmax.f32 %v12520_v54, 0.0 }
 0x5d6   : > { %5364 = vrot.lane.b32.xlu1 %v5301_v46, %s9911_s26 }
 0x5f5   : > { %v5335_v37 = vpop.permute.xlu0 %5334 }
 0x5f6   : > { %v5406_v1 = vmax.f32 %v5286_v2, %v5335_v37  ;;  %v5339_v32 = vpop.permute.xlu1 %5338 }
 0x5f7   : > { %v5408_v6 = vmax.f32 %v5288_v44, %v5339_v32 }
 0x5f8   : > { %8773 = vmatprep.mubr.msk.f32.mxu0 %vm5435_vm4, %v5406_v1 }
 0x5f9   : > { %8780 = vmatprep.mubr.msk.f32.mxu1 %vm5435_vm4, %v5408_v6  ;;  %v5337_v60 = vpop.permute.xlu0 %5336 }
 0x5fa   : > { %v5341_v27 = vpop.permute.xlu1 %5340  ;;  %v5407_v7 = vmax.f32 %v5287_v12, %v5337_v60 }
 0x5fb   : > { %v5409_v51 = vmax.f32 %v5289_v17, %v5341_v27 }
 0x5fc   : > { %8774 = vmatmul.mubr.msk.f32.vlgmr.msra.gmra.mrb[52].mxu0 %vm5435_vm4, %v5407_v7 }
 0x5fd   : > { %8781 = vmatmul.mubr.msk.f32.vlgmr.msra.gmra.mrb[52].mxu1 %vm5435_vm4, %v5409_v51  ;;  %9498 = vmatpush3.bf16.msk.msra.mxu0 %vm12367_vm3, %v12364_v57 }
 0x5fe   : > { %v5347_v62 = vpop.permute.xlu1 %5346  ;;  %v5343_v58 = vpop.permute.xlu0 %5342  ;;  %9504 = vmatpush3.bf16.msk.msra.mxu1 %vm12367_vm3, %v12364_v57  ;;  %9507 = vmatprep.subr.msk.bf16.mxu0 %vm12367_vm3, %v12364_v57 }
 0x5ff   : > { %v5412_v55 = vmax.f32 %v5292_v10, %v5347_v62  ;;  %v5410_v40 = vmax.f32 %v5290_v52, %v5343_v58  ;;  %9513 = vmatprep.subr.msk.bf16.mxu1 %vm12367_vm3, %v12364_v57 }
 0x601   : > { %8787 = vmatprep.mubr.msk.f32.mxu0 %vm5435_vm4, %v5410_v40  ;;  %8794 = vmatprep.mubr.msk.f32.mxu1 %vm5435_vm4, %v5412_v55 }
 0x602   : > { %v5349_v61 = vpop.permute.xlu1 %5348  ;;  %v5345_v2 = vpop.permute.xlu0 %5344 }
 0x603   : > { %v5413_v34 = vmax.f32 %v5293_v18, %v5349_v61  ;;  %v5411_v44 = vmax.f32 %v5291_v56, %v5345_v2 }
 0x605   : > { %8788 = vmatmul.mubr.msk.f32.vlgmr.msra.gmra.mrb[54].mxu0 %vm5435_vm4, %v5411_v44  ;;  %8795 = vmatmul.mubr.msk.f32.vlgmr.msra.gmra.mrb[54].mxu1 %vm5435_vm4, %v5413_v34 }
 0x606   : > { %v5351_v35 = vpop.permute.xlu0 %5350  ;;  %9510 = vmatpush3.bf16.msk.msra.mxu0 %vm12367_vm3, %v12364_v57  ;;  %9516 = vmatpush3.bf16.msk.msra.mxu1 %vm12367_vm3, %v12364_v57 }
 0x607   : > { %v5414_v43 = vmax.f32 %v5294_v49, %v5351_v35  ;;  %9519 = vmatprep.subr.msk.bf16.mxu0 %vm12367_vm3, %v12364_v57  ;;  %9525 = vmatprep.subr.msk.bf16.mxu1 %vm12367_vm3, %v12364_v57 }
 0x609   : > { %8801 = vmatprep.mubr.msk.f32.mxu0 %vm5435_vm4, %v5414_v43 }
 0x60a   : > { %v5353_v26 = vpop.permute.xlu0 %5352 }
 0x60b   : > { %v5415_v48 = vmax.f32 %v5295_v50, %v5353_v26  ;;  %v6437_v26 = vld [vmem:[%s13892_s5 + $0x8] sm:$0xff] }
 0x60d   : > { %8802 = vmatmul.mubr.msk.f32.vlgmr.msra.gmra.mrb[56].mxu0 %vm5435_vm4, %v5415_v48 }
 0x60e   : > { %9522 = vmatpush3.bf16.msk.msra.mxu0 %vm12367_vm3, %v12364_v57 }
 0x60f   : > { %9531 = vmatprep.subr.msk.bf16.mxu0 %vm12367_vm3, %v12364_v57 }
 0x611   : > { %v5355_v19 = vpop.permute.xlu1 %5354 }
 0x612   : > { %v5416_v17 = vmax.f32 %v5296_v36, %v5355_v19 }
 0x614   : > { %8808 = vmatprep.mubr.msk.f32.mxu1 %vm5435_vm4, %v5416_v17 }
 0x615   : > { %v5357_v12 = vpop.permute.xlu1 %5356 }
 0x616   : > { %v5417_v45 = vmax.f32 %v5297_v39, %v5357_v12  ;;  %v6448_v12 = vld [vmem:[%s13892_s5 + $0x60] sm:$0xff] }
 0x618   : > { %8809 = vmatmul.mubr.msk.f32.vlgmr.msra.gmra.mrb[56].mxu1 %vm5435_vm4, %v5417_v45  ;;  %v6461_v45 = vld [vmem:[%s13892_s5 + $0xc8] sm:$0xff] }
 0x619   : > { %9528 = vmatpush3.bf16.msk.msra.mxu1 %vm12367_vm3, %v12364_v57 }
 0x61a   : > { %9537 = vmatprep.subr.msk.bf16.mxu1 %vm12367_vm3, %v12364_v57 }
 0x61d   : > { %v5052_v30 = vpop.f32.mrb[44].mxu0 }
 0x61e   : > { %v5053_v28 = vadd.f32 %v5052_v30, %v12371_v41  ;;  %v5054_v10 = vpop.f32.mrb[45].mxu0 }
 0x620   : > { %v5302_v52 = vmax.f32 %v5053_v28, 0.0 }
 0x621   : > { %v5057_v18 = vpop.f32.mrb[46].mxu0 }
 0x622   : > { %v5058_v56 = vadd.f32 %v5057_v18, %v12399_v24  ;;  %5366 = vrot.lane.b32.xlu0 %v5302_v52, %s9911_s26  ;;  %v5059_v16 = vpop.f32.mrb[47].mxu0 }
 0x624   : > { %v5303_v63 = vmax.f32 %v5058_v56, 0.0 }
 0x626   : > { %5368 = vrot.lane.b32.xlu0 %v5303_v63, %s9911_s26 }
 0x62c   : > { %v5127_v49 = vpop.f32.mrb[44].mxu1 }
 0x62d   : > { %v5128_v50 = vadd.f32 %v5127_v49, %v12371_v41  ;;  %v5129_v11 = vpop.f32.mrb[45].mxu1 }
 0x62f   : > { %v5304_v8 = vmax.f32 %v5128_v50, 0.0  ;;  %v6460_v50 = vld [vmem:[%s13892_s5 + $0xc0] sm:$0xff] }
 0x630   : > { %v5132_v15 = vpop.f32.mrb[46].mxu1 }
 0x631   : > { %v5133_v36 = vadd.f32 %v5132_v15, %v12399_v24  ;;  %5370 = vrot.lane.b32.xlu1 %v5304_v8, %s9911_s26  ;;  %v5134_v9 = vpop.f32.mrb[47].mxu1 }
 0x633   : > { %v5305_v13 = vmax.f32 %v5133_v36, 0.0 }
 0x635   : > { %5372 = vrot.lane.b32.xlu1 %v5305_v13, %s9911_s26 }
 0x63a   : > { %v5359_v53 = vpop.permute.xlu0 %5358 }
 0x63b   : > { %v5418_v39 = vmax.f32 %v5298_v47, %v5359_v53 }
 0x63d   : > { %8815 = vmatprep.mubr.msk.f32.mxu0 %vm5435_vm4, %v5418_v39 }
 0x63e   : > { %v5361_v22 = vpop.permute.xlu0 %5360 }
 0x63f   : > { %v5419_v59 = vmax.f32 %v5299_v5, %v5361_v22 }
 0x641   : > { %8816 = vmatmul.mubr.msk.f32.vlgmr.msra.gmra.mrb[58].mxu0 %vm5435_vm4, %v5419_v59 }
 0x642   : > { %9534 = vmatpush3.bf16.msk.msra.mxu0 %vm12367_vm3, %v12364_v57 }
 0x643   : > { %9543 = vmatprep.subr.msk.bf16.mxu0 %vm12367_vm3, %v12364_v57 }
 0x644   : > { %v5363_v4 = vpop.permute.xlu1 %5362 }
 0x645   : > { %v5420_v0 = vmax.f32 %v5300_v23, %v5363_v4 }
 0x647   : > { %8822 = vmatprep.mubr.msk.f32.mxu1 %vm5435_vm4, %v5420_v0  ;;  %v6472_v0 = vld [vmem:[%s13892_s5 + $0x120] sm:$0xff] }
 0x648   : > { %v5365_v47 = vpop.permute.xlu1 %5364 }
 0x649   : > { %v5421_v25 = vmax.f32 %v5301_v46, %v5365_v47  ;;  %v6485_v47 = vld [vmem:[%s13892_s5 + $0x188] sm:$0xff] }
 0x64b   : > { %8823 = vmatmul.mubr.msk.f32.vlgmr.msra.gmra.mrb[58].mxu1 %vm5435_vm4, %v5421_v25 }
 0x64c   : > { %9540 = vmatpush3.bf16.msk.msra.mxu1 %vm12367_vm3, %v12364_v57 }
 0x64d   : > { %9549 = vmatprep.subr.msk.bf16.mxu1 %vm12367_vm3, %v12364_v57 }
 0x64f   : > { %v5202_v21 = vpop.f32.mrb[48].mxu0 }
 0x650   : > { %v5203_v5 = vadd.f32 %v5202_v21, %v12371_v41  ;;  %v5204_v38 = vpop.f32.mrb[49].mxu0 }
 0x652   : > { %v5306_v20 = vmax.f32 %v5203_v5, 0.0 }
 0x654   : > { %v5207_v14 = vpop.f32.mrb[50].mxu0  ;;  %5374 = vrot.lane.b32.xlu0 %v5306_v20, %s9911_s26 }
 0x655   : > { %v5208_v23 = vadd.f32 %v5207_v14, %v12399_v24  ;;  %v5209_v3 = vpop.f32.mrb[51].mxu0  ;;  %v6484_v14 = vld [vmem:[%s13892_s5 + $0x180] sm:$0xff] }
 0x657   : > { %v5307_v54 = vmax.f32 %v5208_v23, 0.0  ;;  %v6497_v23 = vld [vmem:[%s13892_s5 + $0x1e8] sm:$0xff] }
 0x659   : > { %5376 = vrot.lane.b32.xlu0 %v5307_v54, %s9911_s26 }
 0x65e   : > { %v5277_v33 = vpop.f32.mrb[48].mxu1 }
 0x65f   : > { %v5278_v46 = vadd.f32 %v5277_v33, %v12371_v41  ;;  %v5279_v37 = vpop.f32.mrb[49].mxu1 }
 0x661   : > { %v5308_v1 = vmax.f32 %v5278_v46, 0.0 }
 0x662   : > { %v5282_v32 = vpop.f32.mrb[50].mxu1 }
 0x663   : > { %v12639_v6 = vadd.f32 %v5282_v32, %v12399_v24  ;;  %v5284_v60 = vpop.f32.mrb[51].mxu1  ;;  %5378 = vrot.lane.b32.xlu1 %v5308_v1, %s9911_s26  ;;  %v6496_v32 = vld [vmem:[%s13892_s5 + $0x1e0] sm:$0xff] }
 0x665   : > { %v5309_v27 = vmax.f32 %v12639_v6, 0.0  ;;  %v6509_v6 = vld [vmem:[%s13892_s5 + $0x248] sm:$0xff] }
 0x667   : > { %5380 = vrot.lane.b32.xlu1 %v5309_v27, %s9911_s26  ;;  %s12657_s26 = sand.u32 1, %s9892_s28  }
 0x668   : > { %s9553_s10 = smul.u32 96, %s12657_s26  ;;  %s7905_s20 = scalar_lea.sflag [#allocation5], %s12657_s26 }
 0x66a   : > { %s12680_s23 = scalar_lea.vmem [#allocation4], %s9553_s10 }
 0x66b   : > { %s7931_s12 = sshll.u32 %s12680_s23, 4  ;;  %s13805_s12 = int_to_ptr.vmem [resolvable:$true] %s7931_s12 }
 0x66c   : > { %s9806_s21 = scalar_lea.vmem %s13805_s12, 1536  ;;  %p9813_p0 = scmp.lt.s32.totalorder %s13805_s12, %s9811_s24 }
 0x66d   : > { %p9807_p11 = scmp.ne.s32.totalorder %s13805_s12, %s9806_s21 }
 0x66f   : > { %p9808_p12 = pnand %p9807_p11, %p10008_p5 }
 0x671   : > { %p9809_p13 = pneg %p9808_p12 }
 0x694   : > { %v5367_v7 = vpop.permute.xlu0 %5366 }
 0x695   : > { %v5422_v51 = vmax.f32 %v5302_v52, %v5367_v7 }
 0x697   : > { %8829 = vmatprep.mubr.msk.f32.mxu0 %vm5435_vm4, %v5422_v51 }
 0x698   : > { %v5369_v41 = vpop.permute.xlu0 %5368 }
 0x699   : > { %v5423_v62 = vmax.f32 %v5303_v63, %v5369_v41  ;;  %v6473_v63 = vld [vmem:[%s13892_s5 + $0x128] sm:$0xff]  ;;  %v6508_v41 = vld [vmem:[%s13892_s5 + $0x240] sm:$0xff] }
 0x69b   : > { %8830 = vmatmul.mubr.msk.f32.vlgmr.msra.gmra.mrb[60].mxu0 %vm5435_vm4, %v5423_v62  ;;  %v6521_v62 = vld [vmem:[%s13892_s5 + $0x2a8] sm:$0xff] }
 0x69c   : > { %9546 = vmatpush3.bf16.msk.msra.mxu0 %vm12367_vm3, %v12364_v57 }
 0x6a3   : > { %v5371_v24 = vpop.permute.xlu1 %5370 }
 0x6a4   : > { %v5424_v58 = vmax.f32 %v5304_v8, %v5371_v24 }
 0x6a6   : > { %8836 = vmatprep.mubr.msk.f32.mxu1 %vm5435_vm4, %v5424_v58 }
 0x6a7   : > { %v5373_v55 = vpop.permute.xlu1 %5372 }
 0x6a8   : > { %v5425_v40 = vmax.f32 %v5305_v13, %v5373_v55 }
 0x6aa   : > { %8837 = vmatmul.mubr.msk.f32.vlgmr.msra.gmra.mrb[60].mxu1 %vm5435_vm4, %v5425_v40 }
 0x6ab   : > { %9552 = vmatpush3.bf16.msk.msra.mxu1 %vm12367_vm3, %v12364_v57  ;;  %v6449_v57 = vld [vmem:[%s13892_s5 + $0x68] sm:$0xff] }
 0x6c6   : > { %v5375_v61 = vpop.permute.xlu0 %5374 }
 0x6c7   : > { %v5426_v2 = vmax.f32 %v5306_v20, %v5375_v61  ;;  %v6520_v61 = vld [vmem:[%s13892_s5 + $0x2a0] sm:$0xff] }
 0x6c9   : > { %8843 = vmatprep.mubr.msk.f32.mxu0 %vm5435_vm4, %v5426_v2  ;;  %v6533_v2 = vld [vmem:[%s13892_s5 + $0x308] sm:$0xff] }
 0x6cb   : > { %v5377_v34 = vpop.permute.xlu0 %5376 }
 0x6cc   : > { %v5427_v44 = vmax.f32 %v5307_v54, %v5377_v34 }
 0x6ce   : > { %8844 = vmatmul.mubr.msk.f32.vlgmr.msra.gmra.mrb[62].mxu0 %vm5435_vm4, %v5427_v44 }
 0x6cf   : > { %v8775_v35 = vpop.f32.mrb[52].mxu0 }
 0x6d0   : > { %v8782_v43 = vpop.f32.mrb[52].mxu1  ;;  %v5511_v48 = vpop.f32.mrb[53].mxu0 }
 0x6d1   : > { %v12667_v42 = vmax.f32 %v8775_v35, %v8782_v43  ;;  %v5592_v19 = vpop.f32.mrb[53].mxu1 }
 0x6d2   : > { %v12670_v17 = vmax.f32 %v5511_v48, %v5592_v19 }
 0x6d3   : > { %v6557_v30 = vmul.f32 %v6437_v26, %v12667_v42  ;;  %v6569_v28 = vmul.f32 %v6449_v57, %v12667_v42  ;;  %6425 = vst.msk [vmem:[%s12680_s23 + $0x8] sm:$0xff] %vm6423_vm5, %v12667_v42  ;;  %v6581_v16 = vmul.f32 %v6461_v45, %v12667_v42  ;;  %v6593_v15 = vmul.f32 %v6473_v63, %v12667_v42  ;;  %v6545_v45 = vld [vmem:[%s13892_s5 + $0x368] sm:$0xff] }
 0x6d4   : > { %6424 = vst.msk [vmem:[%s12680_s23] sm:$0xff] %vm6423_vm5, %v12670_v17  ;;  %v6568_v56 = vmul.f32 %v6448_v12, %v12670_v17  ;;  %v6580_v22 = vmul.f32 %v6460_v50, %v12670_v17  ;;  %v6592_v38 = vmul.f32 %v6472_v0, %v12670_v17  ;;  %v6605_v20 = vmul.f32 %v6485_v47, %v12667_v42  ;;  %v6532_v12 = vld [vmem:[%s13892_s5 + $0x300] sm:$0xff]  ;;  %v6463_v47 = vld [vmem:[%s13892_s5 + $0xd8] sm:$0xff] }
 0x6d5   : > { %v5379_v10 = vpop.permute.xlu1 %5378  ;;  %v6679_v52 = vsel %vm6423_vm5, %v6557_v30, 0.0  ;;  %v6715_v18 = vsel %vm6423_vm5, %v6569_v28, 0.0  ;;  %v6751_v39 = vsel %vm6423_vm5, %v6581_v16, 0.0  ;;  %v6787_v5 = vsel %vm6423_vm5, %v6593_v15, 0.0 }
 0x6d6   : > { %v5428_v49 = vmax.f32 %v5308_v1, %v5379_v10  ;;  %6680 = vadd.xlane.f32.xlu1 %v6679_v52  ;;  %6716 = vadd.xlane.f32.xlu0 %v6715_v18  ;;  %v6712_v53 = vsel %vm6423_vm5, %v6568_v56, 0.0  ;;  %v6748_v21 = vsel %vm6423_vm5, %v6580_v22, 0.0  ;;  %v6784_v33 = vsel %vm6423_vm5, %v6592_v38, 0.0  ;;  %v6544_v18 = vld [vmem:[%s13892_s5 + $0x360] sm:$0xff] }
 0x6d7   : > { %v6823_v46 = vsel %vm6423_vm5, %v6605_v20, 0.0  ;;  %v6604_v37 = vmul.f32 %v6484_v14, %v12670_v17  ;;  %v6617_v1 = vmul.f32 %v6497_v23, %v12667_v42  ;;  %v6616_v7 = vmul.f32 %v6496_v32, %v12670_v17  ;;  %v6436_v56 = vld [vmem:[%s13892_s5] sm:$0xff]  ;;  %v6475_v14 = vld [vmem:[%s13892_s5 + $0x138] sm:$0xff]  ;;  %v6486_v23 = vld [vmem:[%s13892_s5 + $0x190] sm:$0xff] }
 0x6d8   : > { %v8789_v11 = vpop.f32.mrb[54].mxu0  ;;  %v8796_v8 = vpop.f32.mrb[54].mxu1  ;;  %8850 = vmatprep.mubr.msk.f32.mxu1 %vm5435_vm4, %v5428_v49  ;;  %v6629_v51 = vmul.f32 %v6509_v6, %v12667_v42  ;;  %v6628_v55 = vmul.f32 %v6508_v41, %v12670_v17  ;;  %v6641_v40 = vmul.f32 %v6521_v62, %v12667_v42  ;;  %v6640_v43 = vmul.f32 %v6520_v61, %v12670_v17 }
 0x6d9   : > { %v12700_v36 = vmax.f32 %v8789_v11, %v8796_v8  ;;  %v5673_v9 = vpop.f32.mrb[55].mxu0  ;;  %v5754_v13 = vpop.f32.mrb[55].mxu1  ;;  %v6820_v60 = vsel %vm6423_vm5, %v6604_v37, 0.0  ;;  %v6856_v24 = vsel %vm6423_vm5, %v6616_v7, 0.0  ;;  %v6653_v19 = vmul.f32 %v6533_v2, %v12667_v42  ;;  %v6450_v11 = vld [vmem:[%s13892_s5 + $0x70] sm:$0xff]  ;;  %v6487_v37 = vld [vmem:[%s13892_s5 + $0x198] sm:$0xff] }
 0x6da   : > { %v12705_v59 = vmax.f32 %v5673_v9, %v5754_v13  ;;  %v5381_v4 = vpop.permute.xlu1 %5380  ;;  %6713 = vadd.xlane.f32.xlu1 %v6712_v53  ;;  %6752 = vadd.xlane.f32.xlu0 %v6751_v39  ;;  %v6895_v58 = vsel %vm6423_vm5, %v6629_v51, 0.0  ;;  %v6892_v57 = vsel %vm6423_vm5, %v6628_v55, 0.0  ;;  %v6931_v48 = vsel %vm6423_vm5, %v6641_v40, 0.0  ;;  %v6462_v53 = vld [vmem:[%s13892_s5 + $0xd0] sm:$0xff]  ;;  %v6499_v7 = vld [vmem:[%s13892_s5 + $0x1f8] sm:$0xff] }
 0x6db   : > { %v5429_v25 = vmax.f32 %v5309_v27, %v5381_v4  ;;  %6427 = vst.msk [vmem:[%s12680_s23 + $0x18] sm:$0xff] %vm6423_vm5, %v12700_v36  ;;  %v6859_v27 = vsel %vm6423_vm5, %v6617_v1, 0.0  ;;  %v6928_v30 = vsel %vm6423_vm5, %v6640_v43, 0.0  ;;  %v6967_v28 = vsel %vm6423_vm5, %v6653_v19, 0.0  ;;  %v6498_v1 = vld [vmem:[%s13892_s5 + $0x1f0] sm:$0xff]  ;;  %v6511_v55 = vld [vmem:[%s13892_s5 + $0x258] sm:$0xff] }
 0x6dc   : > { %6426 = vst.msk [vmem:[%s12680_s23 + $0x10] sm:$0xff] %vm6423_vm5, %v12705_v59  ;;  %v6652_v10 = vmul.f32 %v6532_v12, %v12670_v17  ;;  %v6665_v52 = vmul.f32 %v6545_v45, %v12667_v42  ;;  %v6664_v49 = vmul.f32 %v6544_v18, %v12670_v17  ;;  %v6556_v50 = vmul.f32 %v6436_v56, %v12670_v17  ;;  %v6439_v42 = vld [vmem:[%s13892_s5 + $0x18] sm:$0xff]  ;;  %v6510_v51 = vld [vmem:[%s13892_s5 + $0x250] sm:$0xff] }
 0x6dd   : > { %8851 = vmatmul.mubr.msk.f32.vlgmr.msra.gmra.mrb[62].mxu1 %vm5435_vm4, %v5429_v25  ;;  %v6559_v9 = vmul.f32 %v6439_v42, %v12700_v36  ;;  %v6570_v13 = vmul.f32 %v6450_v11, %v12705_v59  ;;  %v6451_v17 = vld [vmem:[%s13892_s5 + $0x78] sm:$0xff]  ;;  %v6582_v0 = vmul.f32 %v6462_v53, %v12705_v59  ;;  %v6474_v25 = vld [vmem:[%s13892_s5 + $0x130] sm:$0xff]  ;;  %v6583_v38 = vmul.f32 %v6463_v47, %v12700_v36 }
 0x6de   : > { %6749 = vadd.xlane.f32.xlu1 %v6748_v21  ;;  %6788 = vadd.xlane.f32.xlu0 %v6787_v5  ;;  %v6964_v16 = vsel %vm6423_vm5, %v6652_v10, 0.0  ;;  %v7003_v63 = vsel %vm6423_vm5, %v6665_v52, 0.0  ;;  %v7000_v8 = vsel %vm6423_vm5, %v6664_v49, 0.0  ;;  %v6676_v15 = vsel %vm6423_vm5, %v6556_v50, 0.0  ;;  %v6522_v40 = vld [vmem:[%s13892_s5 + $0x2b0] sm:$0xff]  ;;  %v6523_v43 = vld [vmem:[%s13892_s5 + $0x2b8] sm:$0xff] }
 0x6df   : > { %v6685_v39 = vsel %vm6423_vm5, %v6559_v9, 0.0  ;;  %v6718_v22 = vsel %vm6423_vm5, %v6570_v13, 0.0  ;;  %v6571_v4 = vmul.f32 %v6451_v17, %v12700_v36  ;;  %v6754_v5 = vsel %vm6423_vm5, %v6582_v0, 0.0  ;;  %v6535_v10 = vld [vmem:[%s13892_s5 + $0x318] sm:$0xff]  ;;  %v6546_v52 = vld [vmem:[%s13892_s5 + $0x370] sm:$0xff]  ;;  %v6440_v50 = vld [vmem:[%s13892_s5 + $0x20] sm:$0xff] }
 0x6e0   : > { %v8803_v3 = vpop.f32.mrb[56].mxu0  ;;  %v6594_v20 = vmul.f32 %v6474_v25, %v12705_v59  ;;  %v6547_v49 = vld [vmem:[%s13892_s5 + $0x378] sm:$0xff]  ;;  %v6438_v13 = vld [vmem:[%s13892_s5 + $0x10] sm:$0xff]  ;;  %v6452_v17 = vld [vmem:[%s13892_s5 + $0x80] sm:$0xff] }
 0x6e1   : > { %v5835_v54 = vpop.f32.mrb[57].mxu0  ;;  %v6721_v21 = vsel %vm6423_vm5, %v6571_v4, 0.0  ;;  %v6558_v0 = vmul.f32 %v6438_v13, %v12705_v59  ;;  %v6441_v25 = vld [vmem:[%s13892_s5 + $0x28] sm:$0xff] }
 0x6e2   : > { %6785 = vadd.xlane.f32.xlu1 %v6784_v33  ;;  %6824 = vadd.xlane.f32.xlu0 %v6823_v46  ;;  %v6595_v33 = vmul.f32 %v6475_v14, %v12700_v36  ;;  %v6606_v46 = vmul.f32 %v6486_v23, %v12705_v59  ;;  %v6453_v14 = vld [vmem:[%s13892_s5 + $0x88] sm:$0xff]  ;;  %v6476_v23 = vld [vmem:[%s13892_s5 + $0x140] sm:$0xff] }
 0x6e4   : > { %v6793_v32 = vsel %vm6423_vm5, %v6595_v33, 0.0  ;;  %v6826_v6 = vsel %vm6423_vm5, %v6606_v46, 0.0 }
 0x6e6   : > { %6821 = vadd.xlane.f32.xlu1 %v6820_v60  ;;  %6860 = vadd.xlane.f32.xlu0 %v6859_v27  ;;  %v6607_v60 = vmul.f32 %v6487_v37, %v12700_v36  ;;  %v6618_v27 = vmul.f32 %v6498_v1, %v12705_v59  ;;  %v6465_v37 = vld [vmem:[%s13892_s5 + $0xe8] sm:$0xff]  ;;  %v6488_v1 = vld [vmem:[%s13892_s5 + $0x1a0] sm:$0xff] }
 0x6e8   : > { %v6829_v41 = vsel %vm6423_vm5, %v6607_v60, 0.0  ;;  %v6862_v62 = vsel %vm6423_vm5, %v6618_v27, 0.0 }
 0x6ea   : > { %6857 = vadd.xlane.f32.xlu1 %v6856_v24  ;;  %6896 = vadd.xlane.f32.xlu0 %v6895_v58  ;;  %v6619_v24 = vmul.f32 %v6499_v7, %v12700_v36  ;;  %v6630_v58 = vmul.f32 %v6510_v51, %v12705_v59  ;;  %v6477_v7 = vld [vmem:[%s13892_s5 + $0x148] sm:$0xff]  ;;  %v6500_v51 = vld [vmem:[%s13892_s5 + $0x200] sm:$0xff] }
 0x6eb   : > { %v8810_v34 = vpop.f32.mrb[56].mxu1 }
 0x6ec   : > { %v12762_v44 = vmax.f32 %v8803_v3, %v8810_v34  ;;  %v5916_v35 = vpop.f32.mrb[57].mxu1  ;;  %v6757_v3 = vsel %vm6423_vm5, %v6583_v38, 0.0  ;;  %v6865_v61 = vsel %vm6423_vm5, %v6619_v24, 0.0  ;;  %v6898_v2 = vsel %vm6423_vm5, %v6630_v58, 0.0 }
 0x6ed   : > { %v12765_v26 = vmax.f32 %v5835_v54, %v5916_v35  ;;  %v6790_v54 = vsel %vm6423_vm5, %v6594_v20, 0.0  ;;  %v6631_v34 = vmul.f32 %v6511_v55, %v12700_v36  ;;  %v6642_v35 = vmul.f32 %v6522_v40, %v12705_v59  ;;  %v6489_v55 = vld [vmem:[%s13892_s5 + $0x1a8] sm:$0xff]  ;;  %v6512_v40 = vld [vmem:[%s13892_s5 + $0x260] sm:$0xff] }
 0x6ee   : > { %6893 = vadd.xlane.f32.xlu1 %v6892_v57  ;;  %6932 = vadd.xlane.f32.xlu0 %v6931_v48  ;;  %6429 = vst.msk [vmem:[%s12680_s23 + $0x28] sm:$0xff] %vm6423_vm5, %v12762_v44  ;;  %v6534_v57 = vld [vmem:[%s13892_s5 + $0x310] sm:$0xff]  ;;  %v6561_v38 = vmul.f32 %v6441_v25, %v12762_v44  ;;  %v6573_v33 = vmul.f32 %v6453_v14, %v12762_v44  ;;  %v6455_v14 = vld [vmem:[%s13892_s5 + $0x98] sm:$0xff] }
 0x6ef   : > { %6428 = vst.msk [vmem:[%s12680_s23 + $0x20] sm:$0xff] %vm6423_vm5, %v12765_v26  ;;  %v6901_v19 = vsel %vm6423_vm5, %v6631_v34, 0.0  ;;  %v6934_v12 = vsel %vm6423_vm5, %v6642_v35, 0.0  ;;  %v6572_v47 = vmul.f32 %v6452_v17, %v12765_v26  ;;  %v6596_v46 = vmul.f32 %v6476_v23, %v12765_v26  ;;  %v6478_v23 = vld [vmem:[%s13892_s5 + $0x150] sm:$0xff] }
 0x6f0   : > { %v6585_v60 = vmul.f32 %v6465_v37, %v12762_v44  ;;  %v6608_v27 = vmul.f32 %v6488_v1, %v12765_v26  ;;  %v6597_v24 = vmul.f32 %v6477_v7, %v12762_v44  ;;  %v6620_v58 = vmul.f32 %v6500_v51, %v12765_v26  ;;  %v6467_v37 = vld [vmem:[%s13892_s5 + $0xf8] sm:$0xff]  ;;  %v6490_v1 = vld [vmem:[%s13892_s5 + $0x1b0] sm:$0xff] }
 0x6f1   : > { %v6609_v34 = vmul.f32 %v6489_v55, %v12762_v44  ;;  %v6632_v35 = vmul.f32 %v6512_v40, %v12765_v26  ;;  %v6479_v7 = vld [vmem:[%s13892_s5 + $0x158] sm:$0xff]  ;;  %v6502_v51 = vld [vmem:[%s13892_s5 + $0x210] sm:$0xff] }
 0x6f2   : > { %6929 = vadd.xlane.f32.xlu1 %v6928_v30  ;;  %6968 = vadd.xlane.f32.xlu0 %v6967_v28  ;;  %v6643_v30 = vmul.f32 %v6523_v43, %v12700_v36  ;;  %v6654_v28 = vmul.f32 %v6534_v57, %v12705_v59  ;;  %v6501_v43 = vld [vmem:[%s13892_s5 + $0x208] sm:$0xff]  ;;  %v6524_v57 = vld [vmem:[%s13892_s5 + $0x2c0] sm:$0xff]  ;;  %v6491_v55 = vld [vmem:[%s13892_s5 + $0x1b8] sm:$0xff] }
 0x6f3   : > { %v6514_v40 = vld [vmem:[%s13892_s5 + $0x270] sm:$0xff] }
 0x6f4   : > { %v6937_v18 = vsel %vm6423_vm5, %v6643_v30, 0.0  ;;  %v6970_v56 = vsel %vm6423_vm5, %v6654_v28, 0.0  ;;  %v6513_v30 = vld [vmem:[%s13892_s5 + $0x268] sm:$0xff]  ;;  %v6536_v28 = vld [vmem:[%s13892_s5 + $0x320] sm:$0xff] }
 0x6f6   : > { %6965 = vadd.xlane.f32.xlu1 %v6964_v16  ;;  %7004 = vadd.xlane.f32.xlu0 %v7003_v63  ;;  %v6655_v16 = vmul.f32 %v6535_v10, %v12700_v36  ;;  %v6666_v63 = vmul.f32 %v6546_v52, %v12705_v59  ;;  %v6682_v59 = vsel %vm6423_vm5, %v6558_v0, 0.0 }
 0x6f8   : > { %v6973_v42 = vsel %vm6423_vm5, %v6655_v16, 0.0  ;;  %v7006_v11 = vsel %vm6423_vm5, %v6666_v63, 0.0  ;;  %v6525_v16 = vld [vmem:[%s13892_s5 + $0x2c8] sm:$0xff]  ;;  %v6548_v63 = vld [vmem:[%s13892_s5 + $0x380] sm:$0xff] }
 0x6fa   : > { %7001 = vadd.xlane.f32.xlu1 %v7000_v8  ;;  %6677 = vadd.xlane.f32.xlu0 %v6676_v15  ;;  %v6667_v8 = vmul.f32 %v6547_v49, %v12700_v36  ;;  %v6560_v15 = vmul.f32 %v6440_v50, %v12765_v26 }
 0x6fc   : > { %v7009_v36 = vsel %vm6423_vm5, %v6667_v8, 0.0  ;;  %v6688_v4 = vsel %vm6423_vm5, %v6560_v15, 0.0  ;;  %v6537_v8 = vld [vmem:[%s13892_s5 + $0x328] sm:$0xff]  ;;  %v6442_v15 = vld [vmem:[%s13892_s5 + $0x30] sm:$0xff] }
 0x6fd   : > { %v6657_v17 = vmul.f32 %v6537_v8, %v12762_v44 }
 0x6fe   : > { %6686 = vadd.xlane.f32.xlu0 %v6685_v39  ;;  %6719 = vadd.xlane.f32.xlu1 %v6718_v22 }
 0x702   : > { %6722 = vadd.xlane.f32.xlu0 %v6721_v21  ;;  %6755 = vadd.xlane.f32.xlu1 %v6754_v5  ;;  %v6464_v21 = vld [vmem:[%s13892_s5 + $0xe0] sm:$0xff]  ;;  %v6724_v5 = vsel %vm6423_vm5, %v6572_v47, 0.0 }
 0x703   : > { %v6584_v20 = vmul.f32 %v6464_v21, %v12765_v26  ;;  %v6443_v21 = vld [vmem:[%s13892_s5 + $0x38] sm:$0xff] }
 0x706   : > { %6758 = vadd.xlane.f32.xlu0 %v6757_v3  ;;  %6791 = vadd.xlane.f32.xlu1 %v6790_v54  ;;  %v6691_v3 = vsel %vm6423_vm5, %v6561_v38, 0.0  ;;  %v6760_v54 = vsel %vm6423_vm5, %v6584_v20, 0.0 }
 0x70a   : > { %6794 = vadd.xlane.f32.xlu0 %v6793_v32  ;;  %6827 = vadd.xlane.f32.xlu1 %v6826_v6  ;;  %v6727_v32 = vsel %vm6423_vm5, %v6573_v33, 0.0  ;;  %v6796_v6 = vsel %vm6423_vm5, %v6596_v46, 0.0 }
 0x70e   : > { %6830 = vadd.xlane.f32.xlu0 %v6829_v41  ;;  %6863 = vadd.xlane.f32.xlu1 %v6862_v62  ;;  %v6763_v41 = vsel %vm6423_vm5, %v6585_v60, 0.0  ;;  %v6832_v62 = vsel %vm6423_vm5, %v6608_v27, 0.0 }
 0x712   : > { %6866 = vadd.xlane.f32.xlu0 %v6865_v61  ;;  %6899 = vadd.xlane.f32.xlu1 %v6898_v2  ;;  %v6799_v61 = vsel %vm6423_vm5, %v6597_v24, 0.0  ;;  %v6868_v2 = vsel %vm6423_vm5, %v6620_v58, 0.0 }
 0x714   : > { %v8817_v48 = vpop.f32.mrb[58].mxu0 }
 0x715   : > { %v5997_v45 = vpop.f32.mrb[59].mxu0 }
 0x716   : > { %6902 = vadd.xlane.f32.xlu0 %v6901_v19  ;;  %6935 = vadd.xlane.f32.xlu1 %v6934_v12  ;;  %v6904_v19 = vsel %vm6423_vm5, %v6632_v35, 0.0  ;;  %v6621_v12 = vmul.f32 %v6501_v43, %v12762_v44  ;;  %v6503_v43 = vld [vmem:[%s13892_s5 + $0x218] sm:$0xff] }
 0x718   : > { %v6871_v10 = vsel %vm6423_vm5, %v6621_v12, 0.0 }
 0x71a   : > { %6938 = vadd.xlane.f32.xlu0 %v6937_v18  ;;  %6971 = vadd.xlane.f32.xlu1 %v6970_v56  ;;  %v6633_v18 = vmul.f32 %v6513_v30, %v12762_v44  ;;  %v6656_v56 = vmul.f32 %v6536_v28, %v12765_v26  ;;  %v6515_v30 = vld [vmem:[%s13892_s5 + $0x278] sm:$0xff]  ;;  %v6538_v28 = vld [vmem:[%s13892_s5 + $0x330] sm:$0xff] }
 0x71c   : > { %v6907_v49 = vsel %vm6423_vm5, %v6633_v18, 0.0  ;;  %v6976_v50 = vsel %vm6423_vm5, %v6656_v56, 0.0 }
 0x71e   : > { %v8824_v9 = vpop.f32.mrb[58].mxu1  ;;  %6974 = vadd.xlane.f32.xlu0 %v6973_v42  ;;  %7007 = vadd.xlane.f32.xlu1 %v7006_v11  ;;  %v6645_v42 = vmul.f32 %v6525_v16, %v12762_v44  ;;  %v6668_v11 = vmul.f32 %v6548_v63, %v12765_v26 }
 0x71f   : > { %v12902_v53 = vmax.f32 %v8817_v48, %v8824_v9  ;;  %v6078_v39 = vpop.f32.mrb[59].mxu1  ;;  %v6835_v48 = vsel %vm6423_vm5, %v6609_v34, 0.0 }
 0x720   : > { %v12904_v22 = vmax.f32 %v5997_v45, %v6078_v39  ;;  %v6644_v45 = vmul.f32 %v6524_v57, %v12765_v26  ;;  %v6943_v9 = vsel %vm6423_vm5, %v6645_v42, 0.0  ;;  %v7012_v13 = vsel %vm6423_vm5, %v6668_v11, 0.0  ;;  %v6549_v26 = vld [vmem:[%s13892_s5 + $0x388] sm:$0xff]  ;;  %v6526_v57 = vld [vmem:[%s13892_s5 + $0x2d0] sm:$0xff] }
 0x721   : > { %6431 = vst.msk [vmem:[%s12680_s23 + $0x38] sm:$0xff] %vm6423_vm5, %v12902_v53  ;;  %v6669_v47 = vmul.f32 %v6549_v26, %v12762_v44  ;;  %v6563_v20 = vmul.f32 %v6443_v21, %v12902_v53  ;;  %v6575_v33 = vmul.f32 %v6455_v14, %v12902_v53  ;;  %v6587_v60 = vmul.f32 %v6467_v37, %v12902_v53 }
 0x722   : > { %7010 = vadd.xlane.f32.xlu0 %v7009_v36  ;;  %6689 = vadd.xlane.f32.xlu1 %v6688_v4  ;;  %6430 = vst.msk [vmem:[%s12680_s23 + $0x30] sm:$0xff] %vm6423_vm5, %v12904_v22  ;;  %v6940_v52 = vsel %vm6423_vm5, %v6644_v45, 0.0  ;;  %v6562_v39 = vmul.f32 %v6442_v15, %v12904_v22  ;;  %v6454_v36 = vld [vmem:[%s13892_s5 + $0x90] sm:$0xff]  ;;  %v6979_v4 = vsel %vm6423_vm5, %v6657_v17, 0.0  ;;  %v6598_v46 = vmul.f32 %v6478_v23, %v12904_v22  ;;  %v6539_v17 = vld [vmem:[%s13892_s5 + $0x338] sm:$0xff] }
 0x723   : > { %v6574_v25 = vmul.f32 %v6454_v36, %v12904_v22  ;;  %v6610_v27 = vmul.f32 %v6490_v1, %v12904_v22  ;;  %v6599_v24 = vmul.f32 %v6479_v7, %v12902_v53  ;;  %v6622_v58 = vmul.f32 %v6502_v51, %v12904_v22  ;;  %v6457_v7 = vld [vmem:[%s13892_s5 + $0xa8] sm:$0xff] }
 0x724   : > { %v6694_v0 = vsel %vm6423_vm5, %v6562_v39, 0.0  ;;  %v6611_v34 = vmul.f32 %v6491_v55, %v12902_v53  ;;  %v6634_v35 = vmul.f32 %v6514_v40, %v12904_v22  ;;  %v6623_v12 = vmul.f32 %v6503_v43, %v12902_v53 }
 0x725   : > { %v6730_v38 = vsel %vm6423_vm5, %v6574_v25, 0.0  ;;  %v6646_v45 = vmul.f32 %v6526_v57, %v12904_v22  ;;  %v6635_v16 = vmul.f32 %v6515_v30, %v12902_v53  ;;  %v6658_v63 = vmul.f32 %v6538_v28, %v12904_v22  ;;  %v6481_v30 = vld [vmem:[%s13892_s5 + $0x168] sm:$0xff]  ;;  %v6480_v28 = vld [vmem:[%s13892_s5 + $0x160] sm:$0xff] }
 0x726   : > { %6683 = vadd.xlane.f32.xlu0 %v6682_v59  ;;  %6725 = vadd.xlane.f32.xlu1 %v6724_v5  ;;  %v6466_v59 = vld [vmem:[%s13892_s5 + $0xf0] sm:$0xff]  ;;  %v7015_v5 = vsel %vm6423_vm5, %v6669_v47, 0.0  ;;  %v6877_v18 = vsel %vm6423_vm5, %v6623_v12, 0.0 }
 0x727   : > { %v6586_v44 = vmul.f32 %v6466_v59, %v12904_v22  ;;  %v6946_v56 = vsel %vm6423_vm5, %v6646_v45, 0.0  ;;  %v6913_v8 = vsel %vm6423_vm5, %v6635_v16, 0.0  ;;  %v6982_v15 = vsel %vm6423_vm5, %v6658_v63, 0.0 }
 0x72a   : > { %6692 = vadd.xlane.f32.xlu0 %v6691_v3  ;;  %6761 = vadd.xlane.f32.xlu1 %v6760_v54  ;;  %v6697_v3 = vsel %vm6423_vm5, %v6563_v20, 0.0  ;;  %v6766_v54 = vsel %vm6423_vm5, %v6586_v44, 0.0 }
 0x72e   : > { %6728 = vadd.xlane.f32.xlu0 %v6727_v32  ;;  %6797 = vadd.xlane.f32.xlu1 %v6796_v6  ;;  %v6733_v32 = vsel %vm6423_vm5, %v6575_v33, 0.0  ;;  %v6802_v6 = vsel %vm6423_vm5, %v6598_v46, 0.0  ;;  %v6445_v46 = vld [vmem:[%s13892_s5 + $0x48] sm:$0xff] }
 0x732   : > { %6764 = vadd.xlane.f32.xlu0 %v6763_v41  ;;  %6833 = vadd.xlane.f32.xlu1 %v6832_v62  ;;  %v6769_v41 = vsel %vm6423_vm5, %v6587_v60, 0.0  ;;  %v6838_v62 = vsel %vm6423_vm5, %v6610_v27, 0.0 }
 0x736   : > { %6800 = vadd.xlane.f32.xlu0 %v6799_v61  ;;  %6869 = vadd.xlane.f32.xlu1 %v6868_v2  ;;  %v6805_v61 = vsel %vm6423_vm5, %v6599_v24, 0.0  ;;  %v6874_v2 = vsel %vm6423_vm5, %v6622_v58, 0.0 }
 0x73a   : > { %6836 = vadd.xlane.f32.xlu0 %v6835_v48  ;;  %6905 = vadd.xlane.f32.xlu1 %v6904_v19  ;;  %v6841_v48 = vsel %vm6423_vm5, %v6611_v34, 0.0  ;;  %v6910_v19 = vsel %vm6423_vm5, %v6634_v35, 0.0  ;;  %v6469_v34 = vld [vmem:[%s13892_s5 + $0x108] sm:$0xff]  ;;  %v6468_v35 = vld [vmem:[%s13892_s5 + $0x100] sm:$0xff] }
 0x73e   : > { %6872 = vadd.xlane.f32.xlu0 %v6871_v10  ;;  %6941 = vadd.xlane.f32.xlu1 %v6940_v52 }
 0x742   : > { %6908 = vadd.xlane.f32.xlu0 %v6907_v49  ;;  %6977 = vadd.xlane.f32.xlu1 %v6976_v50  ;;  %v6527_v49 = vld [vmem:[%s13892_s5 + $0x2d8] sm:$0xff]  ;;  %v6550_v50 = vld [vmem:[%s13892_s5 + $0x390] sm:$0xff] }
 0x746   : > { %6944 = vadd.xlane.f32.xlu0 %v6943_v9  ;;  %7013 = vadd.xlane.f32.xlu1 %v7012_v13  ;;  %v6647_v9 = vmul.f32 %v6527_v49, %v12902_v53  ;;  %v6670_v13 = vmul.f32 %v6550_v50, %v12904_v22  ;;  %v6551_v22 = vld [vmem:[%s13892_s5 + $0x398] sm:$0xff] }
 0x747   : > { %v6671_v59 = vmul.f32 %v6551_v22, %v12902_v53  ;;  %v6505_v22 = vld [vmem:[%s13892_s5 + $0x228] sm:$0xff] }
 0x748   : > { %v6949_v36 = vsel %vm6423_vm5, %v6647_v9, 0.0 }
 0x749   : > { %v7021_v14 = vsel %vm6423_vm5, %v6671_v59, 0.0 }
 0x74a   : > { %6980 = vadd.xlane.f32.xlu0 %v6979_v4  ;;  %6695 = vadd.xlane.f32.xlu1 %v6694_v0  ;;  %v7018_v4 = vsel %vm6423_vm5, %v6670_v13, 0.0  ;;  %v6659_v0 = vmul.f32 %v6539_v17, %v12902_v53 }
 0x74c   : > { %v6985_v21 = vsel %vm6423_vm5, %v6659_v0, 0.0 }
 0x74e   : > { %7016 = vadd.xlane.f32.xlu0 %v7015_v5  ;;  %6731 = vadd.xlane.f32.xlu1 %v6730_v38 }
 0x752   : > { %6698 = vadd.xlane.f32.xlu0 %v6697_v3  ;;  %6767 = vadd.xlane.f32.xlu1 %v6766_v54 }
 0x756   : > { %6734 = vadd.xlane.f32.xlu0 %v6733_v32  ;;  %6803 = vadd.xlane.f32.xlu1 %v6802_v6  ;;  %v6444_v32 = vld [vmem:[%s13892_s5 + $0x40] sm:$0xff] }
 0x75a   : > { %6770 = vadd.xlane.f32.xlu0 %v6769_v41  ;;  %6839 = vadd.xlane.f32.xlu1 %v6838_v62  ;;  %v6456_v41 = vld [vmem:[%s13892_s5 + $0xa0] sm:$0xff] }
 0x75e   : > { %6806 = vadd.xlane.f32.xlu0 %v6805_v61  ;;  %6875 = vadd.xlane.f32.xlu1 %v6874_v2 }
 0x762   : > { %6842 = vadd.xlane.f32.xlu0 %v6841_v48  ;;  %6911 = vadd.xlane.f32.xlu1 %v6910_v19 }
 0x763   : > { %v13082_v10 = vpop.xlane.xlu1 %6680  ;;  %v13084_v52 = vpop.xlane.xlu0 %6716 }
 0x766   : > { %6878 = vadd.xlane.f32.xlu0 %v6877_v18  ;;  %6947 = vadd.xlane.f32.xlu1 %v6946_v56 }
 0x767   : > { %v13096_v42 = vpop.xlane.xlu1 %6713  ;;  %v13098_v11 = vpop.xlane.xlu0 %6752 }
 0x76a   : > { %6914 = vadd.xlane.f32.xlu0 %v6913_v8  ;;  %6983 = vadd.xlane.f32.xlu1 %v6982_v15  ;;  %v6493_v8 = vld [vmem:[%s13892_s5 + $0x1c8] sm:$0xff]  ;;  %v6492_v15 = vld [vmem:[%s13892_s5 + $0x1c0] sm:$0xff] }
 0x76b   : > { %v13107_v39 = vpop.xlane.xlu1 %6749  ;;  %v13109_v26 = vpop.xlane.xlu0 %6788 }
 0x76e   : > { %6950 = vadd.xlane.f32.xlu0 %v6949_v36  ;;  %7019 = vadd.xlane.f32.xlu1 %v7018_v4  ;;  %v8831_v5 = vpop.f32.mrb[60].mxu0 }
 0x76f   : > { %v13117_v47 = vpop.xlane.xlu1 %6785  ;;  %v13119_v25 = vpop.xlane.xlu0 %6824 }
 0x770   : > { %v6159_v44 = vpop.f32.mrb[61].mxu0 }
 0x772   : > { %6986 = vadd.xlane.f32.xlu0 %v6985_v21  ;;  %v6504_v21 = vld [vmem:[%s13892_s5 + $0x220] sm:$0xff] }
 0x773   : > { %v13123_v38 = vpop.xlane.xlu1 %6821  ;;  %v13125_v20 = vpop.xlane.xlu0 %6860 }
 0x776   : > { %7022 = vadd.xlane.f32.xlu0 %v7021_v14 }
 0x777   : > { %v13128_v23 = vpop.xlane.xlu1 %6857  ;;  %v13130_v3 = vpop.xlane.xlu0 %6896 }
 0x77b   : > { %v13132_v54 = vpop.xlane.xlu1 %6893  ;;  %v13134_v33 = vpop.xlane.xlu0 %6932 }
 0x77d   : > { %v8838_v53 = vpop.f32.mrb[60].mxu1 }
 0x77e   : > { %v13139_v37 = vmax.f32 %v8831_v5, %v8838_v53  ;;  %v6240_v1 = vpop.f32.mrb[61].mxu1 }
 0x77f   : > { %v13144_v6 = vmax.f32 %v6159_v44, %v6240_v1  ;;  %v13146_v60 = vpop.xlane.xlu1 %6929  ;;  %v13148_v27 = vpop.xlane.xlu0 %6968  ;;  %v6517_v1 = vld [vmem:[%s13892_s5 + $0x288] sm:$0xff] }
 0x780   : > { %v6565_v51 = vmul.f32 %v6445_v46, %v13139_v37  ;;  %6433 = vst.msk [vmem:[%s12680_s23 + $0x48] sm:$0xff] %vm6423_vm5, %v13139_v37  ;;  %v6577_v58 = vmul.f32 %v6457_v7, %v13139_v37  ;;  %v6589_v57 = vmul.f32 %v6469_v34, %v13139_v37  ;;  %v6601_v56 = vmul.f32 %v6481_v30, %v13139_v37  ;;  %v6541_v30 = vld [vmem:[%s13892_s5 + $0x348] sm:$0xff] }
 0x781   : > { %v6564_v62 = vmul.f32 %v6444_v32, %v13144_v6  ;;  %6432 = vst.msk [vmem:[%s12680_s23 + $0x40] sm:$0xff] %vm6423_vm5, %v13144_v6  ;;  %v6576_v2 = vmul.f32 %v6456_v41, %v13144_v6  ;;  %v6588_v45 = vmul.f32 %v6468_v35, %v13144_v6  ;;  %v6600_v50 = vmul.f32 %v6480_v28, %v13144_v6  ;;  %v6516_v32 = vld [vmem:[%s13892_s5 + $0x280] sm:$0xff] }
 0x782   : > { %v6703_v24 = vsel %vm6423_vm5, %v6565_v51, 0.0  ;;  %v6739_v43 = vsel %vm6423_vm5, %v6577_v58, 0.0  ;;  %v6775_v18 = vsel %vm6423_vm5, %v6589_v57, 0.0  ;;  %v6811_v9 = vsel %vm6423_vm5, %v6601_v56, 0.0  ;;  %v6540_v28 = vld [vmem:[%s13892_s5 + $0x340] sm:$0xff] }
 0x783   : > { %v13166_v55 = vpop.xlane.xlu1 %6965  ;;  %v13168_v40 = vpop.xlane.xlu0 %7004  ;;  %6704 = vadd.xlane.f32.xlu0 %v6703_v24  ;;  %v6700_v61 = vsel %vm6423_vm5, %v6564_v62, 0.0  ;;  %v6736_v12 = vsel %vm6423_vm5, %v6576_v2, 0.0  ;;  %v6772_v49 = vsel %vm6423_vm5, %v6588_v45, 0.0  ;;  %v6613_v13 = vmul.f32 %v6493_v8, %v13139_v37  ;;  %v6528_v2 = vld [vmem:[%s13892_s5 + $0x2e0] sm:$0xff] }
 0x784   : > { %6701 = vadd.xlane.f32.xlu1 %v6700_v61  ;;  %v6808_v4 = vsel %vm6423_vm5, %v6600_v50, 0.0  ;;  %v6612_v0 = vmul.f32 %v6492_v15, %v13144_v6  ;;  %v6625_v5 = vmul.f32 %v6505_v22, %v13139_v37  ;;  %v6624_v46 = vmul.f32 %v6504_v21, %v13144_v6  ;;  %v6529_v61 = vld [vmem:[%s13892_s5 + $0x2e8] sm:$0xff] }
 0x785   : > { %v6847_v59 = vsel %vm6423_vm5, %v6613_v13, 0.0  ;;  %v6637_v51 = vmul.f32 %v6517_v1, %v13139_v37  ;;  %v6636_v58 = vmul.f32 %v6516_v32, %v13144_v6  ;;  %v6649_v35 = vmul.f32 %v6529_v61, %v13139_v37  ;;  %v6552_v13 = vld [vmem:[%s13892_s5 + $0x3a0] sm:$0xff] }
 0x786   : > { %v6844_v53 = vsel %vm6423_vm5, %v6612_v0, 0.0  ;;  %v6883_v7 = vsel %vm6423_vm5, %v6625_v5, 0.0  ;;  %v6880_v24 = vsel %vm6423_vm5, %v6624_v46, 0.0  ;;  %v6648_v45 = vmul.f32 %v6528_v2, %v13144_v6 }
 0x787   : > { %v13180_v48 = vpop.xlane.xlu1 %7001  ;;  %v13182_v19 = vpop.xlane.xlu0 %6677  ;;  %6740 = vadd.xlane.f32.xlu0 %v6739_v43  ;;  %v6919_v34 = vsel %vm6423_vm5, %v6637_v51, 0.0  ;;  %v6661_v56 = vmul.f32 %v6541_v30, %v13139_v37  ;;  %v6660_v15 = vmul.f32 %v6540_v28, %v13144_v6  ;;  %v6672_v5 = vmul.f32 %v6552_v13, %v13144_v6  ;;  %v6458_v13 = vld [vmem:[%s13892_s5 + $0xb0] sm:$0xff] }
 0x788   : > { %6737 = vadd.xlane.f32.xlu1 %v6736_v12  ;;  %v6916_v12 = vsel %vm6423_vm5, %v6636_v58, 0.0  ;;  %v6952_v8 = vsel %vm6423_vm5, %v6648_v45, 0.0  ;;  %v7160_v58 = vadd.s32 4294967288, %v10371_v31  ;;  %v6446_v45 = vld [vmem:[%s13892_s5 + $0x50] sm:$0xff]  ;;  %v13307_v30 = vsub.s32 %v10371_v31, %v10369_v29 }
 0x78b   : > { %v13194_v16 = vpop.xlane.xlu1 %6719  ;;  %v13196_v63 = vpop.xlane.xlu0 %6686  ;;  %6776 = vadd.xlane.f32.xlu0 %v6775_v18  ;;  %v6955_v18 = vsel %vm6423_vm5, %v6649_v35, 0.0 }
 0x78c   : > { %6773 = vadd.xlane.f32.xlu1 %v6772_v49 }
 0x78f   : > { %v13208_v17 = vpop.xlane.xlu1 %6755  ;;  %v13210_v36 = vpop.xlane.xlu0 %6722  ;;  %6812 = vadd.xlane.f32.xlu0 %v6811_v9  ;;  %v6553_v9 = vld [vmem:[%s13892_s5 + $0x3a8] sm:$0xff] }
 0x790   : > { %6809 = vadd.xlane.f32.xlu1 %v6808_v4  ;;  %v6991_v4 = vsel %vm6423_vm5, %v6661_v56, 0.0  ;;  %v6673_v0 = vmul.f32 %v6553_v9, %v13139_v37  ;;  %v7024_v37 = vsel %vm6423_vm5, %v6672_v5, 0.0  ;;  %v13315_v56 = vsub.s32 %v7160_v58, %v10369_v29 }
 0x791   : > { %v7159_v29 = vrot.slane %v13182_v19, %v13307_v30 }
 0x792   : > { %v7027_v1 = vsel %vm6423_vm5, %v6673_v0, 0.0  ;;  %v7174_v0 = vrot.slane %v13196_v63, %v13315_v56  ;;  %v7164_v19 = vrot.slane %v13082_v10, %v13315_v56  ;;  %v7228_v63 = vrot.slane %v13210_v36, %v13315_v56 }
 0x793   : > { %v13222_v44 = vpop.xlane.xlu1 %6791  ;;  %v13224_v14 = vpop.xlane.xlu0 %6758  ;;  %6848 = vadd.xlane.f32.xlu0 %v6847_v59  ;;  %v6988_v59 = vsel %vm6423_vm5, %v6660_v15, 0.0 }
 0x794   : > { %6845 = vadd.xlane.f32.xlu1 %v6844_v53 }
 0x797   : > { %v13236_v41 = vpop.xlane.xlu1 %6827  ;;  %v13238_v62 = vpop.xlane.xlu0 %6794  ;;  %6884 = vadd.xlane.f32.xlu0 %v6883_v7 }
 0x798   : > { %6881 = vadd.xlane.f32.xlu1 %v6880_v24 }
 0x79b   : > { %v13250_v43 = vpop.xlane.xlu1 %6863  ;;  %v13252_v57 = vpop.xlane.xlu0 %6830  ;;  %6920 = vadd.xlane.f32.xlu0 %v6919_v34  ;;  %v6447_v34 = vld [vmem:[%s13892_s5 + $0x58] sm:$0xff] }
 0x79c   : > { %6917 = vadd.xlane.f32.xlu1 %v6916_v12 }
 0x79f   : > { %v13264_v49 = vpop.xlane.xlu1 %6899  ;;  %v13266_v50 = vpop.xlane.xlu0 %6866  ;;  %6956 = vadd.xlane.f32.xlu0 %v6955_v18  ;;  %v6459_v18 = vld [vmem:[%s13892_s5 + $0xb8] sm:$0xff] }
 0x7a0   : > { %6953 = vadd.xlane.f32.xlu1 %v6952_v8 }
 0x7a1   : > { %v8845_v53 = vpop.f32.mrb[62].mxu0 }
 0x7a2   : > { %v6321_v46 = vpop.f32.mrb[63].mxu0 }
 0x7a3   : > { %v13278_v22 = vpop.xlane.xlu1 %6935  ;;  %v13280_v21 = vpop.xlane.xlu0 %6902  ;;  %6992 = vadd.xlane.f32.xlu0 %v6991_v4 }
 0x7a4   : > { %6989 = vadd.xlane.f32.xlu1 %v6988_v59 }
 0x7a7   : > { %v13285_v32 = vpop.xlane.xlu1 %6971  ;;  %v13287_v7 = vpop.xlane.xlu0 %6938  ;;  %7028 = vadd.xlane.f32.xlu0 %v7027_v1  ;;  %v6471_v1 = vld [vmem:[%s13892_s5 + $0x118] sm:$0xff] }
 0x7a8   : > { %7025 = vadd.xlane.f32.xlu1 %v7024_v37 }
 0x7ab   : > { %v13290_v51 = vpop.xlane.xlu1 %7007  ;;  %v13292_v24 = vpop.xlane.xlu0 %6974 }
 0x7af   : > { %v6690_v6 = vpop.xlane.xlu1 %6689  ;;  %v13295_v61 = vpop.xlane.xlu0 %7010 }
 0x7b0   : > { %v8852_v2 = vpop.f32.mrb[62].mxu1  ;;  %v7179_v10 = vrot.slane %v6690_v6, %v13307_v30 }
 0x7b1   : > { %v13300_v35 = vmax.f32 %v8845_v53, %v8852_v2  ;;  %v6402_v12 = vpop.f32.mrb[63].mxu1 }
 0x7b2   : > { %v13309_v28 = vmax.f32 %v6321_v46, %v6402_v12  ;;  %v7219_v12 = vrot.slane %v13084_v52, %v13315_v56 }
 0x7b3   : > { %v6726_v8 = vpop.xlane.xlu1 %6725  ;;  %v6684_v15 = vpop.xlane.xlu0 %6683  ;;  %v6567_v9 = vmul.f32 %v6447_v34, %v13300_v35  ;;  %6435 = vst.msk [vmem:[%s12680_s23 + $0x58] sm:$0xff] %vm6423_vm5, %v13300_v35  ;;  %v6579_v5 = vmul.f32 %v6459_v18, %v13300_v35  ;;  %v6470_v34 = vld [vmem:[%s13892_s5 + $0x110] sm:$0xff]  ;;  %v7166_v18 = vsel %vm7165_vm6, %v7164_v19, %v7159_v29 }
 0x7b4   : > { %v7170_v31 = vrot.slane %v6684_v15, %v13307_v30  ;;  %v6566_v4 = vmul.f32 %v6446_v45, %v13309_v28  ;;  %6434 = vst.msk [vmem:[%s12680_s23 + $0x50] sm:$0xff] %vm6423_vm5, %v13309_v28  ;;  %v6578_v46 = vmul.f32 %v6458_v13, %v13309_v28  ;;  %v7215_v45 = vrot.slane %v13096_v42, %v13307_v30  ;;  %s9812_s23 = scalar_lea.vmem %s9811_s24, 3072 }
 0x7b5   : > { %v6709_v59 = vsel %vm6423_vm5, %v6567_v9, 0.0  ;;  %v7224_v15 = vrot.slane %v13194_v16, %v13307_v30  ;;  %v6745_v9 = vsel %vm6423_vm5, %v6579_v5, 0.0  ;;  %v6591_v13 = vmul.f32 %v6471_v1, %v13300_v35  ;;  %p9814_p1 = scmp.lt.s32.totalorder %s9812_s23, %s9806_s21 }
 0x7b6   : > { %6710 = vadd.xlane.f32.xlu0 %v6709_v59  ;;  %v6706_v53 = vsel %vm6423_vm5, %v6566_v4, 0.0  ;;  %v7175_v37 = vsel %vm7165_vm6, %v7174_v0, %v7170_v31  ;;  %v6742_v42 = vsel %vm6423_vm5, %v6578_v46, 0.0  ;;  %v6590_v6 = vmul.f32 %v6470_v34, %v13309_v28  ;;  %v6483_v4 = vld [vmem:[%s13892_s5 + $0x178] sm:$0xff] }
 0x7b7   : > { %v6762_v58 = vpop.xlane.xlu1 %6761  ;;  %6707 = vadd.xlane.f32.xlu1 %v6706_v53  ;;  %v6693_v2 = vpop.xlane.xlu0 %6692  ;;  %v7699_v31 = vsel %vm7698_vm7, %v7175_v37, %v7166_v18  ;;  %v7229_v29 = vsel %vm7165_vm6, %v7228_v63, %v7224_v15  ;;  %v7282_v16 = vrot.slane %v13224_v14, %v13315_v56  ;;  %v6482_v53 = vld [vmem:[%s13892_s5 + $0x170] sm:$0xff]  ;;  %v7220_v46 = vsel %vm7165_vm6, %v7219_v12, %v7215_v45  ;;  %p9815_p2 = por %p9814_p1, %p9813_p0 }
 0x7b8   : > { %v7183_v36 = vrot.slane %v6693_v2, %v13315_v56  ;;  %v7233_v1 = vrot.slane %v6726_v8, %v13307_v30  ;;  %v7269_v63 = vrot.slane %v13107_v39, %v13307_v30  ;;  %v7278_v14 = vrot.slane %v13208_v17, %v13307_v30  ;;  %v6495_v39 = vld [vmem:[%s13892_s5 + $0x1d8] sm:$0xff] }
 0x7b9   : > { %v6781_v37 = vsel %vm6423_vm5, %v6591_v13, 0.0  ;;  %v6603_v2 = vmul.f32 %v6483_v4, %v13300_v35  ;;  %v7708_v34 = vsel %vm7698_vm7, %v7229_v29, %v7220_v46  ;;  %v6778_v12 = vsel %vm6423_vm5, %v6590_v6, 0.0  ;;  %p9816_p3 = pnand %p9815_p2, %p9809_p13 }
 0x7ba   : > { %v7184_v52 = vsel %vm7165_vm6, %v7183_v36, %v7179_v10  ;;  %6746 = vadd.xlane.f32.xlu0 %v6745_v9  ;;  %v6602_v8 = vmul.f32 %v6482_v53, %v13309_v28  ;;  %v7273_v17 = vrot.slane %v13098_v11, %v13315_v56  ;;  %v7283_v45 = vsel %vm7165_vm6, %v7282_v16, %v7278_v14  ;;  %v6494_v9 = vld [vmem:[%s13892_s5 + $0x1d0] sm:$0xff] }
 0x7bb   : > { %v13370_v0 = vsel %vm7700_vm8, %v7184_v52, %v7699_v31  ;;  %v6798_v59 = vpop.xlane.xlu1 %6797  ;;  %6743 = vadd.xlane.f32.xlu1 %v6742_v42  ;;  %v6729_v5 = vpop.xlane.xlu0 %6728  ;;  %v7287_v13 = vrot.slane %v6762_v58, %v13307_v30  ;;  %v6817_v11 = vsel %vm6423_vm5, %v6603_v2, 0.0  ;;  %v6615_v42 = vmul.f32 %v6495_v39, %v13300_v35  ;;  %v6507_v58 = vld [vmem:[%s13892_s5 + $0x238] sm:$0xff]  ;;  %v6518_v39 = vld [vmem:[%s13892_s5 + $0x290] sm:$0xff] }
 0x7bc   : > { %v7237_v19 = vrot.slane %v6729_v5, %v13315_v56  ;;  %v7274_v52 = vsel %vm7165_vm6, %v7273_v17, %v7269_v63  ;;  %v6814_v29 = vsel %vm6423_vm5, %v6602_v8, 0.0  ;;  %v6614_v16 = vmul.f32 %v6494_v9, %v13309_v28 }
 0x7bd   : > { %v7713_v6 = vsel %vm7698_vm7, %v7283_v45, %v7274_v52  ;;  %v6853_v14 = vsel %vm6423_vm5, %v6615_v42, 0.0  ;;  %v6638_v52 = vmul.f32 %v6518_v39, %v13309_v28 }
 0x7be   : > { %v7238_v10 = vsel %vm7165_vm6, %v7237_v19, %v7233_v1  ;;  %6782 = vadd.xlane.f32.xlu0 %v6781_v37  ;;  %v6506_v1 = vld [vmem:[%s13892_s5 + $0x230] sm:$0xff]  ;;  %v7341_v19 = vrot.slane %v6798_v59, %v13307_v30  ;;  %v6627_v37 = vmul.f32 %v6507_v58, %v13300_v35 }
 0x7bf   : > { %v13395_v36 = vsel %vm7700_vm8, %v7238_v10, %v7708_v34  ;;  %v6834_v18 = vpop.xlane.xlu1 %6833  ;;  %6779 = vadd.xlane.f32.xlu1 %v6778_v12  ;;  %v6765_v15 = vpop.xlane.xlu0 %6764  ;;  %v6850_v34 = vsel %vm6423_vm5, %v6614_v16, 0.0  ;;  %v6626_v10 = vmul.f32 %v6506_v1, %v13309_v28  ;;  %v6519_v12 = vld [vmem:[%s13892_s5 + $0x298] sm:$0xff]  ;;  %v6922_v1 = vsel %vm6423_vm5, %v6638_v52, 0.0 }
 0x7c0   : > { %v7291_v31 = vrot.slane %v6765_v15, %v13315_v56  ;;  %v7395_v17 = vrot.slane %v6834_v18, %v13307_v30  ;;  %v6889_v15 = vsel %vm6423_vm5, %v6627_v37, 0.0  ;;  %v6639_v9 = vmul.f32 %v6519_v12, %v13300_v35  ;;  %v6542_v37 = vld [vmem:[%s13892_s5 + $0x350] sm:$0xff] }
 0x7c2   : > { %v7292_v4 = vsel %vm7165_vm6, %v7291_v31, %v7287_v13  ;;  %6818 = vadd.xlane.f32.xlu0 %v6817_v11  ;;  %v6886_v31 = vsel %vm6423_vm5, %v6626_v10, 0.0  ;;  %v6531_v11 = vld [vmem:[%s13892_s5 + $0x2f8] sm:$0xff]  ;;  %v6925_v16 = vsel %vm6423_vm5, %v6639_v9, 0.0 }
 0x7c3   : > { %v13413_v5 = vsel %vm7700_vm8, %v7292_v4, %v7713_v6  ;;  %v6870_v53 = vpop.xlane.xlu1 %6869  ;;  %6815 = vadd.xlane.f32.xlu1 %v6814_v29  ;;  %v6801_v46 = vpop.xlane.xlu0 %6800  ;;  %v6530_v6 = vld [vmem:[%s13892_s5 + $0x2f0] sm:$0xff]  ;;  %v6651_v58 = vmul.f32 %v6531_v11, %v13300_v35 }
 0x7c4   : > { %v7345_v63 = vrot.slane %v6801_v46, %v13315_v56  ;;  %v7449_v4 = vrot.slane %v6870_v53, %v13307_v30 }
 0x7c5   : > { %v6961_v12 = vsel %vm6423_vm5, %v6651_v58, 0.0  ;;  %v7660_v58 = vrot.slane %v13295_v61, %v13315_v56 }
 0x7c6   : > { %v13423_v2 = vsel %vm7165_vm6, %v7345_v63, %v7341_v19  ;;  %6854 = vadd.xlane.f32.xlu0 %v6853_v14  ;;  %v6650_v19 = vmul.f32 %v6530_v6, %v13309_v28  ;;  %v6543_v63 = vld [vmem:[%s13892_s5 + $0x358] sm:$0xff] }
 0x7c7   : > { %v6906_v8 = vpop.xlane.xlu1 %6905  ;;  %6851 = vadd.xlane.f32.xlu1 %v6850_v34  ;;  %v6837_v59 = vpop.xlane.xlu0 %6836 }
 0x7c8   : > { %v7399_v45 = vrot.slane %v6837_v59, %v13315_v56  ;;  %v7503_v34 = vrot.slane %v6906_v8, %v13307_v30  ;;  %v6663_v59 = vmul.f32 %v6543_v63, %v13300_v35 }
 0x7ca   : > { %v13438_v13 = vsel %vm7165_vm6, %v7399_v45, %v7395_v17  ;;  %6890 = vadd.xlane.f32.xlu0 %v6889_v15  ;;  %v6958_v17 = vsel %vm6423_vm5, %v6650_v19, 0.0  ;;  %v6662_v45 = vmul.f32 %v6542_v37, %v13309_v28  ;;  %v6555_v15 = vld [vmem:[%s13892_s5 + $0x3b8] sm:$0xff] }
 0x7cb   : > { %v6942_v42 = vpop.xlane.xlu1 %6941  ;;  %6887 = vadd.xlane.f32.xlu1 %v6886_v31  ;;  %v6873_v18 = vpop.xlane.xlu0 %6872  ;;  %v6554_v31 = vld [vmem:[%s13892_s5 + $0x3b0] sm:$0xff]  ;;  %v6675_v6 = vmul.f32 %v6555_v15, %v13300_v35  ;;  %v7647_v35 = vrot.slane %v13180_v48, %v13307_v30 }
 0x7cc   : > { %v7453_v29 = vrot.slane %v6873_v18, %v13315_v56  ;;  %v7557_v52 = vrot.slane %v6942_v42, %v13307_v30  ;;  %v6997_v18 = vsel %vm6423_vm5, %v6663_v59, 0.0 }
 0x7cd   : > { %v7033_v37 = vsel %vm6423_vm5, %v6675_v6, 0.0 }
 0x7ce   : > { %v13453_v46 = vsel %vm7165_vm6, %v7453_v29, %v7449_v4  ;;  %6926 = vadd.xlane.f32.xlu0 %v6925_v16  ;;  %v6994_v29 = vsel %vm6423_vm5, %v6662_v45, 0.0  ;;  %v6674_v16 = vmul.f32 %v6554_v31, %v13309_v28 }
 0x7cf   : > { %v6978_v14 = vpop.xlane.xlu1 %6977  ;;  %6923 = vadd.xlane.f32.xlu1 %v6922_v1  ;;  %v6909_v53 = vpop.xlane.xlu0 %6908 }
 0x7d0   : > { %v7507_v10 = vrot.slane %v6909_v53, %v13315_v56  ;;  %v7611_v19 = vrot.slane %v6978_v14, %v13307_v30  ;;  %v7656_v53 = vrot.slane %v13290_v51, %v13307_v30  ;;  %v7030_v61 = vsel %vm6423_vm5, %v6674_v16, 0.0 }
 0x7d2   : > { %v13468_v39 = vsel %vm7165_vm6, %v7507_v10, %v7503_v34  ;;  %6962 = vadd.xlane.f32.xlu0 %v6961_v12  ;;  %v7651_v34 = vrot.slane %v13168_v40, %v13315_v56  ;;  %v7661_v14 = vsel %vm7165_vm6, %v7660_v58, %v7656_v53  ;;  %v7336_v58 = vrot.slane %v13238_v62, %v13315_v56 }
 0x7d3   : > { %v7014_v9 = vpop.xlane.xlu1 %7013  ;;  %6959 = vadd.xlane.f32.xlu1 %v6958_v17  ;;  %v6945_v8 = vpop.xlane.xlu0 %6944  ;;  %v7327_v62 = vrot.slane %v13109_v26, %v13315_v56  ;;  %v7386_v26 = vrot.slane %v13236_v41, %v13307_v30  ;;  %v7431_v41 = vrot.slane %v13128_v23, %v13307_v30 }
 0x7d4   : > { %v7561_v11 = vrot.slane %v6945_v8, %v13315_v56  ;;  %v7665_v48 = vrot.slane %v7014_v9, %v13307_v30  ;;  %v7652_v59 = vsel %vm7165_vm6, %v7651_v34, %v7647_v35 }
 0x7d5   : > { %v7748_v17 = vsel %vm7698_vm7, %v7661_v14, %v7652_v59 }
 0x7d6   : > { %v13483_v4 = vsel %vm7165_vm6, %v7561_v11, %v7557_v52  ;;  %6998 = vadd.xlane.f32.xlu0 %v6997_v18 }
 0x7d7   : > { %v6696_v1 = vpop.xlane.xlu1 %6695  ;;  %6995 = vadd.xlane.f32.xlu1 %v6994_v29  ;;  %v6981_v42 = vpop.xlane.xlu0 %6980 }
 0x7d8   : > { %v7615_v63 = vrot.slane %v6981_v42, %v13315_v56  ;;  %v7188_v31 = vrot.slane %v6696_v1, %v13307_v30  ;;  %v7323_v42 = vrot.slane %v13117_v47, %v13307_v30  ;;  %v7390_v47 = vrot.slane %v13252_v57, %v13315_v56 }
 0x7da   : > { %v13497_v28 = vsel %vm7165_vm6, %v7615_v63, %v7611_v19  ;;  %7034 = vadd.xlane.f32.xlu0 %v7033_v37 }
 0x7db   : > { %v6732_v10 = vpop.xlane.xlu1 %6731  ;;  %7031 = vadd.xlane.f32.xlu1 %v7030_v61  ;;  %v7017_v12 = vpop.xlane.xlu0 %7016 }
 0x7dc   : > { %v7669_v51 = vrot.slane %v7017_v12, %v13315_v56  ;;  %v7242_v29 = vrot.slane %v6732_v10, %v13307_v30  ;;  %v7377_v12 = vrot.slane %v13123_v38, %v13307_v30 }
 0x7de   : > { %v7670_v45 = vsel %vm7165_vm6, %v7669_v51, %v7665_v48  ;;  %v7381_v51 = vrot.slane %v13119_v25, %v13315_v56 }
 0x7df   : > { %v13509_v15 = vsel %vm7700_vm8, %v7670_v45, %v7748_v17  ;;  %v6768_v8 = vpop.xlane.xlu1 %6767  ;;  %v6699_v40 = vpop.xlane.xlu0 %6698  ;;  %v7391_v17 = vsel %vm7165_vm6, %v7390_v47, %v7386_v26 }
 0x7e0   : > { %v7192_v52 = vrot.slane %v6699_v40, %v13315_v56  ;;  %v7296_v53 = vrot.slane %v6768_v8, %v13307_v30  ;;  %v7382_v25 = vsel %vm7165_vm6, %v7381_v51, %v7377_v12 }
 0x7e2   : > { %v7193_v9 = vsel %vm7165_vm6, %v7192_v52, %v7188_v31  ;;  %v7440_v52 = vrot.slane %v13250_v43, %v13307_v30 }
 0x7e3   : > { %v6804_v11 = vpop.xlane.xlu1 %6803  ;;  %v6735_v18 = vpop.xlane.xlu0 %6734  ;;  %v13516_v6 = vsel %vm7702_vm9, %v7193_v9, %v13370_v0  ;;  %v7332_v0 = vrot.slane %v13222_v44, %v13307_v30 }
 0x7e4   : > { %v7246_v16 = vrot.slane %v6735_v18, %v13315_v56  ;;  %v7350_v48 = vrot.slane %v6804_v11, %v13307_v30  ;;  %v7723_v11 = vsel %vm7698_vm7, %v7391_v17, %v7382_v25  ;;  %v7498_v18 = vrot.slane %v13280_v21, %v13315_v56 }
 0x7e5   : > { %v7337_v61 = vsel %vm7165_vm6, %v7336_v58, %v7332_v0 }
 0x7e6   : > { %v7247_v1 = vsel %vm7165_vm6, %v7246_v16, %v7242_v29  ;;  %v7724_v29 = vsel %vm7700_vm8, %v13438_v13, %v7723_v11  ;;  %v7489_v13 = vrot.slane %v13130_v3, %v13315_v56 }
 0x7e7   : > { %v6840_v19 = vpop.xlane.xlu1 %6839  ;;  %v6771_v63 = vpop.xlane.xlu0 %6770  ;;  %v13527_v35 = vsel %vm7702_vm9, %v7247_v1, %v13395_v36  ;;  %v7328_v36 = vsel %vm7165_vm6, %v7327_v62, %v7323_v42  ;;  %v7494_v42 = vrot.slane %v13264_v49, %v13307_v30  ;;  %v7539_v62 = vrot.slane %v13146_v60, %v13307_v30 }
 0x7e8   : > { %v7300_v37 = vrot.slane %v6771_v63, %v13315_v56  ;;  %v7718_v59 = vsel %vm7698_vm7, %v7337_v61, %v7328_v36 }
 0x7e9   : > { %v7719_v38 = vsel %vm7700_vm8, %v13423_v2, %v7718_v59  ;;  %v7435_v2 = vrot.slane %v13125_v20, %v13315_v56  ;;  %v7485_v20 = vrot.slane %v13132_v54, %v13307_v30  ;;  %v7602_v59 = vrot.slane %v13285_v32, %v13307_v30 }
 0x7ea   : > { %v7301_v34 = vsel %vm7165_vm6, %v7300_v37, %v7296_v53  ;;  %v7499_v53 = vsel %vm7165_vm6, %v7498_v18, %v7494_v42  ;;  %v7552_v37 = vrot.slane %v13287_v7, %v13315_v56 }
 0x7eb   : > { %v6876_v14 = vpop.xlane.xlu1 %6875  ;;  %v6807_v10 = vpop.xlane.xlu0 %6806  ;;  %v13542_v44 = vsel %vm7702_vm9, %v7301_v34, %v13413_v5  ;;  %v7444_v5 = vrot.slane %v13266_v50, %v13315_v56  ;;  %v7404_v50 = vrot.slane %v6840_v19, %v13307_v30  ;;  %v7436_v43 = vsel %vm7165_vm6, %v7435_v2, %v7431_v41 }
 0x7ec   : > { %v7354_v57 = vrot.slane %v6807_v10, %v13315_v56  ;;  %v7458_v19 = vrot.slane %v6876_v14, %v13307_v30  ;;  %v7490_v3 = vsel %vm7165_vm6, %v7489_v13, %v7485_v20  ;;  %v7548_v34 = vrot.slane %v13278_v22, %v13307_v30 }
 0x7ed   : > { %v7445_v23 = vsel %vm7165_vm6, %v7444_v5, %v7440_v52  ;;  %v7733_v14 = vsel %vm7698_vm7, %v7499_v53, %v7490_v3  ;;  %v7606_v10 = vrot.slane %v13292_v24, %v13315_v56  ;;  %v7597_v5 = vrot.slane %v13148_v27, %v13315_v56 }
 0x7ee   : > { %v7355_v45 = vsel %vm7165_vm6, %v7354_v57, %v7350_v48  ;;  %v7728_v63 = vsel %vm7698_vm7, %v7445_v23, %v7436_v43  ;;  %v7553_v60 = vsel %vm7165_vm6, %v7552_v37, %v7548_v34  ;;  %v7734_v12 = vsel %vm7700_vm8, %v13468_v39, %v7733_v14 }
 0x7ef   : > { %v6912_v8 = vpop.xlane.xlu1 %6911  ;;  %v6843_v40 = vpop.xlane.xlu0 %6842  ;;  %v13562_v31 = vsel %vm7702_vm9, %v7355_v45, %v7719_v38  ;;  %v7729_v54 = vsel %vm7700_vm8, %v13453_v46, %v7728_v63  ;;  %v7543_v46 = vrot.slane %v13134_v33, %v13315_v56  ;;  %v7593_v33 = vrot.slane %v13166_v55, %v13307_v30 }
 0x7f0   : > { %v7408_v9 = vrot.slane %v6843_v40, %v13315_v56  ;;  %v7512_v36 = vrot.slane %v6912_v8, %v13307_v30  ;;  %v7607_v38 = vsel %vm7165_vm6, %v7606_v10, %v7602_v59 }
 0x7f1   : > { %v7544_v22 = vsel %vm7165_vm6, %v7543_v46, %v7539_v62  ;;  %v7598_v32 = vsel %vm7165_vm6, %v7597_v5, %v7593_v33 }
 0x7f2   : > { %v7409_v16 = vsel %vm7165_vm6, %v7408_v9, %v7404_v50  ;;  %v7738_v39 = vsel %vm7698_vm7, %v7553_v60, %v7544_v22  ;;  %v7743_v52 = vsel %vm7698_vm7, %v7607_v38, %v7598_v32 }
 0x7f3   : > { %v6879_v58 = vpop.xlane.xlu0 %6878  ;;  %v13580_v1 = vsel %vm7702_vm9, %v7409_v16, %v7724_v29  ;;  %v6948_v0 = vpop.xlane.xlu1 %6947  ;;  %v7739_v45 = vsel %vm7700_vm8, %v13483_v4, %v7738_v39  ;;  %v7744_v50 = vsel %vm7700_vm8, %v13497_v28, %v7743_v52 }
 0x7f4   : > { %v7462_v21 = vrot.slane %v6879_v58, %v13315_v56  ;;  %v7566_v24 = vrot.slane %v6948_v0, %v13307_v30 }
 0x7f6   : > { %v7463_v49 = vsel %vm7165_vm6, %v7462_v21, %v7458_v19 }
 0x7f7   : > { %v6915_v61 = vpop.xlane.xlu0 %6914  ;;  %v13600_v47 = vsel %vm7702_vm9, %v7463_v49, %v7729_v54  ;;  %v6984_v48 = vpop.xlane.xlu1 %6983 }
 0x7f8   : > { %v7516_v7 = vrot.slane %v6915_v61, %v13315_v56  ;;  %v7620_v40 = vrot.slane %v6984_v48, %v13307_v30 }
 0x7fa   : > { %v7517_v26 = vsel %vm7165_vm6, %v7516_v7, %v7512_v36 }
 0x7fb   : > { %v6951_v57 = vpop.xlane.xlu0 %6950  ;;  %v13618_v51 = vsel %vm7702_vm9, %v7517_v26, %v7734_v12  ;;  %v7020_v27 = vpop.xlane.xlu1 %7019 }
 0x7fc   : > { %v7570_v17 = vrot.slane %v6951_v57, %v13315_v56  ;;  %v7674_v11 = vrot.slane %v7020_v27, %v13307_v30 }
 0x7fe   : > { %v7571_v41 = vsel %vm7165_vm6, %v7570_v17, %v7566_v24 }
 0x7ff   : > { %v6987_v55 = vpop.xlane.xlu0 %6986  ;;  %v13634_v8 = vsel %vm7702_vm9, %v7571_v41, %v7739_v45 }
 0x800   : > { %v7624_v25 = vrot.slane %v6987_v55, %v13315_v56 }
 0x802   : > { %v7625_v4 = vsel %vm7165_vm6, %v7624_v25, %v7620_v40 }
 0x803   : > { %v7023_v9 = vpop.xlane.xlu0 %7022  ;;  %v13644_v2 = vsel %vm7702_vm9, %v7625_v4, %v7744_v50 }
 0x804   : > { %v7678_v23 = vrot.slane %v7023_v9, %v13315_v56 }
 0x806   : > { %v7679_v18 = vsel %vm7165_vm6, %v7678_v23, %v7674_v11 }
 0x807   : > { %v13651_v29 = vsel %vm7702_vm9, %v7679_v18, %v13509_v15 }
 0x810   : > { %v6705_v16 = vpop.xlane.xlu0 %6704 }
 0x811   : > { %v6702_v43 = vpop.xlane.xlu1 %6701  ;;  %v7201_v34 = vrot.slane %v6705_v16, %v13315_v56 }
 0x812   : > { %v7197_v36 = vrot.slane %v6702_v43, %v13307_v30 }
 0x814   : > { %v6741_v58 = vpop.xlane.xlu0 %6740  ;;  %v7202_v14 = vsel %vm7165_vm6, %v7201_v34, %v7197_v36 }
 0x815   : > { %v6738_v28 = vpop.xlane.xlu1 %6737  ;;  %v7255_v60 = vrot.slane %v6741_v58, %v13315_v56  ;;  %v7705_v24 = vsel %vm7704_vm10, %v7202_v14, %v13516_v6 }
 0x816   : > { %v7251_v10 = vrot.slane %v6738_v28, %v13307_v30 }
 0x818   : > { %v6777_v20 = vpop.xlane.xlu0 %6776  ;;  %v7256_v17 = vsel %vm7165_vm6, %v7255_v60, %v7251_v10 }
 0x819   : > { %v6774_v42 = vpop.xlane.xlu1 %6773  ;;  %v7309_v48 = vrot.slane %v6777_v20, %v13315_v56  ;;  %v7711_v6 = vsel %vm7704_vm10, %v7256_v17, %v13527_v35 }
 0x81a   : > { %v7305_v57 = vrot.slane %v6774_v42, %v13307_v30 }
 0x81c   : > { %v6813_v19 = vpop.xlane.xlu0 %6812  ;;  %v7310_v55 = vsel %vm7165_vm6, %v7309_v48, %v7305_v57 }
 0x81d   : > { %v6810_v21 = vpop.xlane.xlu1 %6809  ;;  %v7363_v25 = vrot.slane %v6813_v19, %v13315_v56  ;;  %v7716_v43 = vsel %vm7704_vm10, %v7310_v55, %v13542_v44 }
 0x81e   : > { %v7359_v52 = vrot.slane %v6810_v21, %v13307_v30 }
 0x820   : > { %v6849_v13 = vpop.xlane.xlu0 %6848  ;;  %v7364_v58 = vsel %vm7165_vm6, %v7363_v25, %v7359_v52 }
 0x821   : > { %v6846_v63 = vpop.xlane.xlu1 %6845  ;;  %v7417_v23 = vrot.slane %v6849_v13, %v13315_v56  ;;  %v7721_v44 = vsel %vm7704_vm10, %v7364_v58, %v13562_v31 }
 0x822   : > { %v7413_v18 = vrot.slane %v6846_v63, %v13307_v30 }
 0x824   : > { %v13653_v0 = vpop.xlane.xlu0 %6884  ;;  %v7418_v13 = vsel %vm7165_vm6, %v7417_v23, %v7413_v18 }
 0x825   : > { %v13655_v53 = vpop.xlane.xlu1 %6881  ;;  %v7471_v36 = vrot.slane %v13653_v0, %v13315_v56 }
 0x828   : > { %v13657_v37 = vpop.xlane.xlu0 %6920 }
 0x829   : > { %v13659_v54 = vpop.xlane.xlu1 %6917 }
 0x82a   : > { %v7521_v31 = vrot.slane %v13659_v54, %v13307_v30 }
 0x82c   : > { %v13661_v15 = vpop.xlane.xlu0 %6956 }
 0x82d   : > { %v13663_v49 = vpop.xlane.xlu1 %6953 }
 0x830   : > { %v13665_v62 = vpop.xlane.xlu0 %6992 }
 0x831   : > { %v13667_v61 = vpop.xlane.xlu1 %6989  ;;  %v7633_v25 = vrot.slane %v13665_v62, %v13315_v56 }
 0x834   : > { %v13669_v3 = vpop.xlane.xlu0 %7028 }
 0x835   : > { %v13673_v7 = vpop.xlane.xlu1 %7025 }
 0x843   : > { %v6711_v46 = vpop.xlane.xlu0 %6710 }
 0x844   : > { %v7210_v12 = vrot.slane %v6711_v46, %v13315_v56  ;;  %v6708_v26 = vpop.xlane.xlu1 %6707  ;;  %v7467_v46 = vrot.slane %v13655_v53, %v13307_v30  ;;  %v7726_v53 = vsel %vm7704_vm10, %v7418_v13, %v13580_v1 }
 0x845   : > { %v7206_v22 = vrot.slane %v6708_v26, %v13307_v30 }
 0x846   : > { %v7472_v57 = vsel %vm7165_vm6, %v7471_v36, %v7467_v46 }
 0x847   : > { %v6747_v33 = vpop.xlane.xlu0 %6746  ;;  %v7211_v59 = vsel %vm7165_vm6, %v7210_v12, %v7206_v22  ;;  %v7525_v22 = vrot.slane %v13657_v37, %v13315_v56  ;;  %v7731_v1 = vsel %vm7704_vm10, %v7472_v57, %v13600_v47  ;;  %v7629_v47 = vrot.slane %v13667_v61, %v13307_v30 }
 0x848   : > { %v7264_v39 = vrot.slane %v6747_v33, %v13315_v56  ;;  %v6744_v5 = vpop.xlane.xlu1 %6743  ;;  %v7707_v38 = vsel %vm7706_vm11, %v7211_v59, %v7705_v24 }
 0x849   : > { %v7260_v45 = vrot.slane %v6744_v5, %v13307_v30  ;;  %v7764_v41 = vsel %vm7763_vm12, %v7707_v38, 0.0  ;;  %v7526_v54 = vsel %vm7165_vm6, %v7525_v22, %v7521_v31  ;;  %v7579_v38 = vrot.slane %v13661_v15, %v13315_v56 }
 0x84a   : > { %7765 = vadd.xlane.f32.xlu1 %v7764_v41  ;;  %v7634_v61 = vsel %vm7165_vm6, %v7633_v25, %v7629_v47 }
 0x84b   : > { %v6783_v32 = vpop.xlane.xlu0 %6782  ;;  %v7265_v40 = vsel %vm7165_vm6, %v7264_v39, %v7260_v45  ;;  %v7575_v45 = vrot.slane %v13663_v49, %v13307_v30  ;;  %v7736_v49 = vsel %vm7704_vm10, %v7526_v54, %v13618_v51 }
 0x84c   : > { %v7318_v27 = vrot.slane %v6783_v32, %v13315_v56  ;;  %v6780_v50 = vpop.xlane.xlu1 %6779  ;;  %v7712_v4 = vsel %vm7706_vm11, %v7265_v40, %v7711_v6 }
 0x84d   : > { %v7314_v9 = vrot.slane %v6780_v50, %v13307_v30  ;;  %v7767_v11 = vsel %vm7763_vm12, %v7712_v4, 0.0 }
 0x84e   : > { %7768 = vadd.xlane.f32.xlu0 %v7767_v11 }
 0x84f   : > { %v6819_v16 = vpop.xlane.xlu0 %6818  ;;  %v7319_v35 = vsel %vm7165_vm6, %v7318_v27, %v7314_v9  ;;  %v7580_v27 = vsel %vm7165_vm6, %v7579_v38, %v7575_v45 }
 0x850   : > { %v7372_v28 = vrot.slane %v6819_v16, %v13315_v56  ;;  %v6816_v20 = vpop.xlane.xlu1 %6815  ;;  %v7717_v42 = vsel %vm7706_vm11, %v7319_v35, %v7716_v43  ;;  %v7741_v51 = vsel %vm7704_vm10, %v7580_v27, %v13634_v8  ;;  %v7687_v16 = vrot.slane %v13669_v3, %v13315_v56 }
 0x851   : > { %v7368_v19 = vrot.slane %v6816_v20, %v13307_v30  ;;  %v7770_v21 = vsel %vm7763_vm12, %v7717_v42, 0.0  ;;  %v7683_v35 = vrot.slane %v13673_v7, %v13307_v30  ;;  %v7746_v8 = vsel %vm7704_vm10, %v7634_v61, %v13644_v2 }
 0x852   : > { %7771 = vadd.xlane.f32.xlu1 %v7770_v21 }
 0x853   : > { %v6855_v63 = vpop.xlane.xlu0 %6854  ;;  %v7373_v34 = vsel %vm7165_vm6, %v7372_v28, %v7368_v19  ;;  %v7688_v3 = vsel %vm7165_vm6, %v7687_v16, %v7683_v35 }
 0x854   : > { %v7426_v14 = vrot.slane %v6855_v63, %v13315_v56  ;;  %v6852_v60 = vpop.xlane.xlu1 %6851  ;;  %v7722_v10 = vsel %vm7706_vm11, %v7373_v34, %v7721_v44  ;;  %v7751_v46 = vsel %vm7704_vm10, %v7688_v3, %v13651_v29 }
 0x855   : > { %v7422_v12 = vrot.slane %v6852_v60, %v13307_v30  ;;  %v7773_v26 = vsel %vm7763_vm12, %v7722_v10, 0.0 }
 0x856   : > { %7774 = vadd.xlane.f32.xlu0 %v7773_v26 }
 0x857   : > { %v6891_v0 = vpop.xlane.xlu0 %6890  ;;  %v7427_v48 = vsel %vm7165_vm6, %v7426_v14, %v7422_v12 }
 0x858   : > { %v7480_v33 = vrot.slane %v6891_v0, %v13315_v56  ;;  %v6888_v59 = vpop.xlane.xlu1 %6887  ;;  %v7727_v24 = vsel %vm7706_vm11, %v7427_v48, %v7726_v53 }
 0x859   : > { %v7476_v17 = vrot.slane %v6888_v59, %v13307_v30  ;;  %v7776_v37 = vsel %vm7763_vm12, %v7727_v24, 0.0 }
 0x85a   : > { %7777 = vadd.xlane.f32.xlu1 %v7776_v37 }
 0x85b   : > { %v6927_v39 = vpop.xlane.xlu0 %6926  ;;  %v7481_v5 = vsel %vm7165_vm6, %v7480_v33, %v7476_v17 }
 0x85c   : > { %v7534_v41 = vrot.slane %v6927_v39, %v13315_v56  ;;  %v6924_v55 = vpop.xlane.xlu1 %6923  ;;  %v7732_v32 = vsel %vm7706_vm11, %v7481_v5, %v7731_v1 }
 0x85d   : > { %v7530_v40 = vrot.slane %v6924_v55, %v13307_v30  ;;  %v7779_v6 = vsel %vm7763_vm12, %v7732_v32, 0.0 }
 0x85e   : > { %7780 = vadd.xlane.f32.xlu0 %v7779_v6 }
 0x85f   : > { %v6963_v15 = vpop.xlane.xlu0 %6962  ;;  %v7535_v52 = vsel %vm7165_vm6, %v7534_v41, %v7530_v40 }
 0x860   : > { %v7588_v50 = vrot.slane %v6963_v15, %v13315_v56  ;;  %v6960_v4 = vpop.xlane.xlu1 %6959  ;;  %v7737_v9 = vsel %vm7706_vm11, %v7535_v52, %v7736_v49  ;;  %v8268_v52 = vld [vmem:[%s13893_s6] ss:$0 sm:$0xff] }
 0x861   : > { %v7584_v11 = vrot.slane %v6960_v4, %v13307_v30  ;;  %v7782_v62 = vsel %vm7763_vm12, %v7737_v9, 0.0 }
 0x862   : > { %7783 = vadd.xlane.f32.xlu1 %v7782_v62 }
 0x863   : > { %v6999_v23 = vpop.xlane.xlu0 %6998  ;;  %v7589_v18 = vsel %vm7165_vm6, %v7588_v50, %v7584_v11 }
 0x864   : > { %v7642_v43 = vrot.slane %v6999_v23, %v13315_v56  ;;  %v6996_v58 = vpop.xlane.xlu1 %6995  ;;  %v7742_v28 = vsel %vm7706_vm11, %v7589_v18, %v7741_v51 }
 0x865   : > { %v7638_v20 = vrot.slane %v6996_v58, %v13307_v30  ;;  %v7785_v42 = vsel %vm7763_vm12, %v7742_v28, 0.0 }
 0x866   : > { %7786 = vadd.xlane.f32.xlu0 %v7785_v42 }
 0x867   : > { %v7035_v19 = vpop.xlane.xlu0 %7034  ;;  %v7643_v21 = vsel %vm7165_vm6, %v7642_v43, %v7638_v20 }
 0x868   : > { %v7696_v7 = vrot.slane %v7035_v19, %v13315_v56  ;;  %v7032_v13 = vpop.xlane.xlu1 %7031  ;;  %v7747_v63 = vsel %vm7706_vm11, %v7643_v21, %v7746_v8 }
 0x869   : > { %v7692_v34 = vrot.slane %v7032_v13, %v13307_v30  ;;  %v7788_v44 = vsel %vm7763_vm12, %v7747_v63, 0.0 }
 0x86a   : > { %7789 = vadd.xlane.f32.xlu1 %v7788_v44 }
 0x86b   : > { %v7697_v36 = vsel %vm7165_vm6, %v7696_v7, %v7692_v34 }
 0x86c   : > { %v7752_v14 = vsel %vm7706_vm11, %v7697_v36, %v7751_v46 }
 0x86d   : > { %v7791_v2 = vsel %vm7763_vm12, %v7752_v14, 0.0 }
 0x86e   : > { %7792 = vadd.xlane.f32.xlu0 %v7791_v2 }
 0x8d7   : > { %v7766_v60 = vpop.xlane.xlu1 %7765 }
 0x8d8   : > { %v7807_v53 = vrot.slane %v7766_v60, %v13307_v30 }
 0x8db   : > { %v7769_v10 = vpop.xlane.xlu0 %7768 }
 0x8dc   : > { %v7811_v31 = vrot.slane %v7769_v10, %v13307_v30 }
 0x8de   : > { %v7844_v59 = vsel %vm7698_vm7, %v7811_v31, %v7807_v53 }
 0x8df   : > { %v7772_v12 = vpop.xlane.xlu1 %7771 }
 0x8e0   : > { %v7815_v0 = vrot.slane %v7772_v12, %v13307_v30 }
 0x8e2   : > { %v7845_v17 = vsel %vm7700_vm8, %v7815_v0, %v7844_v59 }
 0x8e3   : > { %v7775_v26 = vpop.xlane.xlu0 %7774 }
 0x8e4   : > { %v7819_v57 = vrot.slane %v7775_v26, %v13307_v30 }
 0x8e6   : > { %v7846_v54 = vsel %vm7702_vm9, %v7819_v57, %v7845_v17 }
 0x8e7   : > { %v7778_v22 = vpop.xlane.xlu1 %7777 }
 0x8e8   : > { %v7823_v29 = vrot.slane %v7778_v22, %v13307_v30 }
 0x8ea   : > { %v7847_v39 = vsel %vm7704_vm10, %v7823_v29, %v7846_v54 }
 0x8eb   : > { %v7781_v48 = vpop.xlane.xlu0 %7780 }
 0x8ec   : > { %v7827_v24 = vrot.slane %v7781_v48, %v13307_v30 }
 0x8ee   : > { %v7848_v1 = vsel %vm7706_vm11, %v7827_v24, %v7847_v39 }
 0x8ef   : > { %v7784_v33 = vpop.xlane.xlu1 %7783 }
 0x8f0   : > { %v7831_v37 = vrot.slane %v7784_v33, %v13307_v30 }
 0x8f2   : > { %v7850_v45 = vsel %vm7849_vm13, %v7831_v37, %v7848_v1 }
 0x8f3   : > { %v7787_v5 = vpop.xlane.xlu0 %7786 }
 0x8f4   : > { %v7835_v38 = vrot.slane %v7787_v5, %v13307_v30 }
 0x8f6   : > { %v7852_v41 = vsel %vm7851_vm14, %v7835_v38, %v7850_v45 }
 0x8f7   : > { %v7856_v55 = vsel %vm6423_vm5, %v7852_v41, 0.0  ;;  %v7790_v32 = vpop.xlane.xlu1 %7789 }
 0x8f8   : > { %7857 = vadd.xlane.f32.xlu1 %v7856_v55  ;;  %v7839_v6 = vrot.slane %v7790_v32, %v13307_v30 }
 0x8fb   : > { %v7793_v40 = vpop.xlane.xlu0 %7792 }
 0x8fc   : > { %v7843_v25 = vrot.slane %v7793_v40, %v13307_v30 }
 0x8fe   : > { %v7853_v47 = vsel %vm7698_vm7, %v7843_v25, %v7839_v6 }
 0x8ff   : > { %v7860_v15 = vsel %vm7859_vm15, %v7853_v47, 0.0 }
 0x900   : > { %7861 = vadd.xlane.f32.xlu0 %v7860_v15 }
 0x909   : > { %7870 = vbcast.lane.b32.xlu1 %v8268_v52, 256 }
 0x916   : > { %7874 = vbcast.lane.b32.xlu0 %v8268_v52, 264 }
 0x985   : > { %v7858_v49 = vpop.xlane.xlu1 %7857 }
 0x989   : > { %v7871_v27 = vpop.permute.xlu1 %7870 }
 0x98a   : > { %v7878_v50 = vadd.f32 %v7871_v27, %v7858_v49 }
 0x98c   : > { %7883 = vperm.xlu1 %9801, %v7878_v50  }
 0x98d   : > { %v7862_v4 = vpop.xlane.xlu0 %7861 }
 0x991   : > { %v7875_v9 = vpop.permute.xlu0 %7874 }
 0x992   : > { %v7879_v11 = vadd.f32 %v7875_v9, %v7862_v4 }
 0x994   : > { %7886 = vperm.xlu1 %9801, %v7879_v11  }
 0x995   : > { %9819 = shalt.err (!%p9816_p3)
}
 0x996   : > { %s9820_s25 = scalar_lea.hbm %s13810_s19, 1536  ;;  %s9824_s17 = scalar_lea.hbm %s13895_s8, 3072 }
 0x997   : > { %p9821_p4 = scmp.ne.s32.totalorder %s13810_s19, %s9820_s25  ;;  %p9825_p9 = scmp.lt.u32.totalorder %s13810_s19, %s13895_s8 }
 0x998   : > { %p9826_p10 = scmp.lt.u32.totalorder %s9824_s17, %s9820_s25  ;;  %p9828_p12 = scmp.lt.u32.totalorder %s9820_s25, %s13810_s19 }
 0x999   : > { %p9822_p7 = pnand %p9821_p4, %p10008_p5 }
 0x99a   : > { %p9827_p11 = por %p9826_p10, %p9825_p9 }
 0x99b   : > { %p9823_p8 = pneg %p9822_p7 }
 0x99c   : > { %p9829_p13 = por %p9828_p12, %p9827_p11 }
 0x99e   : > { %p9830_p0 = pnand %p9829_p13, %p9823_p8 }
 0x9a0   : > { %9833 = shalt.err (!%p9830_p0)
}
 0x9a1   : > { %s9922_s21 = smov 128   ;;  %s9923_s24 = smov 8   ;;  %vm7898_vm0 = vcmask 73728  }
 0x9a2   : > { %9557 = dma.vmem_to_hbm [thread:$0]  (%p10008_p5), %s13805_s12, 1536, %s13810_s19, %s7905_s20, %s9922_s21, %s9922_s21, %s9923_s24  }
 0x9a3   : > { %s8269_s23 = sshll.u32 %s9991_s9, 4  ;;  %s299_s10 = scalar_lea.vmem [#allocation2], %s12657_s26 }
 0x9a4   : > { %s7918_s25 = sshll.u32 %s299_s10, 4  ;;  %s13843_s18 = scalar_lea.hbm %s13894_s7, %s8269_s23  ;;  %s13845_s25 = int_to_ptr.vmem [resolvable:$true] %s7918_s25 }
 0x9a5   : > { %s7901_s9 = scalar_lea.sflag [#allocation3], %s12657_s26  ;;  %s9834_s12 = scalar_lea.vmem %s13845_s25, 16 }
 0x9a6   : > { %p9835_p1 = scmp.ne.s32.totalorder %s13845_s25, %s9834_s12  ;;  %s9924_s19 = smov [#allocation2]  }
 0x9a7   : > { %s9838_s20 = sshll.u32 %s9924_s19, 4  ;;  %s9839_s20 = int_to_ptr.vmem [resolvable:$false] %s9838_s20 }
 0x9a8   : > { %p9836_p2 = pnand %p9835_p1, %p10008_p5  ;;  %s9840_s22 = scalar_lea.vmem %s9839_s20, 32 }
 0x9a9   : > { %p9841_p4 = scmp.lt.s32.totalorder %s13845_s25, %s9839_s20  ;;  %p9842_p7 = scmp.lt.s32.totalorder %s9840_s22, %s9834_s12 }
 0x9aa   : > { %p9837_p3 = pneg %p9836_p2 }
 0x9ab   : > { %p9843_p8 = por %p9842_p7, %p9841_p4 }
 0x9ad   : > { %p9844_p9 = pnand %p9843_p8, %p9837_p3 }
 0xa0b   : > { %v7884_v62 = vpop.permute.xlu1 %7883 }
 0xa0c   : > { %v7891_v23 = vrot.slane %v7884_v62, %v13307_v30 }
 0xa13   : > { %v7887_v61 = vpop.permute.xlu1 %7886 }
 0xa14   : > { %v7895_v18 = vrot.slane %v7887_v61, %v13315_v56 }
 0xa16   : > { %v7896_v51 = vsel %vm7165_vm6, %v7895_v18, %v7891_v23 }
 0xa17   : > { %7899 = vst.msk [vmem:[%s299_s10] sm:$0x1] %vm7898_vm0, %v7896_v51 }
 0xa18   : > { %9847 = shalt.err (!%p9844_p9)
}
 0xa19   : > { %s9848_s26 = scalar_lea.hbm %s13843_s18, 16  ;;  %s9852_s23 = scalar_lea.hbm %s13894_s7, 32 }
 0xa1a   : > { %p9849_p10 = scmp.ne.s32.totalorder %s13843_s18, %s9848_s26  ;;  %p9853_p13 = scmp.lt.u32.totalorder %s13843_s18, %s13894_s7 }
 0xa1b   : > { %p9854_p0 = scmp.lt.u32.totalorder %s9852_s23, %s9848_s26  ;;  %p9856_p2 = scmp.lt.u32.totalorder %s9848_s26, %s13843_s18 }
 0xa1c   : > { %p9850_p11 = pnand %p9849_p10, %p10008_p5 }
 0xa1d   : > { %p9855_p1 = por %p9854_p0, %p9853_p13 }
 0xa1e   : > { %p9851_p12 = pneg %p9850_p11 }
 0xa1f   : > { %p9857_p3 = por %p9856_p2, %p9855_p1 }
 0xa21   : > { %p9858_p4 = pnand %p9857_p3, %p9851_p12 }
 0xa23   : > { %9861 = shalt.err (!%p9858_p4)
}
 0xa24   : > { %9556 = dma.vmem_to_hbm [thread:$0]  (%p10008_p5), %s13845_s25, 16, %s13843_s18, %s7901_s9  }
 0xa25 PF: > { %p9567_p7 = scmp.ge.s32.totalorder %s9900_s30, 2  ;;  %s7946_s17 = sand.u32 1, %s9888_s27  }
 0xa26   : > { %s7947_s12 = scalar_lea.sflag [#allocation3], %s7946_s17 }
 0xa27   : > { %p9561_p8 = pnand %p9567_p7, %p10012_p6 }
 0xa29   : > { %9879 = dma.done.wait (!%p9561_p8), %s7947_s12, 16  }
 0xa2a   : > { %9881 = vsyncadd (!%p9561_p8), %s7947_s12, 4294967280  ;;  %s7955_s19 = scalar_lea.sflag [#allocation5], %s7946_s17 }
 0xa2b   : > { %9883 = dma.done.wait (!%p9561_p8), %s7955_s19, 1536  }
 0xa2c   : > { %9885 = vsyncadd (!%p9561_p8), %s7955_s19, 4294965760  ;;  %p22_p5 = scmp.ge.s32.totalorder %s9995_s11, 4   ;;  %s13910_s27 = smov %s9892_s28 }
 0xa2d   : > { %s13911_s28 = smov %s9896_s29  ;;  %s13912_s29 = smov %s10006_s14 }
 0xa2e   : > { %s13913_s30 = smov %s9995_s11  ;;  %24 = sbr.rel (!%p22_p5) target bundleno = 5 (0x5), region = 100 }
 0xa35   :  { %7960 = vsyncpa [#allocation3], 1 }
 0xa36   :  { %7962 = vsyncpa [#allocation3 + $0x1], 1 }
 0xa37   :  { %7963 = vsyncpa [#allocation5], 1 }
 0xa38   :  { %7965 = vsyncpa [#allocation5 + $0x1], 1 }

</bundles_post_ra>
